<compile_context>
chip_gen: v6e
topology: v6e:2x2x1
jax: 0.10.0
libtpu: 0.0.40
codegen_flags: <defaults>
</compile_context>

<pallas_src>
import functools
import math

import numpy as np

import jax
import jax.numpy as jnp
from jax.experimental import pallas as pl
from jax.experimental.pallas import tpu as pltpu

LEAKY_SLOPE = 0.2
_BIAS_ORDER = ("rgb7", "rgb8", "p1", "p2", "f1", "f2", "f3")


# ----------------------------------------------------------------------------
# Packed-weight layout (row offsets inside the single bf16 weight buffer)
# ----------------------------------------------------------------------------
def _weight_layout(C, c1, hw2):
  segs = (("rgb7", c1), ("rgb8", c1), ("p1", 9 * C), ("p2", 9 * C),
          ("f1", 9 * (C + 1)), ("f2", hw2 * C), ("f3", C), ("bias", 8))
  off, cur = {}, 0
  for name, rows in segs:
    off[name] = cur
    cur += rows
    cur += (-cur) % 8            # keep every segment start sublane-aligned
  return off, cur


# ----------------------------------------------------------------------------
# Fused Pallas kernel
# ----------------------------------------------------------------------------
def _discriminator_fused_kernel(
    alpha_ref,        # SMEM (1,) f32                     fade-in blend factor
    xcat_ref,         # VMEM (M, c1) bf16                 [image | class chan], batch-major rows
    w_ref,            # VMEM (Wrows, C) bf16              all weights + biases, packed
    pool_ref,         # VMEM (M2, M) bf16                 2x2 avg-pool (batch-major 8x8 -> pixel-major 4x4)
    bmean_ref,        # VMEM (M2, M2) bf16                per-pixel batch-mean matrix
    mask8_ref,        # VMEM (M, 9*C) f32                 3x3 conv validity mask, 8x8 stage
    mask4_ref,        # VMEM (M2, 9*(C+1)) f32            3x3 conv validity mask, 4x4 stage
    out_ref,          # VMEM (B, 1) f32
    strip8_ref,       # scratch (2*pad8 + M, C) f32       zero-padded 8x8 strip
    strip4_ref,       # scratch (2*pad4 + M2, C+1) f32    zero-padded 4x4 strip (+ std channel)
    col_ref,          # scratch (M, 9*(C+1)) f32          im2col buffer (shared by all 3x3 convs)
    g_ref,            # scratch (B, hw2*C) f32            per-batch flattened 4x4 features
    *, B, H, W, C, c1, pad8, pad4, off):
  f32, bf16 = jnp.float32, jnp.bfloat16
  H2, W2 = H // 2, W // 2
  hw2 = H2 * W2
  M, M2 = B * H * W, B * hw2

  def mm(a, b):
    return jnp.dot(a.astype(bf16), b.astype(bf16), preferred_element_type=f32)

  def lrelu(v):
    return jnp.where(v >= 0.0, v, LEAKY_SLOPE * v)

  def w_at(name, rows):
    return w_ref[off[name]:off[name] + rows, :]

  def bias(name):
    r = off["bias"] + _BIAS_ORDER.index(name)
    return w_ref[r:r + 1, :]                      # (1, C) bf16, broadcasts over rows

  def conv3x3(strip, w, b, mask, m, cin, pad, offs):
    # 3x3 'same' conv: 9 shifted copies into the im2col scratch, one mask multiply,
    # ONE (m, 9*cin) @ (9*cin, C) MXU matmul.
    for k, o in enumerate(offs):
      col_ref[0:m, k * cin:(k + 1) * cin] = strip[pad + o:pad + o + m, 0:cin]
    a = col_ref[0:m, 0:9 * cin] * mask
    return lrelu(mm(a, w) + b)

  xcat = xcat_ref[...]                                               # (M, c1) bf16

  # ---- out = leaky(rgb_layers[cur_step](x))  (1x1 conv) ----------------------
  out8 = lrelu(mm(xcat, w_at("rgb7", c1)) + bias("rgb7"))            # (M, C) f32

  # ---- prog_blocks[cur_step]: two 3x3 convs + leaky ---------------------------
  strip8_ref[0:pad8, :] = jnp.zeros((pad8, C), f32)                  # zero pads once
  strip8_ref[pad8 + M:2 * pad8 + M, :] = jnp.zeros((pad8, C), f32)
  offs8 = [di * W + dj for di in (-1, 0, 1) for dj in (-1, 0, 1)]
  mask8 = mask8_ref[...]
  strip8_ref[pad8:pad8 + M, :] = out8
  out8 = conv3x3(strip8_ref, w_at("p1", 9 * C), bias("p1"), mask8, M, C, pad8, offs8)
  strip8_ref[pad8:pad8 + M, :] = out8
  out8 = conv3x3(strip8_ref, w_at("p2", 9 * C), bias("p2"), mask8, M, C, pad8, offs8)

  # ---- 2x2 avg-pools (precomputed matrix; pooled rows are pixel-major) --------
  pool = pool_ref[...]                                               # (M2, M) bf16
  out4 = mm(pool, out8)                                              # avg_pool(prog_block(out))
  down = lrelu(mm(mm(pool, xcat), w_at("rgb8", c1)) + bias("rgb8"))  # rgb(avg_pool(x))

  # ---- fade_in -----------------------------------------------------------------
  a = alpha_ref[0]
  out4 = a * out4 + (1.0 - a) * down                                 # (M2, C) f32

  # ---- minibatch_std: biased std over batch per (pixel, chan), then mean -------
  bmean = bmean_ref[...]                                             # (M2, M2) bf16
  mu = mm(bmean, out4)
  d = out4 - mu
  std = jnp.sqrt(mm(bmean, d * d))                                   # per-pixel std, replicated over batch rows
  stat = jnp.sum(std, axis=1, keepdims=True)
  stat = jnp.sum(stat, axis=0, keepdims=True) * (1.0 / (M2 * C))     # (1, 1)

  # ---- final_block[0]: 3x3 conv (C+1 -> C) + leaky; std channel written directly
  strip4_ref[0:pad4, :] = jnp.zeros((pad4, C + 1), f32)
  strip4_ref[pad4 + M2:2 * pad4 + M2, :] = jnp.zeros((pad4, C + 1), f32)
  strip4_ref[pad4:pad4 + M2, 0:C] = out4
  strip4_ref[pad4:pad4 + M2, C:C + 1] = jnp.broadcast_to(stat, (M2, 1))
  offs4 = [(di * W2 + dj) * B for di in (-1, 0, 1) for dj in (-1, 0, 1)]
  f1 = conv3x3(strip4_ref, w_at("f1", 9 * (C + 1)), bias("f1"),
               mask4_ref[...], M2, C + 1, pad4, offs4)               # (M2, C)

  # ---- final_block[2]: 4x4 valid conv == one (B, hw2*C)@(hw2*C, C) GEMM --------
  strip4_ref[pad4:pad4 + M2, 0:C] = f1
  for p in range(hw2):                                               # 16 contiguous (B, C) copies
    g_ref[0:B, p * C:(p + 1) * C] = strip4_ref[pad4 + p * B:pad4 + (p + 1) * B, 0:C]
  f2 = lrelu(mm(g_ref[...], w_at("f2", hw2 * C)) + bias("f2"))       # (B, C)

  # ---- final_block[4]: 1x1 conv (C -> 1), no activation ------------------------
  res = mm(f2, w_at("f3", C)) + bias("f3")                           # (B, C), only col 0 valid
  out_ref[...] = res[:, 0:1]


# ----------------------------------------------------------------------------
# Host-precomputed constant matrices (depend only on static B, H, W, C)
# ----------------------------------------------------------------------------
def _build_constants(B, H, W, C, c1):
  del c1
  H2, W2 = H // 2, W // 2
  M, hw2 = B * H * W, H2 * W2
  M2 = B * hw2

  # 2x2 avg-pool: batch-major 8x8 rows -> pixel-major 4x4 rows.
  r2 = np.arange(M2)[:, None]
  r1 = np.arange(M)[None, :]
  b2, p2 = r2 % B, r2 // B
  i2, j2 = p2 // W2, p2 % W2
  b1, q1 = r1 // (H * W), r1 % (H * W)
  i1, j1 = q1 // W, q1 % W
  pool = 0.25 * ((b1 == b2) & (i1 // 2 == i2) & (j1 // 2 == j2)).astype(np.float32)

  # per-pixel batch-mean matrix over pixel-major 4x4 rows.
  ra = np.arange(M2)[:, None]
  rb = np.arange(M2)[None, :]
  bmean = (ra // B == rb // B).astype(np.float32) / B

  def conv_mask(ii, jj, hgt, wid, cin):
    cols = []
    for di in (-1, 0, 1):
      for dj in (-1, 0, 1):
        ok = ((ii + di >= 0) & (ii + di < hgt) &
              (jj + dj >= 0) & (jj + dj < wid)).astype(np.float32)
        cols.append(np.repeat(ok[:, None], cin, axis=1))
    return np.concatenate(cols, axis=1)

  r = np.arange(M)
  mask8 = conv_mask((r % (H * W)) // W, r % W, H, W, C)
  r = np.arange(M2)
  p = r // B
  mask4 = conv_mask(p // W2, p % W2, H2, W2, C + 1)

  return (jnp.asarray(pool, jnp.bfloat16), jnp.asarray(bmean, jnp.bfloat16),
          jnp.asarray(mask8, jnp.float32), jnp.asarray(mask4, jnp.float32))


# ----------------------------------------------------------------------------
# Parameters (deterministic; only layers reached by the steps=1 path)
# ----------------------------------------------------------------------------
def init_params(key, in_channels, num_classes, img_channels=3):
  ks = jax.random.split(key, 18)
  n = lambda k, shape, s=0.1: s * jax.random.normal(k, shape, jnp.float32)
  ic, nc, imc = in_channels, num_classes, img_channels + 1
  return {
      "emb": n(ks[0], (nc, nc), 1.0),                 # class_embedding.weight
      "linear1_w": n(ks[1], (nc, 64)),                # linear1 (steps=1 -> 8*8)
      "linear1_b": n(ks[2], (64,)),
      "rgb7_w": n(ks[3], (ic, imc, 1, 1)),            # rgb_layers[cur_step]
      "rgb7_b": n(ks[10], (ic,), 0.05),
      "rgb8_w": n(ks[4], (ic, imc, 1, 1)),            # rgb_layers[cur_step+1]
      "rgb8_b": n(ks[11], (ic,), 0.05),
      "prog7_c1_w": n(ks[5], (ic, ic, 3, 3)),         # ConvBlock conv1
      "prog7_c1_b": n(ks[12], (ic,), 0.05),
      "prog7_c2_w": n(ks[6], (ic, ic, 3, 3)),         # ConvBlock conv2
      "prog7_c2_b": n(ks[13], (ic,), 0.05),
      "final1_w": n(ks[7], (ic, ic + 1, 3, 3)),       # final_block
      "final1_b": n(ks[14], (ic,), 0.05),
      "final2_w": n(ks[8], (ic, ic, 4, 4)),
      "final2_b": n(ks[15], (ic,), 0.05),
      "final3_w": n(ks[9], (1, ic, 1, 1)),
      "final3_b": n(ks[16], (1,), 0.05),
  }


def prepare_params(params):
  """Fold the equalized-lr (WSConv2d) scale into the weights, reshape every conv to a
  GEMM-ready matrix and pack all weights + biases into ONE bf16 buffer (single DMA)."""
  C = int(params["rgb7_w"].shape[0])               # in_channels
  c1 = int(params["rgb7_w"].shape[1])              # img_channels + 1
  k4 = int(params["final2_w"].shape[-1])
  hw2 = k4 * k4                                    # 4x4 'valid' conv

  def sc(w):
    w = np.asarray(w, np.float32)
    _, cin, kh, kw = w.shape
    return w * math.sqrt(2.0 / (cin * kh * kw))    # WSConv2d scale (gain=2)

  def as_1x1(w):                                   # (cout,cin,1,1) -> (cin, cout)
    return sc(w)[:, :, 0, 0].T

  def as_kxk(w):                                   # (cout,cin,k,k) -> (k*k*cin, cout), tap-major
    w = sc(w).transpose(2, 3, 1, 0)
    return w.reshape(-1, w.shape[-1])

  def bias_row(b):
    r = np.zeros((1, C), np.float32)
    b = np.asarray(b, np.float32).reshape(-1)
    r[0, :b.shape[0]] = b
    return r

  f3 = as_1x1(params["final3_w"])                  # (C, 1)
  mats = {
      "rgb7": as_1x1(params["rgb7_w"]),
      "rgb8": as_1x1(params["rgb8_w"]),
      "p1": as_kxk(params["prog7_c1_w"]),
      "p2": as_kxk(params["prog7_c2_w"]),
      "f1": as_kxk(params["final1_w"]),
      "f2": as_kxk(params["final2_w"]),
      "f3": np.pad(f3, ((0, 0), (0, C - f3.shape[1]))),
      "bias": np.concatenate(
          [bias_row(params[k]) for k in ("rgb7_b", "rgb8_b", "prog7_c1_b",
                                         "prog7_c2_b", "final1_b", "final2_b",
                                         "final3_b")]
          + [np.zeros((1, C), np.float32)], axis=0),
  }
  off, total = _weight_layout(C, c1, hw2)
  packed = np.zeros((total, C), np.float32)
  for name, m in mats.items():
    packed[off[name]:off[name] + m.shape[0], :m.shape[1]] = m
  return {
      "emb": params["emb"],
      "linear1_w": params["linear1_w"],
      "linear1_b": params["linear1_b"],
      "wpack": jnp.asarray(packed, jnp.bfloat16),
  }


# ----------------------------------------------------------------------------
# Forward pass (steps = 1; cur_step = 8 - 1 = 7)
# ----------------------------------------------------------------------------
def discriminator_forward(prepped, x, labels, alpha, steps=1):
  assert steps == 1, "this script implements the steps=1 (8x8) path"
  B, c_img, H, W = x.shape
  c1 = c_img + 1
  C = prepped["wpack"].shape[1]                   # in_channels
  H2, W2 = H // 2, W // 2
  hw2 = H2 * W2
  M, M2 = B * H * W, B * hw2
  pad8 = -(-(W + 1) // 8) * 8                     # >= W+1, sublane-aligned
  pad4 = -(-((W2 + 1) * B) // 8) * 8              # >= (W/2+1)*B, sublane-aligned
  off, wrows = _weight_layout(C, c1, hw2)
  assert prepped["wpack"].shape[0] == wrows

  # class embedding (gather) + tiny class linear + channel concat: a few XLA ops
  # fused into the same jit; everything downstream runs in ONE Pallas kernel.
  emb = prepped["emb"][labels]                                        # (B, nc)
  class_lin = emb @ prepped["linear1_w"] + prepped["linear1_b"]       # (B, H*W)
  xcat = jnp.concatenate([x, class_lin.reshape(B, 1, H, W)], axis=1)  # (B, c+1, H, W)
  xcat2d = xcat.transpose(0, 2, 3, 1).reshape(M, c1).astype(jnp.bfloat16)
  alpha_arr = jnp.asarray(alpha, jnp.float32).reshape(1)

  pool, bmean, mask8, mask4 = _build_constants(B, H, W, C, c1)

  kernel = functools.partial(
      _discriminator_fused_kernel,
      B=B, H=H, W=W, C=C, c1=c1, pad8=pad8, pad4=pad4, off=off)
  vmem = pl.BlockSpec(memory_space=pltpu.MemorySpace.VMEM)
  smem = pl.BlockSpec(memory_space=pltpu.MemorySpace.SMEM)
  logits = pl.pallas_call(
      kernel,
      out_shape=jax.ShapeDtypeStruct((B, 1), jnp.float32),
      in_specs=[smem] + [vmem] * 6,
      out_specs=vmem,
      scratch_shapes=[
          pltpu.VMEM((2 * pad8 + M, C), jnp.float32),        # padded 8x8 strip
          pltpu.VMEM((2 * pad4 + M2, C + 1), jnp.float32),   # padded 4x4 strip (+ std chan)
          pltpu.VMEM((M, 9 * (C + 1)), jnp.float32),         # im2col (shared by 3 convs)
          pltpu.VMEM((B, hw2 * C), jnp.float32),             # (B, 4*4*C) final-conv operand
      ],
  )(alpha_arr, xcat2d, prepped["wpack"], pool, bmean, mask8, mask4)
  return logits                                                       # (B, 1)


# ----------------------------------------------------------------------------
if __name__ == "__main__":
  in_channels, num_classes, img_channels = 16, 5, 3
  batch, steps = 2, 1
  res = 4 * (2 ** steps)                          # 8

  key = jax.random.PRNGKey(0)
  kx, kl, kp = jax.random.split(key, 3)
  x = jax.random.normal(kx, (batch, img_channels, res, res), jnp.float32)
  labels = jax.random.randint(kl, (batch,), 0, num_classes)
  alpha = 0.7

  prepped = prepare_params(init_params(kp, in_channels, num_classes, img_channels))
  fwd = jax.jit(discriminator_forward, static_argnames=("steps",))
  logits = jax.block_until_ready(fwd(prepped, x, labels, alpha, steps=steps))

  assert logits.shape == (batch, 1)
  assert bool(jnp.all(jnp.isfinite(logits)))
  print("KERNEL_OK")
</pallas_src>

<mosaic_0001>
module attributes {stable_mosaic.version = 11 : i64} {
  func.func @_discriminator_fused_kernel(%arg0: memref<1xf32, #tpu.memory_space<smem>>, %arg1: memref<128x4xbf16, #tpu.memory_space<vmem>>, %arg2: memref<744x16xbf16, #tpu.memory_space<vmem>>, %arg3: memref<32x128xbf16, #tpu.memory_space<vmem>>, %arg4: memref<32x32xbf16, #tpu.memory_space<vmem>>, %arg5: memref<128x144xf32, #tpu.memory_space<vmem>>, %arg6: memref<32x153xf32, #tpu.memory_space<vmem>>, %arg7: memref<2x1xf32, #tpu.memory_space<vmem>>, %arg8: memref<160x16xf32, #tpu.memory_space<vmem>>, %arg9: memref<64x17xf32, #tpu.memory_space<vmem>>, %arg10: memref<128x153xf32, #tpu.memory_space<vmem>>, %arg11: memref<2x256xf32, #tpu.memory_space<vmem>>) attributes {dimension_semantics = [], scalar_prefetch = 0 : i64, scratch_operands = 4 : i64, tpu.core_type = #tpu.core_type<tc>} {
    %c0 = arith.constant 0 : index
    %c0_0 = arith.constant 0 : index
    %0 = vector.load %arg1[%c0, %c0_0] : memref<128x4xbf16, #tpu.memory_space<vmem>>, vector<128x4xbf16>
    %c0_1 = arith.constant 0 : index
    %c0_2 = arith.constant 0 : index
    %1 = vector.load %arg2[%c0_1, %c0_2] : memref<744x16xbf16, #tpu.memory_space<vmem>>, vector<4x16xbf16>
    %cst = arith.constant dense<0.000000e+00> : vector<128x16xf32>
    %2 = tpu.matmul %0, %1, %cst {dimension_numbers = #tpu.dot_dimension_numbers<[1], [0], [0], [1], [0, 0, 1, 1], [], []>} : vector<128x4xbf16>, vector<4x16xbf16>, vector<128x16xf32> -> vector<128x16xf32>
    %c736 = arith.constant 736 : index
    %c0_3 = arith.constant 0 : index
    %3 = vector.load %arg2[%c736, %c0_3] : memref<744x16xbf16, #tpu.memory_space<vmem>>, vector<1x16xbf16>
    %4 = arith.extf %3 : vector<1x16xbf16> to vector<1x16xf32>
    %5 = vector.broadcast %4 : vector<1x16xf32> to vector<128x16xf32>
    %6 = arith.addf %2, %5 : vector<128x16xf32>
    %cst_4 = arith.constant 0.000000e+00 : f32
    %7 = vector.broadcast %cst_4 : f32 to vector<128x16xf32>
    %8 = arith.cmpf oge, %6, %7 : vector<128x16xf32>
    %cst_5 = arith.constant 2.000000e-01 : f32
    %9 = vector.broadcast %cst_5 : f32 to vector<128x16xf32>
    %10 = arith.mulf %9, %6 : vector<128x16xf32>
    %11 = arith.select %8, %6, %10 : vector<128x16xi1>, vector<128x16xf32>
    %cst_6 = arith.constant 0.000000e+00 : f32
    %12 = vector.broadcast %cst_6 : f32 to vector<16x16xf32>
    %c0_7 = arith.constant 0 : index
    %c0_8 = arith.constant 0 : index
    %13 = vector.load %arg8[%c0_7, %c0_8] : memref<160x16xf32, #tpu.memory_space<vmem>>, vector<16x16xf32>
    tpu.vector_store %arg8[%c0_7, %c0_8], %12 {strides = array<i32>} : memref<160x16xf32, #tpu.memory_space<vmem>>, vector<16x16xf32>,
    %cst_9 = arith.constant 0.000000e+00 : f32
    %14 = vector.broadcast %cst_9 : f32 to vector<16x16xf32>
    %c144 = arith.constant 144 : index
    %c0_10 = arith.constant 0 : index
    %15 = vector.load %arg8[%c144, %c0_10] : memref<160x16xf32, #tpu.memory_space<vmem>>, vector<16x16xf32>
    tpu.vector_store %arg8[%c144, %c0_10], %14 {strides = array<i32>} : memref<160x16xf32, #tpu.memory_space<vmem>>, vector<16x16xf32>,
    %c0_11 = arith.constant 0 : index
    %c0_12 = arith.constant 0 : index
    %16 = vector.load %arg5[%c0_11, %c0_12] : memref<128x144xf32, #tpu.memory_space<vmem>>, vector<128x144xf32>
    %c16 = arith.constant 16 : index
    %c0_13 = arith.constant 0 : index
    %17 = vector.load %arg8[%c16, %c0_13] : memref<160x16xf32, #tpu.memory_space<vmem>>, vector<128x16xf32>
    tpu.vector_store %arg8[%c16, %c0_13], %11 {strides = array<i32>} : memref<160x16xf32, #tpu.memory_space<vmem>>, vector<128x16xf32>,
    %c16_14 = arith.constant 16 : index
    %c0_15 = arith.constant 0 : index
    %18 = vector.load %arg2[%c16_14, %c0_15] : memref<744x16xbf16, #tpu.memory_space<vmem>>, vector<144x16xbf16>
    %c738 = arith.constant 738 : index
    %c0_16 = arith.constant 0 : index
    %19 = vector.load %arg2[%c738, %c0_16] : memref<744x16xbf16, #tpu.memory_space<vmem>>, vector<1x16xbf16>
    %c7 = arith.constant 7 : index
    %c0_17 = arith.constant 0 : index
    %20 = vector.load %arg8[%c7, %c0_17] : memref<160x16xf32, #tpu.memory_space<vmem>>, vector<128x16xf32>
    %c0_18 = arith.constant 0 : index
    %c0_19 = arith.constant 0 : index
    %21 = vector.load %arg10[%c0_18, %c0_19] : memref<128x153xf32, #tpu.memory_space<vmem>>, vector<128x16xf32>
    tpu.vector_store %arg10[%c0_18, %c0_19], %20 {strides = array<i32>} : memref<128x153xf32, #tpu.memory_space<vmem>>, vector<128x16xf32>,
    %c8 = arith.constant 8 : index
    %c0_20 = arith.constant 0 : index
    %22 = vector.load %arg8[%c8, %c0_20] : memref<160x16xf32, #tpu.memory_space<vmem>>, vector<128x16xf32>
    %c0_21 = arith.constant 0 : index
    %c16_22 = arith.constant 16 : index
    %23 = vector.load %arg10[%c0_21, %c16_22] : memref<128x153xf32, #tpu.memory_space<vmem>>, vector<128x16xf32>
    tpu.vector_store %arg10[%c0_21, %c16_22], %22 {strides = array<i32>} : memref<128x153xf32, #tpu.memory_space<vmem>>, vector<128x16xf32>,
    %c9 = arith.constant 9 : index
    %c0_23 = arith.constant 0 : index
    %24 = vector.load %arg8[%c9, %c0_23] : memref<160x16xf32, #tpu.memory_space<vmem>>, vector<128x16xf32>
    %c0_24 = arith.constant 0 : index
    %c32 = arith.constant 32 : index
    %25 = vector.load %arg10[%c0_24, %c32] : memref<128x153xf32, #tpu.memory_space<vmem>>, vector<128x16xf32>
    tpu.vector_store %arg10[%c0_24, %c32], %24 {strides = array<i32>} : memref<128x153xf32, #tpu.memory_space<vmem>>, vector<128x16xf32>,
    %c15 = arith.constant 15 : index
    %c0_25 = arith.constant 0 : index
    %26 = vector.load %arg8[%c15, %c0_25] : memref<160x16xf32, #tpu.memory_space<vmem>>, vector<128x16xf32>
    %c0_26 = arith.constant 0 : index
    %c48 = arith.constant 48 : index
    %27 = vector.load %arg10[%c0_26, %c48] : memref<128x153xf32, #tpu.memory_space<vmem>>, vector<128x16xf32>
    tpu.vector_store %arg10[%c0_26, %c48], %26 {strides = array<i32>} : memref<128x153xf32, #tpu.memory_space<vmem>>, vector<128x16xf32>,
    %c16_27 = arith.constant 16 : index
    %c0_28 = arith.constant 0 : index
    %28 = vector.load %arg8[%c16_27, %c0_28] : memref<160x16xf32, #tpu.memory_space<vmem>>, vector<128x16xf32>
    %c0_29 = arith.constant 0 : index
    %c64 = arith.constant 64 : index
    %29 = vector.load %arg10[%c0_29, %c64] : memref<128x153xf32, #tpu.memory_space<vmem>>, vector<128x16xf32>
    tpu.vector_store %arg10[%c0_29, %c64], %28 {strides = array<i32>} : memref<128x153xf32, #tpu.memory_space<vmem>>, vector<128x16xf32>,
    %c17 = arith.constant 17 : index
    %c0_30 = arith.constant 0 : index
    %30 = vector.load %arg8[%c17, %c0_30] : memref<160x16xf32, #tpu.memory_space<vmem>>, vector<128x16xf32>
    %c0_31 = arith.constant 0 : index
    %c80 = arith.constant 80 : index
    %31 = vector.load %arg10[%c0_31, %c80] : memref<128x153xf32, #tpu.memory_space<vmem>>, vector<128x16xf32>
    tpu.vector_store %arg10[%c0_31, %c80], %30 {strides = array<i32>} : memref<128x153xf32, #tpu.memory_space<vmem>>, vector<128x16xf32>,
    %c23 = arith.constant 23 : index
    %c0_32 = arith.constant 0 : index
    %32 = vector.load %arg8[%c23, %c0_32] : memref<160x16xf32, #tpu.memory_space<vmem>>, vector<128x16xf32>
    %c0_33 = arith.constant 0 : index
    %c96 = arith.constant 96 : index
    %33 = vector.load %arg10[%c0_33, %c96] : memref<128x153xf32, #tpu.memory_space<vmem>>, vector<128x16xf32>
    tpu.vector_store %arg10[%c0_33, %c96], %32 {strides = array<i32>} : memref<128x153xf32, #tpu.memory_space<vmem>>, vector<128x16xf32>,
    %c24 = arith.constant 24 : index
    %c0_34 = arith.constant 0 : index
    %34 = vector.load %arg8[%c24, %c0_34] : memref<160x16xf32, #tpu.memory_space<vmem>>, vector<128x16xf32>
    %c0_35 = arith.constant 0 : index
    %c112 = arith.constant 112 : index
    %35 = vector.load %arg10[%c0_35, %c112] : memref<128x153xf32, #tpu.memory_space<vmem>>, vector<128x16xf32>
    tpu.vector_store %arg10[%c0_35, %c112], %34 {strides = array<i32>} : memref<128x153xf32, #tpu.memory_space<vmem>>, vector<128x16xf32>,
    %c25 = arith.constant 25 : index
    %c0_36 = arith.constant 0 : index
    %36 = vector.load %arg8[%c25, %c0_36] : memref<160x16xf32, #tpu.memory_space<vmem>>, vector<128x16xf32>
    %c0_37 = arith.constant 0 : index
    %c128 = arith.constant 128 : index
    %37 = vector.load %arg10[%c0_37, %c128] : memref<128x153xf32, #tpu.memory_space<vmem>>, vector<128x16xf32>
    tpu.vector_store %arg10[%c0_37, %c128], %36 {strides = array<i32>} : memref<128x153xf32, #tpu.memory_space<vmem>>, vector<128x16xf32>,
    %c0_38 = arith.constant 0 : index
    %c0_39 = arith.constant 0 : index
    %38 = vector.load %arg10[%c0_38, %c0_39] : memref<128x153xf32, #tpu.memory_space<vmem>>, vector<128x144xf32>
    %39 = arith.mulf %38, %16 : vector<128x144xf32>
    %40 = arith.truncf %39 : vector<128x144xf32> to vector<128x144xbf16>
    %cst_40 = arith.constant dense<0.000000e+00> : vector<128x16xf32>
    %41 = tpu.matmul %40, %18, %cst_40 {dimension_numbers = #tpu.dot_dimension_numbers<[1], [0], [0], [1], [0, 0, 1, 1], [], []>} : vector<128x144xbf16>, vector<144x16xbf16>, vector<128x16xf32> -> vector<128x16xf32>
    %42 = arith.extf %19 : vector<1x16xbf16> to vector<1x16xf32>
    %43 = vector.broadcast %42 : vector<1x16xf32> to vector<128x16xf32>
    %44 = arith.addf %41, %43 : vector<128x16xf32>
    %cst_41 = arith.constant 0.000000e+00 : f32
    %45 = vector.broadcast %cst_41 : f32 to vector<128x16xf32>
    %46 = arith.cmpf oge, %44, %45 : vector<128x16xf32>
    %cst_42 = arith.constant 2.000000e-01 : f32
    %47 = vector.broadcast %cst_42 : f32 to vector<128x16xf32>
    %48 = arith.mulf %47, %44 : vector<128x16xf32>
    %49 = arith.select %46, %44, %48 : vector<128x16xi1>, vector<128x16xf32>
    %c16_43 = arith.constant 16 : index
    %c0_44 = arith.constant 0 : index
    %50 = vector.load %arg8[%c16_43, %c0_44] : memref<160x16xf32, #tpu.memory_space<vmem>>, vector<128x16xf32>
    tpu.vector_store %arg8[%c16_43, %c0_44], %49 {strides = array<i32>} : memref<160x16xf32, #tpu.memory_space<vmem>>, vector<128x16xf32>,
    %c160 = arith.constant 160 : index
    %c0_45 = arith.constant 0 : index
    %51 = vector.load %arg2[%c160, %c0_45] : memref<744x16xbf16, #tpu.memory_space<vmem>>, vector<144x16xbf16>
    %c739 = arith.constant 739 : index
    %c0_46 = arith.constant 0 : index
    %52 = vector.load %arg2[%c739, %c0_46] : memref<744x16xbf16, #tpu.memory_space<vmem>>, vector<1x16xbf16>
    %c7_47 = arith.constant 7 : index
    %c0_48 = arith.constant 0 : index
    %53 = vector.load %arg8[%c7_47, %c0_48] : memref<160x16xf32, #tpu.memory_space<vmem>>, vector<128x16xf32>
    %c0_49 = arith.constant 0 : index
    %c0_50 = arith.constant 0 : index
    %54 = vector.load %arg10[%c0_49, %c0_50] : memref<128x153xf32, #tpu.memory_space<vmem>>, vector<128x16xf32>
    tpu.vector_store %arg10[%c0_49, %c0_50], %53 {strides = array<i32>} : memref<128x153xf32, #tpu.memory_space<vmem>>, vector<128x16xf32>,
    %c8_51 = arith.constant 8 : index
    %c0_52 = arith.constant 0 : index
    %55 = vector.load %arg8[%c8_51, %c0_52] : memref<160x16xf32, #tpu.memory_space<vmem>>, vector<128x16xf32>
    %c0_53 = arith.constant 0 : index
    %c16_54 = arith.constant 16 : index
    %56 = vector.load %arg10[%c0_53, %c16_54] : memref<128x153xf32, #tpu.memory_space<vmem>>, vector<128x16xf32>
    tpu.vector_store %arg10[%c0_53, %c16_54], %55 {strides = array<i32>} : memref<128x153xf32, #tpu.memory_space<vmem>>, vector<128x16xf32>,
    %c9_55 = arith.constant 9 : index
    %c0_56 = arith.constant 0 : index
    %57 = vector.load %arg8[%c9_55, %c0_56] : memref<160x16xf32, #tpu.memory_space<vmem>>, vector<128x16xf32>
    %c0_57 = arith.constant 0 : index
    %c32_58 = arith.constant 32 : index
    %58 = vector.load %arg10[%c0_57, %c32_58] : memref<128x153xf32, #tpu.memory_space<vmem>>, vector<128x16xf32>
    tpu.vector_store %arg10[%c0_57, %c32_58], %57 {strides = array<i32>} : memref<128x153xf32, #tpu.memory_space<vmem>>, vector<128x16xf32>,
    %c15_59 = arith.constant 15 : index
    %c0_60 = arith.constant 0 : index
    %59 = vector.load %arg8[%c15_59, %c0_60] : memref<160x16xf32, #tpu.memory_space<vmem>>, vector<128x16xf32>
    %c0_61 = arith.constant 0 : index
    %c48_62 = arith.constant 48 : index
    %60 = vector.load %arg10[%c0_61, %c48_62] : memref<128x153xf32, #tpu.memory_space<vmem>>, vector<128x16xf32>
    tpu.vector_store %arg10[%c0_61, %c48_62], %59 {strides = array<i32>} : memref<128x153xf32, #tpu.memory_space<vmem>>, vector<128x16xf32>,
    %c16_63 = arith.constant 16 : index
    %c0_64 = arith.constant 0 : index
    %61 = vector.load %arg8[%c16_63, %c0_64] : memref<160x16xf32, #tpu.memory_space<vmem>>, vector<128x16xf32>
    %c0_65 = arith.constant 0 : index
    %c64_66 = arith.constant 64 : index
    %62 = vector.load %arg10[%c0_65, %c64_66] : memref<128x153xf32, #tpu.memory_space<vmem>>, vector<128x16xf32>
    tpu.vector_store %arg10[%c0_65, %c64_66], %61 {strides = array<i32>} : memref<128x153xf32, #tpu.memory_space<vmem>>, vector<128x16xf32>,
    %c17_67 = arith.constant 17 : index
    %c0_68 = arith.constant 0 : index
    %63 = vector.load %arg8[%c17_67, %c0_68] : memref<160x16xf32, #tpu.memory_space<vmem>>, vector<128x16xf32>
    %c0_69 = arith.constant 0 : index
    %c80_70 = arith.constant 80 : index
    %64 = vector.load %arg10[%c0_69, %c80_70] : memref<128x153xf32, #tpu.memory_space<vmem>>, vector<128x16xf32>
    tpu.vector_store %arg10[%c0_69, %c80_70], %63 {strides = array<i32>} : memref<128x153xf32, #tpu.memory_space<vmem>>, vector<128x16xf32>,
    %c23_71 = arith.constant 23 : index
    %c0_72 = arith.constant 0 : index
    %65 = vector.load %arg8[%c23_71, %c0_72] : memref<160x16xf32, #tpu.memory_space<vmem>>, vector<128x16xf32>
    %c0_73 = arith.constant 0 : index
    %c96_74 = arith.constant 96 : index
    %66 = vector.load %arg10[%c0_73, %c96_74] : memref<128x153xf32, #tpu.memory_space<vmem>>, vector<128x16xf32>
    tpu.vector_store %arg10[%c0_73, %c96_74], %65 {strides = array<i32>} : memref<128x153xf32, #tpu.memory_space<vmem>>, vector<128x16xf32>,
    %c24_75 = arith.constant 24 : index
    %c0_76 = arith.constant 0 : index
    %67 = vector.load %arg8[%c24_75, %c0_76] : memref<160x16xf32, #tpu.memory_space<vmem>>, vector<128x16xf32>
    %c0_77 = arith.constant 0 : index
    %c112_78 = arith.constant 112 : index
    %68 = vector.load %arg10[%c0_77, %c112_78] : memref<128x153xf32, #tpu.memory_space<vmem>>, vector<128x16xf32>
    tpu.vector_store %arg10[%c0_77, %c112_78], %67 {strides = array<i32>} : memref<128x153xf32, #tpu.memory_space<vmem>>, vector<128x16xf32>,
    %c25_79 = arith.constant 25 : index
    %c0_80 = arith.constant 0 : index
    %69 = vector.load %arg8[%c25_79, %c0_80] : memref<160x16xf32, #tpu.memory_space<vmem>>, vector<128x16xf32>
    %c0_81 = arith.constant 0 : index
    %c128_82 = arith.constant 128 : index
    %70 = vector.load %arg10[%c0_81, %c128_82] : memref<128x153xf32, #tpu.memory_space<vmem>>, vector<128x16xf32>
    tpu.vector_store %arg10[%c0_81, %c128_82], %69 {strides = array<i32>} : memref<128x153xf32, #tpu.memory_space<vmem>>, vector<128x16xf32>,
    %c0_83 = arith.constant 0 : index
    %c0_84 = arith.constant 0 : index
    %71 = vector.load %arg10[%c0_83, %c0_84] : memref<128x153xf32, #tpu.memory_space<vmem>>, vector<128x144xf32>
    %72 = arith.mulf %71, %16 : vector<128x144xf32>
    %73 = arith.truncf %72 : vector<128x144xf32> to vector<128x144xbf16>
    %cst_85 = arith.constant dense<0.000000e+00> : vector<128x16xf32>
    %74 = tpu.matmul %73, %51, %cst_85 {dimension_numbers = #tpu.dot_dimension_numbers<[1], [0], [0], [1], [0, 0, 1, 1], [], []>} : vector<128x144xbf16>, vector<144x16xbf16>, vector<128x16xf32> -> vector<128x16xf32>
    %75 = arith.extf %52 : vector<1x16xbf16> to vector<1x16xf32>
    %76 = vector.broadcast %75 : vector<1x16xf32> to vector<128x16xf32>
    %77 = arith.addf %74, %76 : vector<128x16xf32>
    %cst_86 = arith.constant 0.000000e+00 : f32
    %78 = vector.broadcast %cst_86 : f32 to vector<128x16xf32>
    %79 = arith.cmpf oge, %77, %78 : vector<128x16xf32>
    %cst_87 = arith.constant 2.000000e-01 : f32
    %80 = vector.broadcast %cst_87 : f32 to vector<128x16xf32>
    %81 = arith.mulf %80, %77 : vector<128x16xf32>
    %82 = arith.select %79, %77, %81 : vector<128x16xi1>, vector<128x16xf32>
    %c0_88 = arith.constant 0 : index
    %c0_89 = arith.constant 0 : index
    %83 = vector.load %arg3[%c0_88, %c0_89] : memref<32x128xbf16, #tpu.memory_space<vmem>>, vector<32x128xbf16>
    %84 = arith.truncf %82 : vector<128x16xf32> to vector<128x16xbf16>
    %cst_90 = arith.constant dense<0.000000e+00> : vector<32x16xf32>
    %85 = tpu.matmul %83, %84, %cst_90 {dimension_numbers = #tpu.dot_dimension_numbers<[1], [0], [0], [1], [0, 0, 1, 1], [], []>} : vector<32x128xbf16>, vector<128x16xbf16>, vector<32x16xf32> -> vector<32x16xf32>
    %cst_91 = arith.constant dense<0.000000e+00> : vector<32x4xf32>
    %86 = tpu.matmul %83, %0, %cst_91 {dimension_numbers = #tpu.dot_dimension_numbers<[1], [0], [0], [1], [0, 0, 1, 1], [], []>} : vector<32x128xbf16>, vector<128x4xbf16>, vector<32x4xf32> -> vector<32x4xf32>
    %c8_92 = arith.constant 8 : index
    %c0_93 = arith.constant 0 : index
    %87 = vector.load %arg2[%c8_92, %c0_93] : memref<744x16xbf16, #tpu.memory_space<vmem>>, vector<4x16xbf16>
    %88 = arith.truncf %86 : vector<32x4xf32> to vector<32x4xbf16>
    %cst_94 = arith.constant dense<0.000000e+00> : vector<32x16xf32>
    %89 = tpu.matmul %88, %87, %cst_94 {dimension_numbers = #tpu.dot_dimension_numbers<[1], [0], [0], [1], [0, 0, 1, 1], [], []>} : vector<32x4xbf16>, vector<4x16xbf16>, vector<32x16xf32> -> vector<32x16xf32>
    %c737 = arith.constant 737 : index
    %c0_95 = arith.constant 0 : index
    %90 = vector.load %arg2[%c737, %c0_95] : memref<744x16xbf16, #tpu.memory_space<vmem>>, vector<1x16xbf16>
    %91 = arith.extf %90 : vector<1x16xbf16> to vector<1x16xf32>
    %92 = vector.broadcast %91 : vector<1x16xf32> to vector<32x16xf32>
    %93 = arith.addf %89, %92 : vector<32x16xf32>
    %cst_96 = arith.constant 0.000000e+00 : f32
    %94 = vector.broadcast %cst_96 : f32 to vector<32x16xf32>
    %95 = arith.cmpf oge, %93, %94 : vector<32x16xf32>
    %cst_97 = arith.constant 2.000000e-01 : f32
    %96 = vector.broadcast %cst_97 : f32 to vector<32x16xf32>
    %97 = arith.mulf %96, %93 : vector<32x16xf32>
    %98 = arith.select %95, %93, %97 : vector<32x16xi1>, vector<32x16xf32>
    %c0_98 = arith.constant 0 : index
    %99 = memref.load %arg0[%c0_98] : memref<1xf32, #tpu.memory_space<smem>>
    %100 = vector.broadcast %99 : f32 to vector<32x16xf32>
    %101 = arith.mulf %100, %85 : vector<32x16xf32>
    %cst_99 = arith.constant 1.000000e+00 : f32
    %102 = arith.subf %cst_99, %99 : f32
    %103 = vector.broadcast %102 : f32 to vector<32x16xf32>
    %104 = arith.mulf %103, %98 : vector<32x16xf32>
    %105 = arith.addf %101, %104 : vector<32x16xf32>
    %c0_100 = arith.constant 0 : index
    %c0_101 = arith.constant 0 : index
    %106 = vector.load %arg4[%c0_100, %c0_101] : memref<32x32xbf16, #tpu.memory_space<vmem>>, vector<32x32xbf16>
    %107 = arith.truncf %105 : vector<32x16xf32> to vector<32x16xbf16>
    %cst_102 = arith.constant dense<0.000000e+00> : vector<32x16xf32>
    %108 = tpu.matmul %106, %107, %cst_102 {dimension_numbers = #tpu.dot_dimension_numbers<[1], [0], [0], [1], [0, 0, 1, 1], [], []>} : vector<32x32xbf16>, vector<32x16xbf16>, vector<32x16xf32> -> vector<32x16xf32>
    %109 = arith.subf %105, %108 : vector<32x16xf32>
    %110 = arith.mulf %109, %109 : vector<32x16xf32>
    %111 = arith.truncf %110 : vector<32x16xf32> to vector<32x16xbf16>
    %cst_103 = arith.constant dense<0.000000e+00> : vector<32x16xf32>
    %112 = tpu.matmul %106, %111, %cst_103 {dimension_numbers = #tpu.dot_dimension_numbers<[1], [0], [0], [1], [0, 0, 1, 1], [], []>} : vector<32x32xbf16>, vector<32x16xbf16>, vector<32x16xf32> -> vector<32x16xf32>
    %113 = math.sqrt %112 : vector<32x16xf32>
    %cst_104 = arith.constant dense<0.000000e+00> : vector<32xf32>
    %114 = vector.multi_reduction <add>, %113, %cst_104 [1] : vector<32x16xf32> to vector<32xf32>
    %115 = vector.shape_cast %114 : vector<32xf32> to vector<32x1xf32>
    %cst_105 = arith.constant dense<0.000000e+00> : vector<1xf32>
    %116 = vector.multi_reduction <add>, %115, %cst_105 [0] : vector<32x1xf32> to vector<1xf32>
    %117 = vector.shape_cast %116 : vector<1xf32> to vector<1x1xf32>
    %cst_106 = arith.constant 0.001953125 : f32
    %118 = vector.broadcast %cst_106 : f32 to vector<1x1xf32>
    %119 = arith.mulf %117, %118 : vector<1x1xf32>
    %cst_107 = arith.constant 0.000000e+00 : f32
    %120 = vector.broadcast %cst_107 : f32 to vector<16x17xf32>
    %c0_108 = arith.constant 0 : index
    %c0_109 = arith.constant 0 : index
    %121 = vector.load %arg9[%c0_108, %c0_109] : memref<64x17xf32, #tpu.memory_space<vmem>>, vector<16x17xf32>
    tpu.vector_store %arg9[%c0_108, %c0_109], %120 {strides = array<i32>} : memref<64x17xf32, #tpu.memory_space<vmem>>, vector<16x17xf32>,
    %cst_110 = arith.constant 0.000000e+00 : f32
    %122 = vector.broadcast %cst_110 : f32 to vector<16x17xf32>
    %c48_111 = arith.constant 48 : index
    %c0_112 = arith.constant 0 : index
    %123 = vector.load %arg9[%c48_111, %c0_112] : memref<64x17xf32, #tpu.memory_space<vmem>>, vector<16x17xf32>
    tpu.vector_store %arg9[%c48_111, %c0_112], %122 {strides = array<i32>} : memref<64x17xf32, #tpu.memory_space<vmem>>, vector<16x17xf32>,
    %c16_113 = arith.constant 16 : index
    %c0_114 = arith.constant 0 : index
    %124 = vector.load %arg9[%c16_113, %c0_114] : memref<64x17xf32, #tpu.memory_space<vmem>>, vector<32x16xf32>
    tpu.vector_store %arg9[%c16_113, %c0_114], %105 {strides = array<i32>} : memref<64x17xf32, #tpu.memory_space<vmem>>, vector<32x16xf32>,
    %125 = vector.shape_cast %119 : vector<1x1xf32> to vector<1x1xf32>
    %126 = vector.broadcast %125 : vector<1x1xf32> to vector<32x1xf32>
    %c16_115 = arith.constant 16 : index
    %c16_116 = arith.constant 16 : index
    %127 = vector.load %arg9[%c16_115, %c16_116] : memref<64x17xf32, #tpu.memory_space<vmem>>, vector<32x1xf32>
    tpu.vector_store %arg9[%c16_115, %c16_116], %126 {strides = array<i32>} : memref<64x17xf32, #tpu.memory_space<vmem>>, vector<32x1xf32>,
    %c304 = arith.constant 304 : index
    %c0_117 = arith.constant 0 : index
    %128 = vector.load %arg2[%c304, %c0_117] : memref<744x16xbf16, #tpu.memory_space<vmem>>, vector<153x16xbf16>
    %c740 = arith.constant 740 : index
    %c0_118 = arith.constant 0 : index
    %129 = vector.load %arg2[%c740, %c0_118] : memref<744x16xbf16, #tpu.memory_space<vmem>>, vector<1x16xbf16>
    %c0_119 = arith.constant 0 : index
    %c0_120 = arith.constant 0 : index
    %130 = vector.load %arg6[%c0_119, %c0_120] : memref<32x153xf32, #tpu.memory_space<vmem>>, vector<32x153xf32>
    %c6 = arith.constant 6 : index
    %c0_121 = arith.constant 0 : index
    %131 = vector.load %arg9[%c6, %c0_121] : memref<64x17xf32, #tpu.memory_space<vmem>>, vector<32x17xf32>
    %c0_122 = arith.constant 0 : index
    %c0_123 = arith.constant 0 : index
    %132 = vector.load %arg10[%c0_122, %c0_123] : memref<128x153xf32, #tpu.memory_space<vmem>>, vector<32x17xf32>
    tpu.vector_store %arg10[%c0_122, %c0_123], %131 {strides = array<i32>} : memref<128x153xf32, #tpu.memory_space<vmem>>, vector<32x17xf32>,
    %c8_124 = arith.constant 8 : index
    %c0_125 = arith.constant 0 : index
    %133 = vector.load %arg9[%c8_124, %c0_125] : memref<64x17xf32, #tpu.memory_space<vmem>>, vector<32x17xf32>
    %c0_126 = arith.constant 0 : index
    %c17_127 = arith.constant 17 : index
    %134 = vector.load %arg10[%c0_126, %c17_127] : memref<128x153xf32, #tpu.memory_space<vmem>>, vector<32x17xf32>
    tpu.vector_store %arg10[%c0_126, %c17_127], %133 {strides = array<i32>} : memref<128x153xf32, #tpu.memory_space<vmem>>, vector<32x17xf32>,
    %c10 = arith.constant 10 : index
    %c0_128 = arith.constant 0 : index
    %135 = vector.load %arg9[%c10, %c0_128] : memref<64x17xf32, #tpu.memory_space<vmem>>, vector<32x17xf32>
    %c0_129 = arith.constant 0 : index
    %c34 = arith.constant 34 : index
    %136 = vector.load %arg10[%c0_129, %c34] : memref<128x153xf32, #tpu.memory_space<vmem>>, vector<32x17xf32>
    tpu.vector_store %arg10[%c0_129, %c34], %135 {strides = array<i32>} : memref<128x153xf32, #tpu.memory_space<vmem>>, vector<32x17xf32>,
    %c14 = arith.constant 14 : index
    %c0_130 = arith.constant 0 : index
    %137 = vector.load %arg9[%c14, %c0_130] : memref<64x17xf32, #tpu.memory_space<vmem>>, vector<32x17xf32>
    %c0_131 = arith.constant 0 : index
    %c51 = arith.constant 51 : index
    %138 = vector.load %arg10[%c0_131, %c51] : memref<128x153xf32, #tpu.memory_space<vmem>>, vector<32x17xf32>
    tpu.vector_store %arg10[%c0_131, %c51], %137 {strides = array<i32>} : memref<128x153xf32, #tpu.memory_space<vmem>>, vector<32x17xf32>,
    %c16_132 = arith.constant 16 : index
    %c0_133 = arith.constant 0 : index
    %139 = vector.load %arg9[%c16_132, %c0_133] : memref<64x17xf32, #tpu.memory_space<vmem>>, vector<32x17xf32>
    %c0_134 = arith.constant 0 : index
    %c68 = arith.constant 68 : index
    %140 = vector.load %arg10[%c0_134, %c68] : memref<128x153xf32, #tpu.memory_space<vmem>>, vector<32x17xf32>
    tpu.vector_store %arg10[%c0_134, %c68], %139 {strides = array<i32>} : memref<128x153xf32, #tpu.memory_space<vmem>>, vector<32x17xf32>,
    %c18 = arith.constant 18 : index
    %c0_135 = arith.constant 0 : index
    %141 = vector.load %arg9[%c18, %c0_135] : memref<64x17xf32, #tpu.memory_space<vmem>>, vector<32x17xf32>
    %c0_136 = arith.constant 0 : index
    %c85 = arith.constant 85 : index
    %142 = vector.load %arg10[%c0_136, %c85] : memref<128x153xf32, #tpu.memory_space<vmem>>, vector<32x17xf32>
    tpu.vector_store %arg10[%c0_136, %c85], %141 {strides = array<i32>} : memref<128x153xf32, #tpu.memory_space<vmem>>, vector<32x17xf32>,
    %c22 = arith.constant 22 : index
    %c0_137 = arith.constant 0 : index
    %143 = vector.load %arg9[%c22, %c0_137] : memref<64x17xf32, #tpu.memory_space<vmem>>, vector<32x17xf32>
    %c0_138 = arith.constant 0 : index
    %c102 = arith.constant 102 : index
    %144 = vector.load %arg10[%c0_138, %c102] : memref<128x153xf32, #tpu.memory_space<vmem>>, vector<32x17xf32>
    tpu.vector_store %arg10[%c0_138, %c102], %143 {strides = array<i32>} : memref<128x153xf32, #tpu.memory_space<vmem>>, vector<32x17xf32>,
    %c24_139 = arith.constant 24 : index
    %c0_140 = arith.constant 0 : index
    %145 = vector.load %arg9[%c24_139, %c0_140] : memref<64x17xf32, #tpu.memory_space<vmem>>, vector<32x17xf32>
    %c0_141 = arith.constant 0 : index
    %c119 = arith.constant 119 : index
    %146 = vector.load %arg10[%c0_141, %c119] : memref<128x153xf32, #tpu.memory_space<vmem>>, vector<32x17xf32>
    tpu.vector_store %arg10[%c0_141, %c119], %145 {strides = array<i32>} : memref<128x153xf32, #tpu.memory_space<vmem>>, vector<32x17xf32>,
    %c26 = arith.constant 26 : index
    %c0_142 = arith.constant 0 : index
    %147 = vector.load %arg9[%c26, %c0_142] : memref<64x17xf32, #tpu.memory_space<vmem>>, vector<32x17xf32>
    %c0_143 = arith.constant 0 : index
    %c136 = arith.constant 136 : index
    %148 = vector.load %arg10[%c0_143, %c136] : memref<128x153xf32, #tpu.memory_space<vmem>>, vector<32x17xf32>
    tpu.vector_store %arg10[%c0_143, %c136], %147 {strides = array<i32>} : memref<128x153xf32, #tpu.memory_space<vmem>>, vector<32x17xf32>,
    %c0_144 = arith.constant 0 : index
    %c0_145 = arith.constant 0 : index
    %149 = vector.load %arg10[%c0_144, %c0_145] : memref<128x153xf32, #tpu.memory_space<vmem>>, vector<32x153xf32>
    %150 = arith.mulf %149, %130 : vector<32x153xf32>
    %151 = arith.truncf %150 : vector<32x153xf32> to vector<32x153xbf16>
    %cst_146 = arith.constant dense<0.000000e+00> : vector<32x16xf32>
    %152 = tpu.matmul %151, %128, %cst_146 {dimension_numbers = #tpu.dot_dimension_numbers<[1], [0], [0], [1], [0, 0, 1, 1], [], []>} : vector<32x153xbf16>, vector<153x16xbf16>, vector<32x16xf32> -> vector<32x16xf32>
    %153 = arith.extf %129 : vector<1x16xbf16> to vector<1x16xf32>
    %154 = vector.broadcast %153 : vector<1x16xf32> to vector<32x16xf32>
    %155 = arith.addf %152, %154 : vector<32x16xf32>
    %cst_147 = arith.constant 0.000000e+00 : f32
    %156 = vector.broadcast %cst_147 : f32 to vector<32x16xf32>
    %157 = arith.cmpf oge, %155, %156 : vector<32x16xf32>
    %cst_148 = arith.constant 2.000000e-01 : f32
    %158 = vector.broadcast %cst_148 : f32 to vector<32x16xf32>
    %159 = arith.mulf %158, %155 : vector<32x16xf32>
    %160 = arith.select %157, %155, %159 : vector<32x16xi1>, vector<32x16xf32>
    %c16_149 = arith.constant 16 : index
    %c0_150 = arith.constant 0 : index
    %161 = vector.load %arg9[%c16_149, %c0_150] : memref<64x17xf32, #tpu.memory_space<vmem>>, vector<32x16xf32>
    tpu.vector_store %arg9[%c16_149, %c0_150], %160 {strides = array<i32>} : memref<64x17xf32, #tpu.memory_space<vmem>>, vector<32x16xf32>,
    %c16_151 = arith.constant 16 : index
    %c0_152 = arith.constant 0 : index
    %162 = vector.load %arg9[%c16_151, %c0_152] : memref<64x17xf32, #tpu.memory_space<vmem>>, vector<2x16xf32>
    %c0_153 = arith.constant 0 : index
    %c0_154 = arith.constant 0 : index
    %163 = vector.load %arg11[%c0_153, %c0_154] : memref<2x256xf32, #tpu.memory_space<vmem>>, vector<2x16xf32>
    tpu.vector_store %arg11[%c0_153, %c0_154], %162 {strides = array<i32>} : memref<2x256xf32, #tpu.memory_space<vmem>>, vector<2x16xf32>,
    %c18_155 = arith.constant 18 : index
    %c0_156 = arith.constant 0 : index
    %164 = vector.load %arg9[%c18_155, %c0_156] : memref<64x17xf32, #tpu.memory_space<vmem>>, vector<2x16xf32>
    %c0_157 = arith.constant 0 : index
    %c16_158 = arith.constant 16 : index
    %165 = vector.load %arg11[%c0_157, %c16_158] : memref<2x256xf32, #tpu.memory_space<vmem>>, vector<2x16xf32>
    tpu.vector_store %arg11[%c0_157, %c16_158], %164 {strides = array<i32>} : memref<2x256xf32, #tpu.memory_space<vmem>>, vector<2x16xf32>,
    %c20 = arith.constant 20 : index
    %c0_159 = arith.constant 0 : index
    %166 = vector.load %arg9[%c20, %c0_159] : memref<64x17xf32, #tpu.memory_space<vmem>>, vector<2x16xf32>
    %c0_160 = arith.constant 0 : index
    %c32_161 = arith.constant 32 : index
    %167 = vector.load %arg11[%c0_160, %c32_161] : memref<2x256xf32, #tpu.memory_space<vmem>>, vector<2x16xf32>
    tpu.vector_store %arg11[%c0_160, %c32_161], %166 {strides = array<i32>} : memref<2x256xf32, #tpu.memory_space<vmem>>, vector<2x16xf32>,
    %c22_162 = arith.constant 22 : index
    %c0_163 = arith.constant 0 : index
    %168 = vector.load %arg9[%c22_162, %c0_163] : memref<64x17xf32, #tpu.memory_space<vmem>>, vector<2x16xf32>
    %c0_164 = arith.constant 0 : index
    %c48_165 = arith.constant 48 : index
    %169 = vector.load %arg11[%c0_164, %c48_165] : memref<2x256xf32, #tpu.memory_space<vmem>>, vector<2x16xf32>
    tpu.vector_store %arg11[%c0_164, %c48_165], %168 {strides = array<i32>} : memref<2x256xf32, #tpu.memory_space<vmem>>, vector<2x16xf32>,
    %c24_166 = arith.constant 24 : index
    %c0_167 = arith.constant 0 : index
    %170 = vector.load %arg9[%c24_166, %c0_167] : memref<64x17xf32, #tpu.memory_space<vmem>>, vector<2x16xf32>
    %c0_168 = arith.constant 0 : index
    %c64_169 = arith.constant 64 : index
    %171 = vector.load %arg11[%c0_168, %c64_169] : memref<2x256xf32, #tpu.memory_space<vmem>>, vector<2x16xf32>
    tpu.vector_store %arg11[%c0_168, %c64_169], %170 {strides = array<i32>} : memref<2x256xf32, #tpu.memory_space<vmem>>, vector<2x16xf32>,
    %c26_170 = arith.constant 26 : index
    %c0_171 = arith.constant 0 : index
    %172 = vector.load %arg9[%c26_170, %c0_171] : memref<64x17xf32, #tpu.memory_space<vmem>>, vector<2x16xf32>
    %c0_172 = arith.constant 0 : index
    %c80_173 = arith.constant 80 : index
    %173 = vector.load %arg11[%c0_172, %c80_173] : memref<2x256xf32, #tpu.memory_space<vmem>>, vector<2x16xf32>
    tpu.vector_store %arg11[%c0_172, %c80_173], %172 {strides = array<i32>} : memref<2x256xf32, #tpu.memory_space<vmem>>, vector<2x16xf32>,
    %c28 = arith.constant 28 : index
    %c0_174 = arith.constant 0 : index
    %174 = vector.load %arg9[%c28, %c0_174] : memref<64x17xf32, #tpu.memory_space<vmem>>, vector<2x16xf32>
    %c0_175 = arith.constant 0 : index
    %c96_176 = arith.constant 96 : index
    %175 = vector.load %arg11[%c0_175, %c96_176] : memref<2x256xf32, #tpu.memory_space<vmem>>, vector<2x16xf32>
    tpu.vector_store %arg11[%c0_175, %c96_176], %174 {strides = array<i32>} : memref<2x256xf32, #tpu.memory_space<vmem>>, vector<2x16xf32>,
    %c30 = arith.constant 30 : index
    %c0_177 = arith.constant 0 : index
    %176 = vector.load %arg9[%c30, %c0_177] : memref<64x17xf32, #tpu.memory_space<vmem>>, vector<2x16xf32>
    %c0_178 = arith.constant 0 : index
    %c112_179 = arith.constant 112 : index
    %177 = vector.load %arg11[%c0_178, %c112_179] : memref<2x256xf32, #tpu.memory_space<vmem>>, vector<2x16xf32>
    tpu.vector_store %arg11[%c0_178, %c112_179], %176 {strides = array<i32>} : memref<2x256xf32, #tpu.memory_space<vmem>>, vector<2x16xf32>,
    %c32_180 = arith.constant 32 : index
    %c0_181 = arith.constant 0 : index
    %178 = vector.load %arg9[%c32_180, %c0_181] : memref<64x17xf32, #tpu.memory_space<vmem>>, vector<2x16xf32>
    %c0_182 = arith.constant 0 : index
    %c128_183 = arith.constant 128 : index
    %179 = vector.load %arg11[%c0_182, %c128_183] : memref<2x256xf32, #tpu.memory_space<vmem>>, vector<2x16xf32>
    tpu.vector_store %arg11[%c0_182, %c128_183], %178 {strides = array<i32>} : memref<2x256xf32, #tpu.memory_space<vmem>>, vector<2x16xf32>,
    %c34_184 = arith.constant 34 : index
    %c0_185 = arith.constant 0 : index
    %180 = vector.load %arg9[%c34_184, %c0_185] : memref<64x17xf32, #tpu.memory_space<vmem>>, vector<2x16xf32>
    %c0_186 = arith.constant 0 : index
    %c144_187 = arith.constant 144 : index
    %181 = vector.load %arg11[%c0_186, %c144_187] : memref<2x256xf32, #tpu.memory_space<vmem>>, vector<2x16xf32>
    tpu.vector_store %arg11[%c0_186, %c144_187], %180 {strides = array<i32>} : memref<2x256xf32, #tpu.memory_space<vmem>>, vector<2x16xf32>,
    %c36 = arith.constant 36 : index
    %c0_188 = arith.constant 0 : index
    %182 = vector.load %arg9[%c36, %c0_188] : memref<64x17xf32, #tpu.memory_space<vmem>>, vector<2x16xf32>
    %c0_189 = arith.constant 0 : index
    %c160_190 = arith.constant 160 : index
    %183 = vector.load %arg11[%c0_189, %c160_190] : memref<2x256xf32, #tpu.memory_space<vmem>>, vector<2x16xf32>
    tpu.vector_store %arg11[%c0_189, %c160_190], %182 {strides = array<i32>} : memref<2x256xf32, #tpu.memory_space<vmem>>, vector<2x16xf32>,
    %c38 = arith.constant 38 : index
    %c0_191 = arith.constant 0 : index
    %184 = vector.load %arg9[%c38, %c0_191] : memref<64x17xf32, #tpu.memory_space<vmem>>, vector<2x16xf32>
    %c0_192 = arith.constant 0 : index
    %c176 = arith.constant 176 : index
    %185 = vector.load %arg11[%c0_192, %c176] : memref<2x256xf32, #tpu.memory_space<vmem>>, vector<2x16xf32>
    tpu.vector_store %arg11[%c0_192, %c176], %184 {strides = array<i32>} : memref<2x256xf32, #tpu.memory_space<vmem>>, vector<2x16xf32>,
    %c40 = arith.constant 40 : index
    %c0_193 = arith.constant 0 : index
    %186 = vector.load %arg9[%c40, %c0_193] : memref<64x17xf32, #tpu.memory_space<vmem>>, vector<2x16xf32>
    %c0_194 = arith.constant 0 : index
    %c192 = arith.constant 192 : index
    %187 = vector.load %arg11[%c0_194, %c192] : memref<2x256xf32, #tpu.memory_space<vmem>>, vector<2x16xf32>
    tpu.vector_store %arg11[%c0_194, %c192], %186 {strides = array<i32>} : memref<2x256xf32, #tpu.memory_space<vmem>>, vector<2x16xf32>,
    %c42 = arith.constant 42 : index
    %c0_195 = arith.constant 0 : index
    %188 = vector.load %arg9[%c42, %c0_195] : memref<64x17xf32, #tpu.memory_space<vmem>>, vector<2x16xf32>
    %c0_196 = arith.constant 0 : index
    %c208 = arith.constant 208 : index
    %189 = vector.load %arg11[%c0_196, %c208] : memref<2x256xf32, #tpu.memory_space<vmem>>, vector<2x16xf32>
    tpu.vector_store %arg11[%c0_196, %c208], %188 {strides = array<i32>} : memref<2x256xf32, #tpu.memory_space<vmem>>, vector<2x16xf32>,
    %c44 = arith.constant 44 : index
    %c0_197 = arith.constant 0 : index
    %190 = vector.load %arg9[%c44, %c0_197] : memref<64x17xf32, #tpu.memory_space<vmem>>, vector<2x16xf32>
    %c0_198 = arith.constant 0 : index
    %c224 = arith.constant 224 : index
    %191 = vector.load %arg11[%c0_198, %c224] : memref<2x256xf32, #tpu.memory_space<vmem>>, vector<2x16xf32>
    tpu.vector_store %arg11[%c0_198, %c224], %190 {strides = array<i32>} : memref<2x256xf32, #tpu.memory_space<vmem>>, vector<2x16xf32>,
    %c46 = arith.constant 46 : index
    %c0_199 = arith.constant 0 : index
    %192 = vector.load %arg9[%c46, %c0_199] : memref<64x17xf32, #tpu.memory_space<vmem>>, vector<2x16xf32>
    %c0_200 = arith.constant 0 : index
    %c240 = arith.constant 240 : index
    %193 = vector.load %arg11[%c0_200, %c240] : memref<2x256xf32, #tpu.memory_space<vmem>>, vector<2x16xf32>
    tpu.vector_store %arg11[%c0_200, %c240], %192 {strides = array<i32>} : memref<2x256xf32, #tpu.memory_space<vmem>>, vector<2x16xf32>,
    %c0_201 = arith.constant 0 : index
    %c0_202 = arith.constant 0 : index
    %194 = vector.load %arg11[%c0_201, %c0_202] : memref<2x256xf32, #tpu.memory_space<vmem>>, vector<2x256xf32>
    %c464 = arith.constant 464 : index
    %c0_203 = arith.constant 0 : index
    %195 = vector.load %arg2[%c464, %c0_203] : memref<744x16xbf16, #tpu.memory_space<vmem>>, vector<256x16xbf16>
    %196 = arith.truncf %194 : vector<2x256xf32> to vector<2x256xbf16>
    %cst_204 = arith.constant dense<0.000000e+00> : vector<2x16xf32>
    %197 = tpu.matmul %196, %195, %cst_204 {dimension_numbers = #tpu.dot_dimension_numbers<[1], [0], [0], [1], [0, 0, 1, 1], [], []>} : vector<2x256xbf16>, vector<256x16xbf16>, vector<2x16xf32> -> vector<2x16xf32>
    %c741 = arith.constant 741 : index
    %c0_205 = arith.constant 0 : index
    %198 = vector.load %arg2[%c741, %c0_205] : memref<744x16xbf16, #tpu.memory_space<vmem>>, vector<1x16xbf16>
    %199 = arith.extf %198 : vector<1x16xbf16> to vector<1x16xf32>
    %200 = vector.broadcast %199 : vector<1x16xf32> to vector<2x16xf32>
    %201 = arith.addf %197, %200 : vector<2x16xf32>
    %cst_206 = arith.constant 0.000000e+00 : f32
    %202 = vector.broadcast %cst_206 : f32 to vector<2x16xf32>
    %203 = arith.cmpf oge, %201, %202 : vector<2x16xf32>
    %cst_207 = arith.constant 2.000000e-01 : f32
    %204 = vector.broadcast %cst_207 : f32 to vector<2x16xf32>
    %205 = arith.mulf %204, %201 : vector<2x16xf32>
    %206 = arith.select %203, %201, %205 : vector<2x16xi1>, vector<2x16xf32>
    %c720 = arith.constant 720 : index
    %c0_208 = arith.constant 0 : index
    %207 = vector.load %arg2[%c720, %c0_208] : memref<744x16xbf16, #tpu.memory_space<vmem>>, vector<16x16xbf16>
    %208 = arith.truncf %206 : vector<2x16xf32> to vector<2x16xbf16>
    %cst_209 = arith.constant dense<0.000000e+00> : vector<2x16xf32>
    %209 = tpu.matmul %208, %207, %cst_209 {dimension_numbers = #tpu.dot_dimension_numbers<[1], [0], [0], [1], [0, 0, 1, 1], [], []>} : vector<2x16xbf16>, vector<16x16xbf16>, vector<2x16xf32> -> vector<2x16xf32>
    %c742 = arith.constant 742 : index
    %c0_210 = arith.constant 0 : index
    %210 = vector.load %arg2[%c742, %c0_210] : memref<744x16xbf16, #tpu.memory_space<vmem>>, vector<1x16xbf16>
    %211 = arith.extf %210 : vector<1x16xbf16> to vector<1x16xf32>
    %212 = vector.broadcast %211 : vector<1x16xf32> to vector<2x16xf32>
    %213 = arith.addf %209, %212 : vector<2x16xf32>
    %214 = vector.extract_strided_slice %213 {offsets = [0, 0], sizes = [2, 1], strides = [1, 1]} : vector<2x16xf32> to vector<2x1xf32>
    %c0_211 = arith.constant 0 : index
    %c0_212 = arith.constant 0 : index
    %215 = vector.load %arg7[%c0_211, %c0_212] : memref<2x1xf32, #tpu.memory_space<vmem>>, vector<2x1xf32>
    tpu.vector_store %arg7[%c0_211, %c0_212], %214 {strides = array<i32>} : memref<2x1xf32, #tpu.memory_space<vmem>>, vector<2x1xf32>,
    return
  }
}

</mosaic_0001>

<bundles_post_ra>
// kernel: discriminator_forward.1
= control target key start
LH: loop header
LB: loop body
LE: loop exit
PB: predicated region body
PF: predicated region fallthrough
CT: control target
= control target key end

     0   :  { %vm116_vm0 = vcmask 1041408   ;;  %vm91_vm1 = vcmask 31744   ;;  %vm265_vm2 = vcmask 130048   ;;  %v4122_v10 = vmov 0.0   ;;  %s4123_s19 = smov 16   ;;  %s4124_s22 = smov 112   ;;  %s5656_s2 = inlined_call_operand.vmem [shape: bf16[744,16], index: 2, kind: input, shape index: {}]   ;;  %s5657_s1 = inlined_call_operand.vmem [shape: bf16[128,4], index: 1, kind: input, shape index: {}]   ;;  %s5658_s5 = inlined_call_operand.vmem [shape: f32[128,144], index: 5, kind: input, shape index: {}]   ;;  %s5659_s3 = inlined_call_operand.vmem [shape: bf16[32,128], index: 3, kind: input, shape index: {}]   ;;  %s5660_s4 = inlined_call_operand.vmem [shape: bf16[32,32], index: 4, kind: input, shape index: {}]   ;;  %s5661_s0 = inlined_call_operand.<no memory space> [shape: f32[1], index: 0, kind: input, shape index: {}]   ;;  %s5662_s6 = inlined_call_operand.vmem [shape: f32[32,153], index: 6, kind: input, shape index: {}]   ;;  %s5663_s7 = inlined_call_operand.vmem [shape: f32[2,1], index: 7, kind: output, shape index: {}]  }
   0x1   :  { %v44_v0 = vld [vmem:[%s5656_s2] sm:$0x3]  ;;  %v4018_v3 = vld [vmem:[%s5657_s1 + $0x8] sm:$0xff]   ;;  %v4019_v4 = vld [vmem:[%s5657_s1 + $0x10] sm:$0xff]   ;;  %267 = vst.msk [vmem:[#allocation2 + $0x8] sm:$0xff] %vm265_vm2, %v4122_v10  ;;  %v47_v12 = vlaneseq  ;;  %vm449_vm3 = vcmask 261248  }
   0x2   :  { %3996 = vmatprep.subr.msk.bf16.mxu0 %vm116_vm0, %v44_v0  ;;  %v118_v1 = vsel %vm116_vm0, %v44_v0, 0  ;;  %v4017_v2 = vld [vmem:[%s5657_s1] sm:$0xff]   ;;  %v4020_v5 = vld [vmem:[%s5657_s1 + $0x18] sm:$0xff]   ;;  %v4022_v7 = vld [vmem:[%s5657_s1 + $0x28] sm:$0xff]   ;;  %266 = vst.msk [vmem:[#allocation2] sm:$0xff] %vm265_vm2, %v4122_v10  ;;  %s4125_s23 = smov 64  }
   0x3   :  { %3911 = vmatpush3.bf16.msra.mxu0 %v118_v1  ;;  %3912 = vmatprep.mubr.msk.bf16.mxu0 %vm91_vm1, %v4017_v2  ;;  %v4021_v6 = vld [vmem:[%s5657_s1 + $0x20] sm:$0xff]   ;;  %v4023_v8 = vld [vmem:[%s5657_s1 + $0x30] sm:$0xff]   ;;  %v4024_v9 = vld [vmem:[%s5657_s1 + $0x38] sm:$0xff]   ;;  %268 = vst.msk [vmem:[#allocation2 + $0x90] sm:$0xff] %vm265_vm2, %v4122_v10  ;;  %v4227_v13 = vshrl.u32 %v47_v12, 7  ;;  %v4126_v1 = vmov 0  }
   0x4   :  { %269 = vst.msk [vmem:[#allocation2 + $0x98] sm:$0xff] %vm265_vm2, %v4122_v10  ;;  %v45_v14 = vld [vmem:[%s5656_s2 + $0x170] sm:$0x1]  ;;  %v4025_v59 = vld [vmem:[%s5656_s2 + $0x40] sm:$0xff]   ;;  %1243 = vmatprep.subr.bf16.mxu1 %v4126_v1  ;;  %2322 = vmatprep.subr.bf16.mxu0 %v4126_v1  ;;  %s4127_s26 = smov 32   ;;  %s4128_s27 = smov 48  }
   0x5   :  { %v46_v15 = vunpack.c.l.bf16 %v45_v14  ;;  %v49_v16 = vsub.s32 0, %v4227_v13  ;;  %1244 = vmatpush1.bf16.msra.mxu1 %v4025_v59  ;;  %s4129_s13 = smov 80   ;;  %s4130_s16 = smov 96  }
   0x6   :  { %3913 = vmatmul.mubr.msk.bf16.vlgmr.msra.gmra.mxu0 %vm91_vm1, %v4018_v3  ;;  %1245 = vmatprep.subr.bf16.mxu1 %v4126_v1  ;;  %s2682_s20 = ssub.f32 1.0, %s5661_s0  ;;  %s4134_s12 = smov 51  }
   0x7   :  { %3916 = vmatprep.mubr.msk.bf16.mxu0 %vm91_vm1, %v4019_v4  ;;  %v4234_v19 = vrot.slane %v46_v15, %v49_v16  ;;  %s4135_s17 = smov 68   ;;  %s4136_s21 = smov 85  }
   0x8   :  { %v369_v11 = vld [vmem:[#allocation2 + $0x8] sm:$0xff]  ;;  %s4137_s8 = smov 102   ;;  %s4139_s9 = smov 8  }
   0x9   :  { %401 = vrot.lane.b32.xlu0 %v369_v11, %s4123_s19  ;;  %v337_v17 = vld [vmem:[#allocation2 + $0x7] sm:$0xff] }
   0xa   :  { %353 = vst.msk [vmem:[#allocation4] sm:$0xff] %vm265_vm2, %v337_v17  ;;  %v271_v17 = vld [vmem:[%s5658_s5 + $0x8] sm:$0xff] }
   0xe   :  { %3917 = vmatmul.mubr.msk.bf16.gmra.mxu0 %vm91_vm1, %v4020_v5 }
   0xf   :  { %3920 = vmatprep.mubr.msk.bf16.mxu0 %vm91_vm1, %v4021_v6 }
  0x16   :  { %3921 = vmatmul.mubr.msk.bf16.gmra.mxu0 %vm91_vm1, %v4022_v7 }
  0x17   :  { %3924 = vmatprep.mubr.msk.bf16.mxu0 %vm91_vm1, %v4023_v8 }
  0x1e   :  { %3925 = vmatmul.mubr.msk.bf16.gmra.mxu0 %vm91_vm1, %v4024_v9  ;;  %v4026_v9 = vld [vmem:[%s5656_s2 + $0x38] sm:$0xff]  }
  0x1f   :  { %1246 = vmatpush1.bf16.msra.mxu1 %v4026_v9 }
  0x20   :  { %1247 = vmatprep.subr.bf16.mxu1 %v4126_v1 }
  0x7b   :  { %v402_v18 = vpop.permute.xlu0 %401 }
  0x7c   :  { %450 = vst.msk [vmem:[#allocation4] sm:$0xff] %vm449_vm3, %v402_v18  ;;  %v273_v18 = vld [vmem:[%s5658_s5 + $0x18] sm:$0xff] }
  0xc6   :  { %v3914_v20 = vpop.f32.mrf.mxu0 }
  0xc7   :  { %v163_v21 = vadd.f32 %v3914_v20, %v4234_v19 }
  0xc8   :  { %v154_v22 = vpop.f32.mrf.mxu0 }
  0xc9   :  { %vm219_vm4 = vcmp.ge.f32.partialorder %v163_v21, 0.0  ;;  %v235_v23 = vmul.f32 0.2, %v163_v21  ;;  %v155_v24 = vadd.f32 %v154_v22, %v4234_v19 }
  0xca   :  { %v3915_v25 = vpop.f32.mrf.mxu0 }
  0xcb   :  { %v251_v26 = vsel %vm219_vm4, %v163_v21, %v235_v23  ;;  %vm217_vm5 = vcmp.ge.f32.partialorder %v155_v24, 0.0  ;;  %v233_v27 = vmul.f32 0.2, %v155_v24  ;;  %v166_v28 = vadd.f32 %v3915_v25, %v4234_v19 }
  0xcc   :  { %304 = vst.msk [vmem:[#allocation2 + $0x20] sm:$0xff] %vm265_vm2, %v251_v26  ;;  %v157_v29 = vpop.f32.mrf.mxu0 }
  0xcd   :  { %v249_v30 = vsel %vm217_vm5, %v155_v24, %v233_v27  ;;  %vm220_vm6 = vcmp.ge.f32.partialorder %v166_v28, 0.0  ;;  %v236_v31 = vmul.f32 0.2, %v166_v28  ;;  %v158_v32 = vadd.f32 %v157_v29, %v4234_v19 }
  0xce   :  { %302 = vst.msk [vmem:[#allocation2 + $0x10] sm:$0xff] %vm265_vm2, %v249_v30  ;;  %v3918_v33 = vpop.f32.mrf.mxu0 }
  0xcf   :  { %v252_v34 = vsel %vm220_vm6, %v166_v28, %v236_v31  ;;  %vm218_vm7 = vcmp.ge.f32.partialorder %v158_v32, 0.0  ;;  %v234_v35 = vmul.f32 0.2, %v158_v32  ;;  %v179_v36 = vadd.f32 %v3918_v33, %v4234_v19  ;;  %v4027_v28 = vld [vmem:[%s5656_s2 + $0x30] sm:$0xff]  }
  0xd0   :  { %305 = vst.msk [vmem:[#allocation2 + $0x28] sm:$0xff] %vm265_vm2, %v252_v34  ;;  %v170_v37 = vpop.f32.mrf.mxu0  ;;  %1248 = vmatpush1.bf16.msra.mxu1 %v4027_v28 }
  0xd1   :  { %v250_v38 = vsel %vm218_vm7, %v158_v32, %v234_v35  ;;  %vm223_vm8 = vcmp.ge.f32.partialorder %v179_v36, 0.0  ;;  %v239_v39 = vmul.f32 0.2, %v179_v36  ;;  %v171_v40 = vadd.f32 %v170_v37, %v4234_v19  ;;  %1249 = vmatprep.subr.bf16.mxu1 %v4126_v1 }
  0xd2   :  { %303 = vst.msk [vmem:[#allocation2 + $0x18] sm:$0xff] %vm265_vm2, %v250_v38  ;;  %v3919_v41 = vpop.f32.mrf.mxu0 }
  0xd3   :  { %v255_v42 = vsel %vm223_vm8, %v179_v36, %v239_v39  ;;  %vm221_vm9 = vcmp.ge.f32.partialorder %v171_v40, 0.0  ;;  %v237_v43 = vmul.f32 0.2, %v171_v40  ;;  %v182_v44 = vadd.f32 %v3919_v41, %v4234_v19  ;;  %v952_v45 = vld [vmem:[#allocation2 + $0x20] sm:$0xff] }
  0xd4   :  { %308 = vst.msk [vmem:[#allocation2 + $0x40] sm:$0xff] %vm265_vm2, %v255_v42  ;;  %985 = vrot.lane.b32.xlu1 %v952_v45, %s4124_s22  ;;  %696 = vrot.lane.b32.xlu0 %v952_v45, %s4125_s23  ;;  %v173_v46 = vpop.f32.mrf.mxu0  ;;  %vm546_vm8 = vcmask 392448  }
  0xd5   :  { %v253_v47 = vsel %vm221_vm9, %v171_v40, %v237_v43  ;;  %vm224_vm10 = vcmp.ge.f32.partialorder %v182_v44, 0.0  ;;  %v240_v48 = vmul.f32 0.2, %v182_v44  ;;  %v174_v49 = vadd.f32 %v173_v46, %v4234_v19  ;;  %v563_v50 = vld [vmem:[#allocation2 + $0xf] sm:$0xff] }
  0xd6   :  { %306 = vst.msk [vmem:[#allocation2 + $0x30] sm:$0xff] %vm265_vm2, %v253_v47  ;;  %v3922_v51 = vpop.f32.mrf.mxu0  ;;  %354 = vst.msk [vmem:[#allocation4 + $0x10] sm:$0xff] %vm265_vm2, %v563_v50  ;;  %v370_v55 = vld [vmem:[#allocation2 + $0x10] sm:$0xff]  ;;  %vm643_vm9 = vcmask 523648  }
  0xd7   :  { %v4254_v52 = vld [vmem:[#allocation2 + $0x21] sm:$0xff]  ;;  %v256_v53 = vsel %vm224_vm10, %v182_v44, %v240_v48  ;;  %vm222_vm11 = vcmp.ge.f32.partialorder %v174_v49, 0.0  ;;  %v238_v54 = vmul.f32 0.2, %v174_v49  ;;  %v195_v57 = vadd.f32 %v3922_v51, %v4234_v19  ;;  %v466_v4 = vld [vmem:[#allocation2 + $0x9] sm:$0xff] }
  0xd8   :  { %v4256_v56 = vld [vmem:[#allocation2 + $0x27] sm:$0xff]  ;;  %1065 = vst.msk [vmem:[#allocation4 + $0x18] sm:$0xff] %vm265_vm2, %v4254_v52  ;;  %309 = vst.msk [vmem:[#allocation2 + $0x48] sm:$0xff] %vm265_vm2, %v256_v53  ;;  %407 = vrot.lane.b32.xlu1 %v952_v45, %s4123_s19  ;;  %403 = vrot.lane.b32.xlu0 %v370_v55, %s4123_s19  ;;  %v186_v58 = vpop.f32.mrf.mxu0  ;;  %vm740_vm10 = vcmask 654848  }
  0xd9   :  { %357 = vst.msk [vmem:[#allocation4 + $0x40] sm:$0xff] %vm265_vm2, %v4256_v56  ;;  %v4269_v60 = vld [vmem:[#allocation2 + $0x19] sm:$0xff]  ;;  %v254_v61 = vsel %vm222_vm11, %v174_v49, %v238_v54  ;;  %vm227_vm12 = vcmp.ge.f32.partialorder %v195_v57, 0.0  ;;  %v243_v62 = vmul.f32 0.2, %v195_v57  ;;  %v187_v63 = vadd.f32 %v186_v58, %v4234_v19  ;;  %v4028_v45 = vld [vmem:[%s5656_s2 + $0x28] sm:$0xff]  }
  0xda   :  { %v4272_v0 = vld [vmem:[#allocation2 + $0x17] sm:$0xff]  ;;  %1064 = vst.msk [vmem:[#allocation4 + $0x8] sm:$0xff] %vm265_vm2, %v4269_v60  ;;  %307 = vst.msk [vmem:[#allocation2 + $0x38] sm:$0xff] %vm265_vm2, %v254_v61  ;;  %v3923_v2 = vpop.f32.mrf.mxu0  ;;  %v4279_v3 = vld [vmem:[#allocation2 + $0x1f] sm:$0xff]  ;;  %1250 = vmatpush1.bf16.msra.mxu1 %v4028_v45  ;;  %vm837_vm11 = vcmask 786048  }
  0xdb   :  { %355 = vst.msk [vmem:[#allocation4 + $0x20] sm:$0xff] %vm265_vm2, %v4272_v0  ;;  %v259_v5 = vsel %vm227_vm12, %v195_v57, %v243_v62  ;;  %vm225_vm13 = vcmp.ge.f32.partialorder %v187_v63, 0.0  ;;  %v241_v6 = vmul.f32 0.2, %v187_v63  ;;  %v198_v7 = vadd.f32 %v3923_v2, %v4234_v19  ;;  %356 = vst.msk [vmem:[#allocation4 + $0x30] sm:$0xff] %vm265_vm2, %v4279_v3  ;;  %v663_v51 = vld [vmem:[#allocation2 + $0x28] sm:$0xff]  ;;  %1251 = vmatprep.subr.bf16.mxu1 %v4126_v1 }
  0xdc   :  { %498 = vrot.lane.b32.xlu1 %v466_v4, %s4127_s26  ;;  %595 = vrot.lane.b32.xlu0 %v563_v50, %s4128_s27  ;;  %312 = vst.msk [vmem:[#allocation2 + $0x60] sm:$0xff] %vm265_vm2, %v259_v5  ;;  %v189_v8 = vpop.f32.mrf.mxu0  ;;  %v467_v62 = vld [vmem:[#allocation2 + $0x11] sm:$0xff]  ;;  %vm934_vm12 = vcmask 917248  }
  0xdd   :  { %v4293_v11 = vld [vmem:[#allocation2 + $0x29] sm:$0xff]  ;;  %v257_v12 = vsel %vm225_vm13, %v187_v63, %v241_v6  ;;  %vm228_vm14 = vcmp.ge.f32.partialorder %v198_v7, 0.0  ;;  %v244_v14 = vmul.f32 0.2, %v198_v7  ;;  %v190_v15 = vadd.f32 %v189_v8, %v4234_v19  ;;  %v4030_v63 = vld [vmem:[%s5656_s2 + $0x18] sm:$0xff]  }
  0xde   :  { %v4296_v16 = vld [vmem:[#allocation2 + $0x2f] sm:$0xff]  ;;  %1066 = vst.msk [vmem:[#allocation4 + $0x28] sm:$0xff] %vm265_vm2, %v4293_v11  ;;  %310 = vst.msk [vmem:[#allocation2 + $0x50] sm:$0xff] %vm265_vm2, %v257_v12  ;;  %v3926_v20 = vpop.f32.mrf.mxu0  ;;  %vm1031_vm13 = vcmask 1048448  }
  0xdf   :  { %358 = vst.msk [vmem:[#allocation4 + $0x50] sm:$0xff] %vm265_vm2, %v4296_v16  ;;  %v4309_v21 = vld [vmem:[#allocation2 + $0x41] sm:$0xff]  ;;  %v1083_v22 = vld [vmem:[#allocation4 + $0x18] sm:$0xff]  ;;  %v260_v23 = vsel %vm228_vm14, %v198_v7, %v244_v14  ;;  %vm226_vm15 = vcmp.ge.f32.partialorder %v190_v15, 0.0  ;;  %v242_v24 = vmul.f32 0.2, %v190_v15  ;;  %v211_v26 = vadd.f32 %v3926_v20, %v4234_v19 }
  0xe0   :  { %v4311_v25 = vld [vmem:[#allocation2 + $0x47] sm:$0xff]  ;;  %1069 = vst.msk [vmem:[#allocation4 + $0x58] sm:$0xff] %vm265_vm2, %v4309_v21  ;;  %504 = vrot.lane.b32.xlu1 %v4254_v52, %s4127_s26  ;;  %692 = vrot.lane.b32.xlu0 %v370_v55, %s4125_s23  ;;  %313 = vst.msk [vmem:[#allocation2 + $0x68] sm:$0xff] %vm265_vm2, %v260_v23  ;;  %v202_v27 = vpop.f32.mrf.mxu0  ;;  %v1115_v36 = vmul.f32 %v1083_v22, %v273_v18  ;;  %v1063_v5 = vld [vmem:[#allocation2 + $0x91] sm:$0xff] }
  0xe1   :  { %361 = vst.msk [vmem:[#allocation4 + $0x80] sm:$0xff] %vm265_vm2, %v4311_v25  ;;  %v4326_v29 = vld [vmem:[#allocation2 + $0x31] sm:$0xff]  ;;  %v4328_v30 = vld [vmem:[#allocation2 + $0x39] sm:$0xff]  ;;  %v1081_v31 = vld [vmem:[#allocation4 + $0x8] sm:$0xff]  ;;  %v258_v32 = vsel %vm226_vm15, %v190_v15, %v242_v24  ;;  %vm231_vm4 = vcmp.ge.f32.partialorder %v211_v26, 0.0  ;;  %v203_v34 = vadd.f32 %v202_v27, %v4234_v19 }
  0xe2   :  { %v247_v33 = vmul.f32 0.2, %v211_v26  ;;  %1067 = vst.msk [vmem:[#allocation4 + $0x38] sm:$0xff] %vm265_vm2, %v4326_v29  ;;  %1068 = vst.msk [vmem:[#allocation4 + $0x48] sm:$0xff] %vm265_vm2, %v4328_v30  ;;  %v1113_v35 = vmul.f32 %v1081_v31, %v271_v17  ;;  %v3927_v37 = vpop.f32.mrf.mxu0  ;;  %v4336_v38 = vld [vmem:[#allocation2 + $0x37] sm:$0xff]  ;;  %v4338_v39 = vld [vmem:[#allocation2 + $0x3f] sm:$0xff] }
  0xe3   :  { %311 = vst.msk [vmem:[#allocation2 + $0x58] sm:$0xff] %vm265_vm2, %v258_v32  ;;  %vm229_vm5 = vcmp.ge.f32.partialorder %v203_v34, 0.0  ;;  %v245_v41 = vmul.f32 0.2, %v203_v34  ;;  %v214_v42 = vadd.f32 %v3927_v37, %v4234_v19  ;;  %360 = vst.msk [vmem:[#allocation4 + $0x70] sm:$0xff] %vm265_vm2, %v4338_v39  ;;  %v4029_v55 = vld [vmem:[%s5656_s2 + $0x20] sm:$0xff]  }
  0xe4   :  { %v263_v40 = vsel %vm231_vm4, %v211_v26, %v247_v33  ;;  %359 = vst.msk [vmem:[#allocation4 + $0x60] sm:$0xff] %vm265_vm2, %v4336_v38  ;;  %601 = vrot.lane.b32.xlu1 %v4256_v56, %s4128_s27  ;;  %793 = vrot.lane.b32.xlu0 %v4254_v52, %s4129_s13  ;;  %v1145_v43 = vpack.c.bf16 %v1115_v36, %v1113_v35  ;;  %v205_v44 = vpop.f32.mrf.mxu0  ;;  %1079 = vst.msk [vmem:[#allocation4 + $0xf8] sm:$0xff] %vm265_vm2, %v1063_v5  ;;  %v4031_v7 = vld [vmem:[%s5656_s2 + $0x10] sm:$0xff]   ;;  %v661_v17 = vld [vmem:[#allocation2 + $0x18] sm:$0xff] }
  0xe5   :  { %316 = vst.msk [vmem:[#allocation2 + $0x80] sm:$0xff] %vm265_vm2, %v263_v40  ;;  %v4354_v46 = vld [vmem:[#allocation2 + $0x49] sm:$0xff]  ;;  %v261_v47 = vsel %vm229_vm5, %v203_v34, %v245_v41  ;;  %vm232_vm6 = vcmp.ge.f32.partialorder %v214_v42, 0.0  ;;  %v248_v48 = vmul.f32 0.2, %v214_v42  ;;  %v206_v49 = vadd.f32 %v205_v44, %v4234_v19  ;;  %1252 = vmatpush1.bf16.msra.mxu1 %v4029_v55  ;;  %v956_v23 = vld [vmem:[#allocation2 + $0x40] sm:$0xff] }
  0xe6   :  { %v4357_v50 = vld [vmem:[#allocation2 + $0x4f] sm:$0xff]  ;;  %3766 = vmatprep.mubr.msk.bf16.mxu1 %vm265_vm2, %v1145_v43  ;;  %1070 = vst.msk [vmem:[#allocation4 + $0x68] sm:$0xff] %vm265_vm2, %v4354_v46  ;;  %314 = vst.msk [vmem:[#allocation2 + $0x70] sm:$0xff] %vm265_vm2, %v261_v47  ;;  %1253 = vmatprep.subr.bf16.mxu1 %v4126_v1 }
  0xe7   :  { %362 = vst.msk [vmem:[#allocation4 + $0x90] sm:$0xff] %vm265_vm2, %v4357_v50  ;;  %v4365_v52 = vld [vmem:[#allocation2 + $0x61] sm:$0xff]  ;;  %v264_v53 = vsel %vm232_vm6, %v214_v42, %v248_v48  ;;  %vm230_vm7 = vcmp.ge.f32.partialorder %v206_v49, 0.0  ;;  %v246_v54 = vmul.f32 0.2, %v206_v49  ;;  %v958_v24 = vld [vmem:[#allocation2 + $0x50] sm:$0xff] }
  0xe8   :  { %v4367_v19 = vld [vmem:[#allocation2 + $0x67] sm:$0xff]  ;;  %698 = vrot.lane.b32.xlu1 %v663_v51, %s4125_s23  ;;  %890 = vrot.lane.b32.xlu0 %v4256_v56, %s4130_s16  ;;  %1073 = vst.msk [vmem:[#allocation4 + $0x98] sm:$0xff] %vm265_vm2, %v4365_v52  ;;  %317 = vst.msk [vmem:[#allocation2 + $0x88] sm:$0xff] %vm265_vm2, %v264_v53 }
  0xe9   :  { %365 = vst.msk [vmem:[#allocation4 + $0xc0] sm:$0xff] %vm265_vm2, %v4367_v19  ;;  %v262_v59 = vsel %vm230_vm7, %v206_v49, %v246_v54  ;;  %1254 = vmatpush1.bf16.msra.mxu1 %v4030_v63  ;;  %v4032_v18 = vld [vmem:[%s5656_s2 + $0x8] sm:$0xff]   ;;  %v1087_v53 = vld [vmem:[#allocation4 + $0x38] sm:$0xff] }
  0xea   :  { %v4381_v57 = vld [vmem:[#allocation2 + $0x51] sm:$0xff]  ;;  %v4383_v58 = vld [vmem:[#allocation2 + $0x59] sm:$0xff]  ;;  %315 = vst.msk [vmem:[#allocation2 + $0x78] sm:$0xff] %vm265_vm2, %v262_v59  ;;  %1255 = vmatprep.subr.bf16.mxu1 %v4126_v1  ;;  %v4033_v20 = vld [vmem:[%s5656_s2 + $0x48] sm:$0xff]  }
  0xeb   :  { %v4385_v61 = vld [vmem:[#allocation2 + $0x57] sm:$0xff]  ;;  %1071 = vst.msk [vmem:[#allocation4 + $0x78] sm:$0xff] %vm265_vm2, %v4381_v57  ;;  %1072 = vst.msk [vmem:[#allocation4 + $0x88] sm:$0xff] %vm265_vm2, %v4383_v58  ;;  %v4392_v56 = vld [vmem:[#allocation2 + $0x5f] sm:$0xff] }
  0xec   :  { %363 = vst.msk [vmem:[#allocation4 + $0xa0] sm:$0xff] %vm265_vm2, %v4385_v61  ;;  %364 = vst.msk [vmem:[#allocation4 + $0xb0] sm:$0xff] %vm265_vm2, %v4392_v56  ;;  %500 = vrot.lane.b32.xlu1 %v467_v62, %s4127_s26  ;;  %987 = vrot.lane.b32.xlu0 %v663_v51, %s4124_s22  ;;  %v4458_v22 = vld [vmem:[#allocation4 + $0xf8] sm:$0xff]  ;;  %v671_v33 = vld [vmem:[#allocation2 + $0x68] sm:$0xff] }
  0xed   :  { %v4404_v2 = vld [vmem:[#allocation2 + $0x69] sm:$0xff]  ;;  %1256 = vmatpush1.bf16.msra.mxu1 %v4031_v7  ;;  %2158 = vst.msk [vmem:[#allocation4 + $0xf8] sm:$0xff] %vm265_vm2, %v1063_v5  ;;  %v669_v40 = vld [vmem:[#allocation2 + $0x58] sm:$0xff]  ;;  %v964_v47 = vld [vmem:[#allocation2 + $0x80] sm:$0xff] }
  0xee   :  { %v4406_v4 = vld [vmem:[#allocation2 + $0x6f] sm:$0xff]  ;;  %1074 = vst.msk [vmem:[#allocation4 + $0xa8] sm:$0xff] %vm265_vm2, %v4404_v2  ;;  %1257 = vmatprep.subr.bf16.mxu1 %v4126_v1 }
  0xef   :  { %366 = vst.msk [vmem:[#allocation4 + $0xd0] sm:$0xff] %vm265_vm2, %v4406_v4  ;;  %v4412_v6 = vld [vmem:[#allocation2 + $0x81] sm:$0xff]  ;;  %v4424_v8 = vld [vmem:[#allocation2 + $0x89] sm:$0xff] }
  0xf0   :  { %597 = vrot.lane.b32.xlu1 %v4272_v0, %s4128_s27  ;;  %409 = vrot.lane.b32.xlu0 %v663_v51, %s4123_s19  ;;  %1077 = vst.msk [vmem:[#allocation4 + $0xd8] sm:$0xff] %vm265_vm2, %v4412_v6  ;;  %1078 = vst.msk [vmem:[#allocation4 + $0xe8] sm:$0xff] %vm265_vm2, %v4424_v8  ;;  %v272_v51 = vld [vmem:[%s5658_s5 + $0x10] sm:$0xff]  ;;  %v275_v59 = vld [vmem:[%s5658_s5 + $0x28] sm:$0xff] }
  0xf1   :  { %v4426_v9 = vld [vmem:[#allocation2 + $0x71] sm:$0xff]  ;;  %v4428_v12 = vld [vmem:[#allocation2 + $0x79] sm:$0xff]  ;;  %1258 = vmatpush1.bf16.msra.mxu1 %v4032_v18 }
  0xf2   :  { %v4430_v14 = vld [vmem:[#allocation2 + $0x77] sm:$0xff]  ;;  %1075 = vst.msk [vmem:[#allocation4 + $0xb8] sm:$0xff] %vm265_vm2, %v4426_v9  ;;  %1076 = vst.msk [vmem:[#allocation4 + $0xc8] sm:$0xff] %vm265_vm2, %v4428_v12  ;;  %v4438_v15 = vld [vmem:[#allocation2 + $0x7f] sm:$0xff]  ;;  %1273 = vmatprep.subr.bf16.mxu1 %v4126_v1 }
  0xf3   :  { %367 = vst.msk [vmem:[#allocation4 + $0xe0] sm:$0xff] %vm265_vm2, %v4430_v14  ;;  %368 = vst.msk [vmem:[#allocation4 + $0xf0] sm:$0xff] %vm265_vm2, %v4438_v15 }
  0xf4   :  { %694 = vrot.lane.b32.xlu1 %v661_v17, %s4125_s23  ;;  %789 = vrot.lane.b32.xlu0 %v467_v62, %s4129_s13 }
  0xf5   :  { %1274 = vmatpush2.bf16.msra.mxu1 %v4033_v20 }
  0xf8   :  { %791 = vrot.lane.b32.xlu1 %v4269_v60, %s4129_s13  ;;  %886 = vrot.lane.b32.xlu0 %v4272_v0, %s4130_s16  ;;  %v954_v0 = vld [vmem:[#allocation2 + $0x30] sm:$0xff] }
  0xfc   :  { %888 = vrot.lane.b32.xlu1 %v4279_v3, %s4130_s16  ;;  %983 = vrot.lane.b32.xlu0 %v661_v17, %s4124_s22 }
 0x100   :  { %993 = vrot.lane.b32.xlu1 %v956_v23, %s4124_s22  ;;  %405 = vrot.lane.b32.xlu0 %v661_v17, %s4123_s19 }
 0x104   :  { %415 = vrot.lane.b32.xlu1 %v956_v23, %s4123_s19  ;;  %502 = vrot.lane.b32.xlu0 %v4269_v60, %s4127_s26  ;;  %v667_v60 = vld [vmem:[#allocation2 + $0x48] sm:$0xff] }
 0x108   :  { %795 = vrot.lane.b32.xlu1 %v4293_v11, %s4129_s13  ;;  %599 = vrot.lane.b32.xlu0 %v4279_v3, %s4128_s27  ;;  %v665_v3 = vld [vmem:[#allocation2 + $0x38] sm:$0xff] }
 0x10c   :  { %892 = vrot.lane.b32.xlu1 %v4296_v16, %s4130_s16  ;;  %704 = vrot.lane.b32.xlu0 %v956_v23, %s4125_s23 }
 0x110   :  { %989 = vrot.lane.b32.xlu1 %v954_v0, %s4124_s22  ;;  %506 = vrot.lane.b32.xlu0 %v4293_v11, %s4127_s26  ;;  %v960_v11 = vld [vmem:[#allocation2 + $0x60] sm:$0xff] }
 0x114   :  { %411 = vrot.lane.b32.xlu1 %v954_v0, %s4123_s19  ;;  %603 = vrot.lane.b32.xlu0 %v4296_v16, %s4128_s27 }
 0x118   :  { %512 = vrot.lane.b32.xlu1 %v4309_v21, %s4127_s26  ;;  %700 = vrot.lane.b32.xlu0 %v954_v0, %s4125_s23  ;;  %v962_v0 = vld [vmem:[#allocation2 + $0x70] sm:$0xff] }
 0x11c   :  { %609 = vrot.lane.b32.xlu1 %v4311_v25, %s4128_s27  ;;  %801 = vrot.lane.b32.xlu0 %v4309_v21, %s4129_s13 }
 0x120   :  { %706 = vrot.lane.b32.xlu1 %v667_v60, %s4125_s23  ;;  %898 = vrot.lane.b32.xlu0 %v4311_v25, %s4130_s16 }
 0x124   :  { %508 = vrot.lane.b32.xlu1 %v4326_v29, %s4127_s26  ;;  %995 = vrot.lane.b32.xlu0 %v667_v60, %s4124_s22 }
 0x128   :  { %605 = vrot.lane.b32.xlu1 %v4336_v38, %s4128_s27  ;;  %417 = vrot.lane.b32.xlu0 %v667_v60, %s4123_s19 }
 0x12c   :  { %702 = vrot.lane.b32.xlu1 %v665_v3, %s4125_s23  ;;  %797 = vrot.lane.b32.xlu0 %v4326_v29, %s4129_s13 }
 0x130   :  { %799 = vrot.lane.b32.xlu1 %v4328_v30, %s4129_s13  ;;  %894 = vrot.lane.b32.xlu0 %v4336_v38, %s4130_s16 }
 0x134   :  { %896 = vrot.lane.b32.xlu1 %v4338_v39, %s4130_s16  ;;  %991 = vrot.lane.b32.xlu0 %v665_v3, %s4124_s22 }
 0x138   :  { %1001 = vrot.lane.b32.xlu1 %v960_v11, %s4124_s22  ;;  %413 = vrot.lane.b32.xlu0 %v665_v3, %s4123_s19 }
 0x13c   :  { %423 = vrot.lane.b32.xlu1 %v960_v11, %s4123_s19  ;;  %510 = vrot.lane.b32.xlu0 %v4328_v30, %s4127_s26 }
 0x140   :  { %803 = vrot.lane.b32.xlu1 %v4354_v46, %s4129_s13  ;;  %607 = vrot.lane.b32.xlu0 %v4338_v39, %s4128_s27 }
 0x144   :  { %900 = vrot.lane.b32.xlu1 %v4357_v50, %s4130_s16  ;;  %712 = vrot.lane.b32.xlu0 %v960_v11, %s4125_s23 }
 0x146   :  { %v4520_v16 = vpop.permute.xlu1 %985  ;;  %v4522_v21 = vpop.permute.xlu0 %696 }
 0x148   :  { %997 = vrot.lane.b32.xlu1 %v958_v24, %s4124_s22  ;;  %514 = vrot.lane.b32.xlu0 %v4354_v46, %s4127_s26 }
 0x14a   :  { %v408_v25 = vpop.permute.xlu1 %407  ;;  %v404_v26 = vpop.permute.xlu0 %403 }
 0x14b   :  { %453 = vst.msk [vmem:[#allocation4 + $0x30] sm:$0xff] %vm449_vm3, %v408_v25  ;;  %451 = vst.msk [vmem:[#allocation4 + $0x10] sm:$0xff] %vm449_vm3, %v404_v26  ;;  %v1091_v25 = vld [vmem:[#allocation4 + $0x58] sm:$0xff]  ;;  %v276_v26 = vld [vmem:[%s5658_s5 + $0x30] sm:$0xff] }
 0x14c   :  { %419 = vrot.lane.b32.xlu1 %v958_v24, %s4123_s19  ;;  %611 = vrot.lane.b32.xlu0 %v4357_v50, %s4128_s27  ;;  %v270_v50 = vld [vmem:[%s5658_s5] sm:$0xff] }
 0x14e   :  { %v499_v27 = vpop.permute.xlu1 %498  ;;  %v596_v28 = vpop.permute.xlu0 %595 }
 0x14f   :  { %547 = vst.msk [vmem:[#allocation4] sm:$0xff] %vm546_vm8, %v499_v27 }
 0x150   :  { %644 = vst.msk [vmem:[#allocation4] sm:$0xff] %vm643_vm9, %v596_v28  ;;  %520 = vrot.lane.b32.xlu1 %v4365_v52, %s4127_s26  ;;  %708 = vrot.lane.b32.xlu0 %v958_v24, %s4125_s23  ;;  %v1089_v24 = vld [vmem:[#allocation4 + $0x48] sm:$0xff] }
 0x152   :  { %v505_v29 = vpop.permute.xlu1 %504  ;;  %v693_v30 = vpop.permute.xlu0 %692 }
 0x153   :  { %550 = vst.msk [vmem:[#allocation4 + $0x30] sm:$0xff] %vm546_vm8, %v505_v29 }
 0x154   :  { %741 = vst.msk [vmem:[#allocation4] sm:$0xff] %vm740_vm10, %v693_v30  ;;  %617 = vrot.lane.b32.xlu1 %v4367_v19, %s4128_s27  ;;  %809 = vrot.lane.b32.xlu0 %v4365_v52, %s4129_s13  ;;  %v277_v52 = vld [vmem:[%s5658_s5 + $0x38] sm:$0xff] }
 0x155   :  { %v1119_v63 = vmul.f32 %v1087_v53, %v277_v52 }
 0x156   :  { %v602_v31 = vpop.permute.xlu1 %601  ;;  %v4543_v32 = vpop.permute.xlu0 %793 }
 0x157   :  { %647 = vst.msk [vmem:[#allocation4 + $0x30] sm:$0xff] %vm643_vm9, %v602_v31  ;;  %v578_v31 = vld [vmem:[#allocation2 + $0x87] sm:$0xff] }
 0x158   :  { %714 = vrot.lane.b32.xlu1 %v671_v33, %s4125_s23  ;;  %906 = vrot.lane.b32.xlu0 %v4367_v19, %s4130_s16 }
 0x15a   :  { %v699_v34 = vpop.permute.xlu1 %698  ;;  %v4549_v35 = vpop.permute.xlu0 %890 }
 0x15b   :  { %744 = vst.msk [vmem:[#allocation4 + $0x30] sm:$0xff] %vm740_vm10, %v699_v34 }
 0x15c   :  { %516 = vrot.lane.b32.xlu1 %v4381_v57, %s4127_s26  ;;  %1003 = vrot.lane.b32.xlu0 %v671_v33, %s4124_s22 }
 0x15e   :  { %v501_v36 = vpop.permute.xlu1 %500  ;;  %v4555_v37 = vpop.permute.xlu0 %987 }
 0x15f   :  { %548 = vst.msk [vmem:[#allocation4 + $0x10] sm:$0xff] %vm546_vm8, %v501_v36 }
 0x160   :  { %613 = vrot.lane.b32.xlu1 %v4385_v61, %s4128_s27  ;;  %425 = vrot.lane.b32.xlu0 %v671_v33, %s4123_s19 }
 0x162   :  { %v598_v38 = vpop.permute.xlu1 %597  ;;  %v410_v39 = vpop.permute.xlu0 %409 }
 0x163   :  { %645 = vst.msk [vmem:[#allocation4 + $0x10] sm:$0xff] %vm643_vm9, %v598_v38 }
 0x164   :  { %454 = vst.msk [vmem:[#allocation4 + $0x40] sm:$0xff] %vm449_vm3, %v410_v39  ;;  %710 = vrot.lane.b32.xlu1 %v669_v40, %s4125_s23  ;;  %805 = vrot.lane.b32.xlu0 %v4381_v57, %s4129_s13  ;;  %v675_v39 = vld [vmem:[#allocation2 + $0x88] sm:$0xff] }
 0x166   :  { %v695_v41 = vpop.permute.xlu1 %694  ;;  %v790_v42 = vpop.permute.xlu0 %789 }
 0x167   :  { %742 = vst.msk [vmem:[#allocation4 + $0x10] sm:$0xff] %vm740_vm10, %v695_v41 }
 0x168   :  { %838 = vst.msk [vmem:[#allocation4] sm:$0xff] %vm837_vm11, %v790_v42  ;;  %807 = vrot.lane.b32.xlu1 %v4383_v58, %s4129_s13  ;;  %902 = vrot.lane.b32.xlu0 %v4385_v61, %s4130_s16  ;;  %v1085_v61 = vld [vmem:[#allocation4 + $0x28] sm:$0xff] }
 0x169   :  { %v1117_v18 = vmul.f32 %v1085_v61, %v275_v59 }
 0x16a   :  { %v792_v43 = vpop.permute.xlu1 %791  ;;  %v887_v44 = vpop.permute.xlu0 %886 }
 0x16b   :  { %839 = vst.msk [vmem:[#allocation4 + $0x10] sm:$0xff] %vm837_vm11, %v792_v43  ;;  %v1147_v20 = vpack.c.bf16 %v1119_v63, %v1117_v18 }
 0x16c   :  { %935 = vst.msk [vmem:[#allocation4] sm:$0xff] %vm934_vm12, %v887_v44  ;;  %904 = vrot.lane.b32.xlu1 %v4392_v56, %s4130_s16  ;;  %999 = vrot.lane.b32.xlu0 %v669_v40, %s4124_s22 }
 0x16e   :  { %v889_v45 = vpop.permute.xlu1 %888  ;;  %v984_v46 = vpop.permute.xlu0 %983 }
 0x16f   :  { %936 = vst.msk [vmem:[#allocation4 + $0x10] sm:$0xff] %vm934_vm12, %v889_v45 }
 0x170   :  { %1032 = vst.msk [vmem:[#allocation4] sm:$0xff] %vm1031_vm13, %v984_v46  ;;  %1033 = vst.msk [vmem:[#allocation4 + $0x10] sm:$0xff] %vm1031_vm13, %v4520_v16  ;;  %1009 = vrot.lane.b32.xlu1 %v964_v47, %s4124_s22  ;;  %421 = vrot.lane.b32.xlu0 %v669_v40, %s4123_s19 }
 0x172   :  { %v4583_v48 = vpop.permute.xlu1 %993  ;;  %v406_v49 = vpop.permute.xlu0 %405 }
 0x173   :  { %452 = vst.msk [vmem:[#allocation4 + $0x20] sm:$0xff] %vm449_vm3, %v406_v49 }
 0x174   :  { %431 = vrot.lane.b32.xlu1 %v964_v47, %s4123_s19  ;;  %518 = vrot.lane.b32.xlu0 %v4383_v58, %s4127_s26 }
 0x176   :  { %v416_v54 = vpop.permute.xlu1 %415  ;;  %v503_v19 = vpop.permute.xlu0 %502 }
 0x177   :  { %v1080_v55 = vld [vmem:[#allocation4] sm:$0xff]  ;;  %457 = vst.msk [vmem:[#allocation4 + $0x70] sm:$0xff] %vm449_vm3, %v416_v54  ;;  %v1082_v57 = vld [vmem:[#allocation4 + $0x10] sm:$0xff]  ;;  %v283_v54 = vld [vmem:[%s5658_s5 + $0x68] sm:$0xff] }
 0x178   :  { %549 = vst.msk [vmem:[#allocation4 + $0x20] sm:$0xff] %vm546_vm8, %v503_v19  ;;  %v1112_v58 = vmul.f32 %v1080_v55, %v270_v50  ;;  %811 = vrot.lane.b32.xlu1 %v4404_v2, %s4129_s13  ;;  %615 = vrot.lane.b32.xlu0 %v4392_v56, %s4128_s27  ;;  %v1114_v62 = vmul.f32 %v1082_v57, %v272_v51  ;;  %v1095_v19 = vld [vmem:[#allocation4 + $0x78] sm:$0xff]  ;;  %v966_v55 = vld [vmem:[#allocation2 + $0x90] sm:$0xff] }
 0x179   :  { %v280_v57 = vld [vmem:[%s5658_s5 + $0x50] sm:$0xff] }
 0x17a   :  { %v796_v5 = vpop.permute.xlu1 %795  ;;  %v600_v7 = vpop.permute.xlu0 %599  ;;  %v1144_v17 = vpack.c.bf16 %v1114_v62, %v1112_v58 }
 0x17b   :  { %841 = vst.msk [vmem:[#allocation4 + $0x30] sm:$0xff] %vm837_vm11, %v796_v5 }
 0x17c   :  { %646 = vst.msk [vmem:[#allocation4 + $0x20] sm:$0xff] %vm643_vm9, %v600_v7  ;;  %908 = vrot.lane.b32.xlu1 %v4406_v4, %s4130_s16  ;;  %720 = vrot.lane.b32.xlu0 %v964_v47, %s4125_s23 }
 0x17d   :  { %743 = vst.msk [vmem:[#allocation4 + $0x20] sm:$0xff] %vm740_vm10, %v4522_v21  ;;  %1276 = vmatmul.mubr.bf16.vlgmr.msra.gmra.mxu1 %v1144_v17  ;;  %v279_v21 = vld [vmem:[%s5658_s5 + $0x48] sm:$0xff] }
 0x17e   :  { %840 = vst.msk [vmem:[#allocation4 + $0x20] sm:$0xff] %vm837_vm11, %v4543_v32  ;;  %3767 = vmatprep.mubr.msk.bf16.mxu1 %vm265_vm2, %v1147_v20  ;;  %v893_v56 = vpop.permute.xlu1 %892  ;;  %v4619_v23 = vpop.permute.xlu0 %704  ;;  %v1121_v34 = vmul.f32 %v1089_v24, %v279_v21  ;;  %v289_v24 = vld [vmem:[%s5658_s5 + $0x98] sm:$0xff] }
 0x17f   :  { %937 = vst.msk [vmem:[#allocation4 + $0x20] sm:$0xff] %vm934_vm12, %v4549_v35  ;;  %938 = vst.msk [vmem:[#allocation4 + $0x30] sm:$0xff] %vm934_vm12, %v893_v56 }
 0x180   :  { %1034 = vst.msk [vmem:[#allocation4 + $0x20] sm:$0xff] %vm1031_vm13, %v4555_v37  ;;  %1005 = vrot.lane.b32.xlu1 %v962_v0, %s4124_s22  ;;  %522 = vrot.lane.b32.xlu0 %v4404_v2, %s4127_s26  ;;  %v281_v2 = vld [vmem:[%s5658_s5 + $0x58] sm:$0xff] }
 0x181   :  { %v1123_v35 = vmul.f32 %v1091_v25, %v281_v2  ;;  %v287_v2 = vld [vmem:[%s5658_s5 + $0x88] sm:$0xff] }
 0x182   :  { %v990_v60 = vpop.permute.xlu1 %989  ;;  %v507_v3 = vpop.permute.xlu0 %506  ;;  %v1097_v25 = vld [vmem:[#allocation4 + $0x88] sm:$0xff] }
 0x183   :  { %1035 = vst.msk [vmem:[#allocation4 + $0x30] sm:$0xff] %vm1031_vm13, %v990_v60  ;;  %v1149_v40 = vpack.c.bf16 %v1123_v35, %v1121_v34 }
 0x184   :  { %551 = vst.msk [vmem:[#allocation4 + $0x40] sm:$0xff] %vm546_vm8, %v507_v3  ;;  %427 = vrot.lane.b32.xlu1 %v962_v0, %s4123_s19  ;;  %619 = vrot.lane.b32.xlu0 %v4406_v4, %s4128_s27  ;;  %v274_v4 = vld [vmem:[%s5658_s5 + $0x20] sm:$0xff] }
 0x186   :  { %v412_v11 = vpop.permute.xlu1 %411  ;;  %v604_v16 = vpop.permute.xlu0 %603 }
 0x187   :  { %455 = vst.msk [vmem:[#allocation4 + $0x50] sm:$0xff] %vm449_vm3, %v412_v11  ;;  %v1084_v27 = vld [vmem:[#allocation4 + $0x20] sm:$0xff] }
 0x188   :  { %648 = vst.msk [vmem:[#allocation4 + $0x40] sm:$0xff] %vm643_vm9, %v604_v16  ;;  %528 = vrot.lane.b32.xlu1 %v4412_v6, %s4127_s26  ;;  %716 = vrot.lane.b32.xlu0 %v962_v0, %s4125_s23  ;;  %v1116_v32 = vmul.f32 %v1084_v27, %v274_v4  ;;  %v1099_v4 = vld [vmem:[#allocation4 + $0x98] sm:$0xff]  ;;  %v284_v27 = vld [vmem:[%s5658_s5 + $0x70] sm:$0xff] }
 0x18a   :  { %v513_v28 = vpop.permute.xlu1 %512  ;;  %v701_v29 = vpop.permute.xlu0 %700  ;;  %v1086_v30 = vld [vmem:[#allocation4 + $0x30] sm:$0xff] }
 0x18b   :  { %554 = vst.msk [vmem:[#allocation4 + $0x70] sm:$0xff] %vm546_vm8, %v513_v28  ;;  %v1118_v33 = vmul.f32 %v1086_v30, %v276_v26  ;;  %v282_v26 = vld [vmem:[%s5658_s5 + $0x60] sm:$0xff] }
 0x18c   :  { %745 = vst.msk [vmem:[#allocation4 + $0x40] sm:$0xff] %vm740_vm10, %v701_v29  ;;  %625 = vrot.lane.b32.xlu1 %v578_v31, %s4128_s27  ;;  %817 = vrot.lane.b32.xlu0 %v4412_v6, %s4129_s13 }
 0x18d   :  { %v1146_v36 = vpack.c.bf16 %v1118_v33, %v1116_v32  ;;  %v1129_v32 = vmul.f32 %v1097_v25, %v287_v2  ;;  %v1131_v33 = vmul.f32 %v1099_v4, %v289_v24  ;;  %v1107_v2 = vld [vmem:[#allocation4 + $0xd8] sm:$0xff]  ;;  %v290_v24 = vld [vmem:[%s5658_s5 + $0xa0] sm:$0xff]  ;;  %v292_v25 = vld [vmem:[%s5658_s5 + $0xb0] sm:$0xff] }
 0x18e   :  { %v610_v37 = vpop.permute.xlu1 %609  ;;  %v4654_v38 = vpop.permute.xlu0 %801 }
 0x18f   :  { %651 = vst.msk [vmem:[#allocation4 + $0x70] sm:$0xff] %vm643_vm9, %v610_v37  ;;  %1284 = vmatmul.mubr.bf16.gmra.mxu1 %v1146_v36 }
 0x190   :  { %722 = vrot.lane.b32.xlu1 %v675_v39, %s4125_s23  ;;  %813 = vrot.lane.b32.xlu0 %v4426_v9, %s4129_s13 }
 0x191   :  { %3768 = vmatprep.mubr.msk.bf16.mxu1 %vm265_vm2, %v1149_v40  ;;  %v1455_v40 = vld [vmem:[#allocation2 + $0x8] sm:$0xff] }
 0x192   :  { %v707_v41 = vpop.permute.xlu1 %706  ;;  %v4661_v42 = vpop.permute.xlu0 %898 }
 0x193   :  { %748 = vst.msk [vmem:[#allocation4 + $0x70] sm:$0xff] %vm740_vm10, %v707_v41 }
 0x194   :  { %524 = vrot.lane.b32.xlu1 %v4426_v9, %s4127_s26  ;;  %910 = vrot.lane.b32.xlu0 %v4430_v14, %s4130_s16  ;;  %v673_v9 = vld [vmem:[#allocation2 + $0x78] sm:$0xff] }
 0x196   :  { %v509_v6 = vpop.permute.xlu1 %508  ;;  %v4668_v43 = vpop.permute.xlu0 %995 }
 0x197   :  { %552 = vst.msk [vmem:[#allocation4 + $0x50] sm:$0xff] %vm546_vm8, %v509_v6 }
 0x198   :  { %621 = vrot.lane.b32.xlu1 %v4430_v14, %s4128_s27  ;;  %914 = vrot.lane.b32.xlu0 %v578_v31, %s4130_s16 }
 0x19a   :  { %v606_v44 = vpop.permute.xlu1 %605  ;;  %v418_v45 = vpop.permute.xlu0 %417 }
 0x19b   :  { %649 = vst.msk [vmem:[#allocation4 + $0x50] sm:$0xff] %vm643_vm9, %v606_v44 }
 0x19c   :  { %458 = vst.msk [vmem:[#allocation4 + $0x80] sm:$0xff] %vm449_vm3, %v418_v45  ;;  %718 = vrot.lane.b32.xlu1 %v673_v9, %s4125_s23  ;;  %1007 = vrot.lane.b32.xlu0 %v673_v9, %s4124_s22 }
 0x19e   :  { %v703_v46 = vpop.permute.xlu1 %702  ;;  %v798_v47 = vpop.permute.xlu0 %797 }
 0x19f   :  { %746 = vst.msk [vmem:[#allocation4 + $0x50] sm:$0xff] %vm740_vm10, %v703_v46 }
 0x1a0   :  { %842 = vst.msk [vmem:[#allocation4 + $0x40] sm:$0xff] %vm837_vm11, %v798_v47  ;;  %815 = vrot.lane.b32.xlu1 %v4428_v12, %s4129_s13  ;;  %429 = vrot.lane.b32.xlu0 %v673_v9, %s4123_s19 }
 0x1a2   :  { %v800_v14 = vpop.permute.xlu1 %799  ;;  %v895_v49 = vpop.permute.xlu0 %894 }
 0x1a3   :  { %843 = vst.msk [vmem:[#allocation4 + $0x50] sm:$0xff] %vm837_vm11, %v800_v14 }
 0x1a4   :  { %939 = vst.msk [vmem:[#allocation4 + $0x40] sm:$0xff] %vm934_vm12, %v895_v49  ;;  %912 = vrot.lane.b32.xlu1 %v4438_v15, %s4130_s16  ;;  %526 = vrot.lane.b32.xlu0 %v4428_v12, %s4127_s26  ;;  %v869_v12 = vld [vmem:[#allocation2 + $0x8f] sm:$0xff] }
 0x1a6   :  { %v897_v50 = vpop.permute.xlu1 %896  ;;  %v992_v51 = vpop.permute.xlu0 %991 }
 0x1a7   :  { %940 = vst.msk [vmem:[#allocation4 + $0x50] sm:$0xff] %vm934_vm12, %v897_v50 }
 0x1a8   :  { %1036 = vst.msk [vmem:[#allocation4 + $0x40] sm:$0xff] %vm1031_vm13, %v992_v51  ;;  %1037 = vst.msk [vmem:[#allocation4 + $0x50] sm:$0xff] %vm1031_vm13, %v4583_v48  ;;  %819 = vrot.lane.b32.xlu1 %v4424_v8, %s4129_s13  ;;  %623 = vrot.lane.b32.xlu0 %v4438_v15, %s4128_s27  ;;  %v285_v48 = vld [vmem:[%s5658_s5 + $0x78] sm:$0xff]  ;;  %v278_v8 = vld [vmem:[%s5658_s5 + $0x40] sm:$0xff] }
 0x1a9   :  { %v1093_v15 = vld [vmem:[#allocation4 + $0x68] sm:$0xff]  ;;  %v1127_v7 = vmul.f32 %v1095_v19, %v285_v48  ;;  %v286_v48 = vld [vmem:[%s5658_s5 + $0x80] sm:$0xff] }
 0x1aa   :  { %v4697_v52 = vpop.permute.xlu1 %1001  ;;  %v414_v53 = vpop.permute.xlu0 %413  ;;  %v1125_v5 = vmul.f32 %v1093_v15, %v283_v54  ;;  %v293_v54 = vld [vmem:[%s5658_s5 + $0xb8] sm:$0xff] }
 0x1ab   :  { %456 = vst.msk [vmem:[#allocation4 + $0x60] sm:$0xff] %vm449_vm3, %v414_v53  ;;  %v1103_v15 = vld [vmem:[#allocation4 + $0xb8] sm:$0xff] }
 0x1ac   :  { %916 = vrot.lane.b32.xlu1 %v869_v12, %s4130_s16  ;;  %1011 = vrot.lane.b32.xlu0 %v675_v39, %s4124_s22  ;;  %v1151_v0 = vpack.c.bf16 %v1127_v7, %v1125_v5  ;;  %v1153_v39 = vpack.c.bf16 %v1131_v33, %v1129_v32  ;;  %v291_v12 = vld [vmem:[%s5658_s5 + $0xa8] sm:$0xff] }
 0x1ae   :  { %v424_v58 = vpop.permute.xlu1 %423  ;;  %v511_v59 = vpop.permute.xlu0 %510 }
 0x1af   :  { %v1088_v61 = vld [vmem:[#allocation4 + $0x40] sm:$0xff]  ;;  %461 = vst.msk [vmem:[#allocation4 + $0xb0] sm:$0xff] %vm449_vm3, %v424_v58  ;;  %v1090_v62 = vld [vmem:[#allocation4 + $0x50] sm:$0xff] }
 0x1b0   :  { %553 = vst.msk [vmem:[#allocation4 + $0x60] sm:$0xff] %vm546_vm8, %v511_v59  ;;  %v1120_v63 = vmul.f32 %v1088_v61, %v278_v8  ;;  %1013 = vrot.lane.b32.xlu1 %v966_v55, %s4124_s22  ;;  %v1122_v17 = vmul.f32 %v1090_v62, %v280_v57  ;;  %1487 = vrot.lane.b32.xlu0 %v1455_v40, %s4123_s19  ;;  %v1101_v8 = vld [vmem:[#allocation4 + $0xa8] sm:$0xff] }
 0x1b1   :  { %v1133_v61 = vmul.f32 %v1101_v8, %v291_v12  ;;  %v1135_v62 = vmul.f32 %v1103_v15, %v293_v54  ;;  %v296_v12 = vld [vmem:[%s5658_s5 + $0xd0] sm:$0xff] }
 0x1b2   :  { %v804_v18 = vpop.permute.xlu1 %803  ;;  %v608_v20 = vpop.permute.xlu0 %607  ;;  %v1148_v56 = vpack.c.bf16 %v1122_v17, %v1120_v63 }
 0x1b3   :  { %845 = vst.msk [vmem:[#allocation4 + $0x70] sm:$0xff] %vm837_vm11, %v804_v18  ;;  %v1155_v18 = vpack.c.bf16 %v1135_v62, %v1133_v61  ;;  %v298_v62 = vld [vmem:[%s5658_s5 + $0xe0] sm:$0xff] }
 0x1b4   :  { %650 = vst.msk [vmem:[#allocation4 + $0x60] sm:$0xff] %vm643_vm9, %v608_v20  ;;  %1292 = vmatmul.mubr.bf16.gmra.mxu1 %v1148_v56 }
 0x1b5   :  { %747 = vst.msk [vmem:[#allocation4 + $0x60] sm:$0xff] %vm740_vm10, %v4619_v23  ;;  %3769 = vmatprep.mubr.msk.bf16.mxu1 %vm265_vm2, %v1151_v0 }
 0x1b6   :  { %844 = vst.msk [vmem:[#allocation4 + $0x60] sm:$0xff] %vm837_vm11, %v4654_v38  ;;  %v901_v60 = vpop.permute.xlu1 %900  ;;  %v4726_v3 = vpop.permute.xlu0 %712 }
 0x1b7   :  { %941 = vst.msk [vmem:[#allocation4 + $0x60] sm:$0xff] %vm934_vm12, %v4661_v42  ;;  %942 = vst.msk [vmem:[#allocation4 + $0x70] sm:$0xff] %vm934_vm12, %v901_v60 }
 0x1b8   :  { %1038 = vst.msk [vmem:[#allocation4 + $0x60] sm:$0xff] %vm1031_vm13, %v4668_v43 }
 0x1ba   :  { %v998_v11 = vpop.permute.xlu1 %997  ;;  %v515_v16 = vpop.permute.xlu0 %514 }
 0x1bb   :  { %1039 = vst.msk [vmem:[#allocation4 + $0x70] sm:$0xff] %vm1031_vm13, %v998_v11 }
 0x1bc   :  { %555 = vst.msk [vmem:[#allocation4 + $0x80] sm:$0xff] %vm546_vm8, %v515_v16  ;;  %v295_v16 = vld [vmem:[%s5658_s5 + $0xc8] sm:$0xff] }
 0x1be   :  { %v420_v23 = vpop.permute.xlu1 %419  ;;  %v612_v21 = vpop.permute.xlu0 %611 }
 0x1bf   :  { %459 = vst.msk [vmem:[#allocation4 + $0x90] sm:$0xff] %vm449_vm3, %v420_v23  ;;  %v1092_v28 = vld [vmem:[#allocation4 + $0x60] sm:$0xff]  ;;  %v297_v23 = vld [vmem:[%s5658_s5 + $0xd8] sm:$0xff] }
 0x1c0   :  { %652 = vst.msk [vmem:[#allocation4 + $0x80] sm:$0xff] %vm643_vm9, %v612_v21  ;;  %v1124_v34 = vmul.f32 %v1092_v28, %v282_v26  ;;  %v1105_v21 = vld [vmem:[#allocation4 + $0xc8] sm:$0xff] }
 0x1c2   :  { %v521_v29 = vpop.permute.xlu1 %520  ;;  %v709_v30 = vpop.permute.xlu0 %708  ;;  %v1094_v31 = vld [vmem:[#allocation4 + $0x70] sm:$0xff] }
 0x1c3   :  { %558 = vst.msk [vmem:[#allocation4 + $0xb0] sm:$0xff] %vm546_vm8, %v521_v29  ;;  %v1126_v35 = vmul.f32 %v1094_v31, %v284_v27  ;;  %v1137_v29 = vmul.f32 %v1105_v21, %v295_v16 }
 0x1c4   :  { %749 = vst.msk [vmem:[#allocation4 + $0x80] sm:$0xff] %vm740_vm10, %v709_v30  ;;  %v1139_v30 = vmul.f32 %v1107_v2, %v297_v23 }
 0x1c5   :  { %v1150_v36 = vpack.c.bf16 %v1126_v35, %v1124_v34 }
 0x1c6   :  { %v618_v37 = vpop.permute.xlu1 %617  ;;  %v810_v38 = vpop.permute.xlu0 %809 }
 0x1c7   :  { %655 = vst.msk [vmem:[#allocation4 + $0xb0] sm:$0xff] %vm643_vm9, %v618_v37  ;;  %1300 = vmatmul.mubr.bf16.gmra.mxu1 %v1150_v36  ;;  %v1157_v36 = vpack.c.bf16 %v1139_v30, %v1137_v29  ;;  %v4035_v29 = vld [vmem:[%s5656_s2 + $0x80] sm:$0xff]  }
 0x1c8   :  { %3770 = vmatprep.mubr.msk.bf16.mxu1 %vm265_vm2, %v1153_v39 }
 0x1ca   :  { %v715_v41 = vpop.permute.xlu1 %714  ;;  %v907_v42 = vpop.permute.xlu0 %906 }
 0x1cb   :  { %752 = vst.msk [vmem:[#allocation4 + $0xb0] sm:$0xff] %vm740_vm10, %v715_v41 }
 0x1ce   :  { %v517_v6 = vpop.permute.xlu1 %516  ;;  %v1004_v43 = vpop.permute.xlu0 %1003 }
 0x1cf   :  { %556 = vst.msk [vmem:[#allocation4 + $0x90] sm:$0xff] %vm546_vm8, %v517_v6 }
 0x1d2   :  { %v614_v44 = vpop.permute.xlu1 %613  ;;  %v426_v45 = vpop.permute.xlu0 %425 }
 0x1d3   :  { %653 = vst.msk [vmem:[#allocation4 + $0x90] sm:$0xff] %vm643_vm9, %v614_v44 }
 0x1d4   :  { %462 = vst.msk [vmem:[#allocation4 + $0xc0] sm:$0xff] %vm449_vm3, %v426_v45 }
 0x1d6   :  { %v711_v9 = vpop.permute.xlu1 %710  ;;  %v806_v46 = vpop.permute.xlu0 %805 }
 0x1d7   :  { %750 = vst.msk [vmem:[#allocation4 + $0x90] sm:$0xff] %vm740_vm10, %v711_v9 }
 0x1d8   :  { %846 = vst.msk [vmem:[#allocation4 + $0x80] sm:$0xff] %vm837_vm11, %v806_v46 }
 0x1da   :  { %v808_v47 = vpop.permute.xlu1 %807  ;;  %v903_v14 = vpop.permute.xlu0 %902 }
 0x1db   :  { %847 = vst.msk [vmem:[#allocation4 + $0x90] sm:$0xff] %vm837_vm11, %v808_v47 }
 0x1dc   :  { %943 = vst.msk [vmem:[#allocation4 + $0x80] sm:$0xff] %vm934_vm12, %v903_v14 }
 0x1de   :  { %v905_v49 = vpop.permute.xlu1 %904  ;;  %v1000_v50 = vpop.permute.xlu0 %999 }
 0x1df   :  { %944 = vst.msk [vmem:[#allocation4 + $0x90] sm:$0xff] %vm934_vm12, %v905_v49  ;;  %v299_v49 = vld [vmem:[%s5658_s5 + $0xe8] sm:$0xff] }
 0x1e0   :  { %1040 = vst.msk [vmem:[#allocation4 + $0x80] sm:$0xff] %vm1031_vm13, %v1000_v50  ;;  %1041 = vst.msk [vmem:[#allocation4 + $0x90] sm:$0xff] %vm1031_vm13, %v4697_v52  ;;  %v288_v52 = vld [vmem:[%s5658_s5 + $0x90] sm:$0xff]  ;;  %v301_v50 = vld [vmem:[%s5658_s5 + $0xf8] sm:$0xff] }
 0x1e2   :  { %v4764_v51 = vpop.permute.xlu1 %1009  ;;  %v422_v53 = vpop.permute.xlu0 %421 }
 0x1e3   :  { %460 = vst.msk [vmem:[#allocation4 + $0xa0] sm:$0xff] %vm449_vm3, %v422_v53  ;;  %v1109_v53 = vld [vmem:[#allocation4 + $0xe8] sm:$0xff] }
 0x1e6   :  { %v432_v19 = vpop.permute.xlu1 %431  ;;  %v519_v55 = vpop.permute.xlu0 %518 }
 0x1e7   :  { %v1096_v57 = vld [vmem:[#allocation4 + $0x80] sm:$0xff]  ;;  %465 = vst.msk [vmem:[#allocation4 + $0xf0] sm:$0xff] %vm449_vm3, %v432_v19  ;;  %v1098_v58 = vld [vmem:[#allocation4 + $0x90] sm:$0xff]  ;;  %v1143_v19 = vmul.f32 %v4458_v22, %v301_v50 }
 0x1e8   :  { %557 = vst.msk [vmem:[#allocation4 + $0xa0] sm:$0xff] %vm546_vm8, %v519_v55  ;;  %v1128_v59 = vmul.f32 %v1096_v57, %v286_v48  ;;  %v1130_v63 = vmul.f32 %v1098_v58, %v288_v52  ;;  %v1141_v52 = vmul.f32 %v1109_v53, %v299_v49  ;;  %v4040_v49 = vld [vmem:[%s5656_s2 + $0x58] sm:$0xff]  }
 0x1ea   :  { %v812_v5 = vpop.permute.xlu1 %811  ;;  %v616_v7 = vpop.permute.xlu0 %615  ;;  %v1152_v17 = vpack.c.bf16 %v1130_v63, %v1128_v59  ;;  %v1159_v61 = vpack.c.bf16 %v1143_v19, %v1141_v52  ;;  %v300_v63 = vld [vmem:[%s5658_s5 + $0xf0] sm:$0xff] }
 0x1eb   :  { %849 = vst.msk [vmem:[#allocation4 + $0xb0] sm:$0xff] %vm837_vm11, %v812_v5 }
 0x1ec   :  { %654 = vst.msk [vmem:[#allocation4 + $0xa0] sm:$0xff] %vm643_vm9, %v616_v7  ;;  %1308 = vmatmul.mubr.bf16.gmra.mxu1 %v1152_v17 }
 0x1ed   :  { %751 = vst.msk [vmem:[#allocation4 + $0xa0] sm:$0xff] %vm740_vm10, %v4726_v3  ;;  %3771 = vmatprep.mubr.msk.bf16.mxu1 %vm265_vm2, %v1155_v18 }
 0x1ee   :  { %848 = vst.msk [vmem:[#allocation4 + $0xa0] sm:$0xff] %vm837_vm11, %v810_v38  ;;  %v909_v20 = vpop.permute.xlu1 %908  ;;  %v721_v56 = vpop.permute.xlu0 %720 }
 0x1ef   :  { %945 = vst.msk [vmem:[#allocation4 + $0xa0] sm:$0xff] %vm934_vm12, %v907_v42  ;;  %946 = vst.msk [vmem:[#allocation4 + $0xb0] sm:$0xff] %vm934_vm12, %v909_v20  ;;  %v336_v20 = vld [vmem:[%s5656_s2 + $0x170] sm:$0x2] }
 0x1f0   :  { %1042 = vst.msk [vmem:[#allocation4 + $0xa0] sm:$0xff] %vm1031_vm13, %v1004_v43 }
 0x1f2   :  { %v1006_v0 = vpop.permute.xlu1 %1005  ;;  %v523_v60 = vpop.permute.xlu0 %522 }
 0x1f3   :  { %1043 = vst.msk [vmem:[#allocation4 + $0xb0] sm:$0xff] %vm1031_vm13, %v1006_v0  ;;  %v1163_v0 = vsub.s32 2, %v4227_v13 }
 0x1f4   :  { %559 = vst.msk [vmem:[#allocation4 + $0xc0] sm:$0xff] %vm546_vm8, %v523_v60  ;;  %v1423_v60 = vld [vmem:[#allocation2 + $0x7] sm:$0xff] }
 0x1f5   :  { %1439 = vst.msk [vmem:[#allocation4] sm:$0xff] %vm265_vm2, %v1423_v60 }
 0x1f6   :  { %v428_v3 = vpop.permute.xlu1 %427  ;;  %v620_v11 = vpop.permute.xlu0 %619 }
 0x1f7   :  { %463 = vst.msk [vmem:[#allocation4 + $0xd0] sm:$0xff] %vm449_vm3, %v428_v3  ;;  %v1100_v4 = vld [vmem:[#allocation4 + $0xa0] sm:$0xff] }
 0x1f8   :  { %656 = vst.msk [vmem:[#allocation4 + $0xc0] sm:$0xff] %vm643_vm9, %v620_v11  ;;  %v1132_v31 = vmul.f32 %v1100_v4, %v290_v24  ;;  %v4034_v24 = vld [vmem:[%s5656_s2 + $0x88] sm:$0xff]  }
 0x1f9   :  { %2323 = vmatpush1.bf16.msra.mxu0 %v4034_v24 }
 0x1fa   :  { %v529_v26 = vpop.permute.xlu1 %528  ;;  %v717_v27 = vpop.permute.xlu0 %716  ;;  %v1102_v28 = vld [vmem:[#allocation4 + $0xb0] sm:$0xff]  ;;  %2324 = vmatprep.subr.bf16.mxu0 %v4126_v1 }
 0x1fb   :  { %562 = vst.msk [vmem:[#allocation4 + $0xf0] sm:$0xff] %vm546_vm8, %v529_v26  ;;  %v1134_v32 = vmul.f32 %v1102_v28, %v292_v25 }
 0x1fc   :  { %753 = vst.msk [vmem:[#allocation4 + $0xc0] sm:$0xff] %vm740_vm10, %v717_v27 }
 0x1fd   :  { %v1154_v33 = vpack.c.bf16 %v1134_v32, %v1132_v31  ;;  %2325 = vmatpush1.bf16.msra.mxu0 %v4035_v29  ;;  %v4036_v31 = vld [vmem:[%s5656_s2 + $0x78] sm:$0xff]  }
 0x1fe   :  { %v626_v34 = vpop.permute.xlu1 %625  ;;  %v818_v35 = vpop.permute.xlu0 %817  ;;  %2326 = vmatprep.subr.bf16.mxu0 %v4126_v1 }
 0x1ff   :  { %659 = vst.msk [vmem:[#allocation4 + $0xf0] sm:$0xff] %vm643_vm9, %v626_v34  ;;  %1316 = vmatmul.mubr.bf16.gmra.mxu1 %v1154_v33 }
 0x200   :  { %3772 = vmatprep.mubr.msk.bf16.mxu1 %vm265_vm2, %v1157_v36 }
 0x201   :  { %2327 = vmatpush1.bf16.msra.mxu0 %v4036_v31 }
 0x202   :  { %v723_v37 = vpop.permute.xlu1 %722  ;;  %v814_v38 = vpop.permute.xlu0 %813  ;;  %2328 = vmatprep.subr.bf16.mxu0 %v4126_v1 }
 0x203   :  { %756 = vst.msk [vmem:[#allocation4 + $0xf0] sm:$0xff] %vm740_vm10, %v723_v37 }
 0x204   :  { %850 = vst.msk [vmem:[#allocation4 + $0xc0] sm:$0xff] %vm837_vm11, %v814_v38 }
 0x206   :  { %v525_v39 = vpop.permute.xlu1 %524  ;;  %v911_v40 = vpop.permute.xlu0 %910 }
 0x207   :  { %560 = vst.msk [vmem:[#allocation4 + $0xd0] sm:$0xff] %vm546_vm8, %v525_v39 }
 0x208   :  { %947 = vst.msk [vmem:[#allocation4 + $0xc0] sm:$0xff] %vm934_vm12, %v911_v40  ;;  %v4038_v40 = vld [vmem:[%s5656_s2 + $0x68] sm:$0xff]  }
 0x20a   :  { %v622_v41 = vpop.permute.xlu1 %621  ;;  %v915_v42 = vpop.permute.xlu0 %914 }
 0x20b   :  { %657 = vst.msk [vmem:[#allocation4 + $0xd0] sm:$0xff] %vm643_vm9, %v622_v41 }
 0x20e   :  { %v719_v6 = vpop.permute.xlu1 %718  ;;  %v1008_v43 = vpop.permute.xlu0 %1007 }
 0x20f   :  { %754 = vst.msk [vmem:[#allocation4 + $0xd0] sm:$0xff] %vm740_vm10, %v719_v6 }
 0x210   :  { %1044 = vst.msk [vmem:[#allocation4 + $0xc0] sm:$0xff] %vm1031_vm13, %v1008_v43 }
 0x212   :  { %v816_v44 = vpop.permute.xlu1 %815  ;;  %v430_v45 = vpop.permute.xlu0 %429 }
 0x213   :  { %851 = vst.msk [vmem:[#allocation4 + $0xd0] sm:$0xff] %vm837_vm11, %v816_v44 }
 0x214   :  { %464 = vst.msk [vmem:[#allocation4 + $0xe0] sm:$0xff] %vm449_vm3, %v430_v45  ;;  %v4039_v45 = vld [vmem:[%s5656_s2 + $0x60] sm:$0xff]  }
 0x216   :  { %v913_v9 = vpop.permute.xlu1 %912  ;;  %v527_v46 = vpop.permute.xlu0 %526 }
 0x217   :  { %948 = vst.msk [vmem:[#allocation4 + $0xd0] sm:$0xff] %vm934_vm12, %v913_v9  ;;  %v1104_v54 = vld [vmem:[#allocation4 + $0xc0] sm:$0xff] }
 0x218   :  { %561 = vst.msk [vmem:[#allocation4 + $0xe0] sm:$0xff] %vm546_vm8, %v527_v46 }
 0x219   :  { %1045 = vst.msk [vmem:[#allocation4 + $0xd0] sm:$0xff] %vm1031_vm13, %v4764_v51  ;;  %v294_v51 = vld [vmem:[%s5658_s5 + $0xc0] sm:$0xff] }
 0x21a   :  { %v820_v47 = vpop.permute.xlu1 %819  ;;  %v624_v14 = vpop.permute.xlu0 %623  ;;  %v1136_v55 = vmul.f32 %v1104_v54, %v294_v51  ;;  %v4041_v51 = vld [vmem:[%s5656_s2 + $0x50] sm:$0xff]  }
 0x21b   :  { %853 = vst.msk [vmem:[#allocation4 + $0xf0] sm:$0xff] %vm837_vm11, %v820_v47 }
 0x21c   :  { %658 = vst.msk [vmem:[#allocation4 + $0xe0] sm:$0xff] %vm643_vm9, %v624_v14 }
 0x21d   :  { %755 = vst.msk [vmem:[#allocation4 + $0xe0] sm:$0xff] %vm740_vm10, %v721_v56  ;;  %v1160_v56 = vunpack.c.l.bf16 %v336_v20 }
 0x21e   :  { %852 = vst.msk [vmem:[#allocation4 + $0xe0] sm:$0xff] %vm837_vm11, %v818_v35  ;;  %v917_v48 = vpop.permute.xlu1 %916  ;;  %v1012_v8 = vpop.permute.xlu0 %1011  ;;  %v4037_v35 = vld [vmem:[%s5656_s2 + $0x70] sm:$0xff]  }
 0x21f   :  { %949 = vst.msk [vmem:[#allocation4 + $0xe0] sm:$0xff] %vm934_vm12, %v915_v42  ;;  %950 = vst.msk [vmem:[#allocation4 + $0xf0] sm:$0xff] %vm934_vm12, %v917_v48  ;;  %v4856_v11 = vrot.slane %v1160_v56, %v1163_v0  ;;  %2329 = vmatpush1.bf16.msra.mxu0 %v4037_v35  ;;  %v4042_v48 = vld [vmem:[%s5656_s2 + $0x90] sm:$0xff]  }
 0x220   :  { %1046 = vst.msk [vmem:[#allocation4 + $0xe0] sm:$0xff] %vm1031_vm13, %v1012_v8  ;;  %v1106_v15 = vld [vmem:[#allocation4 + $0xd0] sm:$0xff]  ;;  %2330 = vmatprep.subr.bf16.mxu0 %v4126_v1 }
 0x221   :  { %v1138_v57 = vmul.f32 %v1106_v15, %v296_v12  ;;  %v4924_v15 = vld [vmem:[%s5657_s1 + $0x38] sm:$0xff]  }
 0x222   :  { %v1014_v58 = vpop.permute.xlu1 %1013  ;;  %v1488_v3 = vpop.permute.xlu0 %1487 }
 0x223   :  { %v1156_v59 = vpack.c.bf16 %v1138_v57, %v1136_v55  ;;  %1047 = vst.msk [vmem:[#allocation4 + $0xf0] sm:$0xff] %vm1031_vm13, %v1014_v58  ;;  %2331 = vmatpush1.bf16.msra.mxu0 %v4038_v40  ;;  %v4083_v55 = vld [vmem:[%s5658_s5 + $0x8] sm:$0xff]  ;;  %v4084_v58 = vld [vmem:[%s5658_s5 + $0x18] sm:$0xff] }
 0x224   :  { %1535 = vst.msk [vmem:[#allocation4] sm:$0xff] %vm449_vm3, %v1488_v3  ;;  %2332 = vmatprep.subr.bf16.mxu0 %v4126_v1 }
 0x225   :  { %1324 = vmatmul.mubr.bf16.gmra.mxu1 %v1156_v59 }
 0x226   :  { %3773 = vmatprep.mubr.msk.bf16.mxu1 %vm265_vm2, %v1159_v61 }
 0x227   :  { %v1108_v5 = vld [vmem:[#allocation4 + $0xe0] sm:$0xff]  ;;  %2333 = vmatpush1.bf16.msra.mxu0 %v4039_v45 }
 0x228   :  { %v1140_v7 = vmul.f32 %v1108_v5, %v298_v62  ;;  %2334 = vmatprep.subr.bf16.mxu0 %v4126_v1 }
 0x22a   :  { %v1110_v22 = vld [vmem:[#allocation4 + $0xf0] sm:$0xff] }
 0x22b   :  { %v1142_v17 = vmul.f32 %v1110_v22, %v300_v63  ;;  %2335 = vmatpush1.bf16.msra.mxu0 %v4040_v49 }
 0x22c   :  { %2336 = vmatprep.subr.bf16.mxu0 %v4126_v1 }
 0x22d   :  { %v1158_v18 = vpack.c.bf16 %v1142_v17, %v1140_v7 }
 0x22f   :  { %1332 = vmatmul.mubr.bf16.gmra.mxu1 %v1158_v18  ;;  %2337 = vmatpush1.bf16.msra.mxu0 %v4041_v51 }
 0x230   :  { %2352 = vmatprep.subr.bf16.mxu0 %v4126_v1 }
 0x233   :  { %2353 = vmatpush2.bf16.msra.mxu0 %v4042_v48 }
 0x234   :  { %3948 = vmatprep.subr.bf16.mxu0 %v4924_v15 }
 0x23d   :  { %v1277_v16 = vpop.f32.mrf.mxu1 }
 0x23e   :  { %v1278_v23 = vadd.f32 %v1277_v16, %v4856_v11 }
 0x23f   :  { %v1279_v21 = vpop.f32.mrf.mxu1 }
 0x240   :  { %vm1340_vm14 = vcmp.ge.f32.partialorder %v1278_v23, 0.0  ;;  %v1356_v2 = vmul.f32 0.2, %v1278_v23 }
 0x241   :  { %v1280_v25 = vpop.f32.mrf.mxu1 }
 0x242   :  { %v1372_v4 = vsel %vm1340_vm14, %v1278_v23, %v1356_v2  ;;  %v1281_v26 = vadd.f32 %v1280_v25, %v4856_v11 }
 0x243   :  { %1388 = vst.msk [vmem:[#allocation2 + $0x10] sm:$0xff] %vm265_vm2, %v1372_v4  ;;  %v1282_v27 = vpop.f32.mrf.mxu1 }
 0x244   :  { %vm1341_vm15 = vcmp.ge.f32.partialorder %v1281_v26, 0.0  ;;  %v1357_v28 = vmul.f32 0.2, %v1281_v26 }
 0x246   :  { %v1373_v30 = vsel %vm1341_vm15, %v1281_v26, %v1357_v28 }
 0x247   :  { %1389 = vst.msk [vmem:[#allocation2 + $0x18] sm:$0xff] %vm265_vm2, %v1373_v30 }
 0x24a   :  { %v1551_v32 = vld [vmem:[#allocation2 + $0x9] sm:$0xff] }
 0x24b   :  { %v1456_v33 = vld [vmem:[#allocation2 + $0x10] sm:$0xff]  ;;  %1583 = vrot.lane.b32.xlu0 %v1551_v32, %s4127_s26 }
 0x24c   :  { %v1647_v34 = vld [vmem:[#allocation2 + $0xf] sm:$0xff]  ;;  %1489 = vrot.lane.b32.xlu1 %v1456_v33, %s4123_s19 }
 0x24d   :  { %1440 = vst.msk [vmem:[#allocation4 + $0x10] sm:$0xff] %vm265_vm2, %v1647_v34 }
 0x24e   :  { %v1552_v36 = vld [vmem:[#allocation2 + $0x11] sm:$0xff] }
 0x24f   :  { %v1648_v37 = vld [vmem:[#allocation2 + $0x17] sm:$0xff]  ;;  %1679 = vrot.lane.b32.xlu0 %v1647_v34, %s4128_s27  ;;  %v1285_v38 = vpop.f32.mrf.mxu1 }
 0x250   :  { %1585 = vrot.lane.b32.xlu1 %v1552_v36, %s4127_s26  ;;  %1441 = vst.msk [vmem:[#allocation4 + $0x20] sm:$0xff] %vm265_vm2, %v1648_v37  ;;  %v1286_v39 = vadd.f32 %v1285_v38, %v4856_v11  ;;  %v1744_v47 = vld [vmem:[#allocation2 + $0x18] sm:$0xff] }
 0x251   :  { %v1287_v41 = vpop.f32.mrf.mxu1 }
 0x252   :  { %vm1342_vm4 = vcmp.ge.f32.partialorder %v1286_v39, 0.0  ;;  %v1358_v42 = vmul.f32 0.2, %v1286_v39 }
 0x253   :  { %1775 = vrot.lane.b32.xlu0 %v1456_v33, %s4125_s23  ;;  %v1288_v6 = vpop.f32.mrf.mxu1 }
 0x254   :  { %1681 = vrot.lane.b32.xlu1 %v1648_v37, %s4128_s27  ;;  %v1374_v43 = vsel %vm1342_vm4, %v1286_v39, %v1358_v42  ;;  %v1289_v44 = vadd.f32 %v1288_v6, %v4856_v11 }
 0x255   :  { %1390 = vst.msk [vmem:[#allocation2 + $0x20] sm:$0xff] %vm265_vm2, %v1374_v43  ;;  %v1290_v9 = vpop.f32.mrf.mxu1 }
 0x256   :  { %vm1343_vm5 = vcmp.ge.f32.partialorder %v1289_v44, 0.0  ;;  %v1359_v46 = vmul.f32 0.2, %v1289_v44 }
 0x257   :  { %1871 = vrot.lane.b32.xlu0 %v1552_v36, %s4129_s13 }
 0x258   :  { %1777 = vrot.lane.b32.xlu1 %v1744_v47, %s4125_s23  ;;  %v1375_v14 = vsel %vm1343_vm5, %v1289_v44, %v1359_v46 }
 0x259   :  { %1391 = vst.msk [vmem:[#allocation2 + $0x28] sm:$0xff] %vm265_vm2, %v1375_v14 }
 0x25b   :  { %1967 = vrot.lane.b32.xlu0 %v1648_v37, %s4130_s16 }
 0x25c   :  { %v1840_v50 = vld [vmem:[#allocation2 + $0x19] sm:$0xff] }
 0x25d   :  { %v1936_v53 = vld [vmem:[#allocation2 + $0x1f] sm:$0xff]  ;;  %1873 = vrot.lane.b32.xlu1 %v1840_v50, %s4129_s13  ;;  %2143 = vst.msk [vmem:[#allocation4 + $0x8] sm:$0xff] %vm265_vm2, %v1840_v50 }
 0x25e   :  { %1442 = vst.msk [vmem:[#allocation4 + $0x30] sm:$0xff] %vm265_vm2, %v1936_v53  ;;  %v2032_v8 = vld [vmem:[#allocation2 + $0x20] sm:$0xff] }
 0x25f   :  { %2063 = vrot.lane.b32.xlu0 %v1744_v47, %s4124_s22 }
 0x260   :  { %v2128_v12 = vld [vmem:[#allocation2 + $0x21] sm:$0xff] }
 0x261   :  { %v1650_v54 = vld [vmem:[#allocation2 + $0x27] sm:$0xff]  ;;  %1969 = vrot.lane.b32.xlu1 %v1936_v53, %s4130_s16  ;;  %2144 = vst.msk [vmem:[#allocation4 + $0x18] sm:$0xff] %vm265_vm2, %v2128_v12 }
 0x262   :  { %1443 = vst.msk [vmem:[#allocation4 + $0x40] sm:$0xff] %vm265_vm2, %v1650_v54  ;;  %v1746_v63 = vld [vmem:[#allocation2 + $0x28] sm:$0xff] }
 0x263   :  { %1491 = vrot.lane.b32.xlu0 %v1744_v47, %s4123_s19 }
 0x264   :  { %v2160_v52 = vld [vmem:[#allocation4 + $0x8] sm:$0xff] }
 0x265   :  { %2065 = vrot.lane.b32.xlu1 %v2032_v8, %s4124_s22  ;;  %v2192_v57 = vmul.f32 %v4083_v55, %v2160_v52 }
 0x267   :  { %1587 = vrot.lane.b32.xlu0 %v1840_v50, %s4127_s26 }
 0x268   :  { %v2162_v19 = vld [vmem:[#allocation4 + $0x18] sm:$0xff] }
 0x269   :  { %1493 = vrot.lane.b32.xlu1 %v2032_v8, %s4123_s19  ;;  %v2194_v59 = vmul.f32 %v4084_v58, %v2162_v19 }
 0x26b   :  { %1683 = vrot.lane.b32.xlu0 %v1936_v53, %s4128_s27  ;;  %v2224_v61 = vpack.c.bf16 %v2194_v59, %v2192_v57 }
 0x26d   :  { %3783 = vmatprep.mubr.msk.bf16.mxu0 %vm265_vm2, %v2224_v61  ;;  %1589 = vrot.lane.b32.xlu1 %v2128_v12, %s4127_s26 }
 0x26f   :  { %1779 = vrot.lane.b32.xlu0 %v2032_v8, %s4125_s23 }
 0x271   :  { %1685 = vrot.lane.b32.xlu1 %v1650_v54, %s4128_s27 }
 0x273   :  { %1875 = vrot.lane.b32.xlu0 %v2128_v12, %s4129_s13 }
 0x274   :  { %v1293_v62 = vpop.f32.mrf.mxu1 }
 0x275   :  { %v1294_v5 = vadd.f32 %v1293_v62, %v4856_v11  ;;  %1781 = vrot.lane.b32.xlu1 %v1746_v63, %s4125_s23 }
 0x276   :  { %v1295_v22 = vpop.f32.mrf.mxu1 }
 0x277   :  { %vm1344_vm6 = vcmp.ge.f32.partialorder %v1294_v5, 0.0  ;;  %v1360_v7 = vmul.f32 0.2, %v1294_v5  ;;  %1971 = vrot.lane.b32.xlu0 %v1650_v54, %s4130_s16 }
 0x278   :  { %v1296_v17 = vpop.f32.mrf.mxu1 }
 0x279   :  { %v1376_v18 = vsel %vm1344_vm6, %v1294_v5, %v1360_v7  ;;  %v1297_v20 = vadd.f32 %v1296_v17, %v4856_v11 }
 0x27a   :  { %1392 = vst.msk [vmem:[#allocation2 + $0x30] sm:$0xff] %vm265_vm2, %v1376_v18  ;;  %v1298_v56 = vpop.f32.mrf.mxu1 }
 0x27b   :  { %vm1345_vm7 = vcmp.ge.f32.partialorder %v1297_v20, 0.0  ;;  %v1361_v0 = vmul.f32 0.2, %v1297_v20  ;;  %2067 = vrot.lane.b32.xlu0 %v1746_v63, %s4124_s22 }
 0x27d   :  { %v1377_v60 = vsel %vm1345_vm7, %v1297_v20, %v1361_v0 }
 0x27e   :  { %1393 = vst.msk [vmem:[#allocation2 + $0x38] sm:$0xff] %vm265_vm2, %v1377_v60 }
 0x27f   :  { %1495 = vrot.lane.b32.xlu0 %v1746_v63, %s4123_s19 }
 0x281   :  { %v1555_v3 = vld [vmem:[#allocation2 + $0x29] sm:$0xff] }
 0x282   :  { %v1651_v16 = vld [vmem:[#allocation2 + $0x2f] sm:$0xff]  ;;  %1877 = vrot.lane.b32.xlu1 %v1555_v3, %s4129_s13  ;;  %2145 = vst.msk [vmem:[#allocation4 + $0x28] sm:$0xff] %vm265_vm2, %v1555_v3 }
 0x283   :  { %1444 = vst.msk [vmem:[#allocation4 + $0x50] sm:$0xff] %vm265_vm2, %v1651_v16  ;;  %1591 = vrot.lane.b32.xlu0 %v1555_v3, %s4127_s26  ;;  %v1747_v4 = vld [vmem:[#allocation2 + $0x30] sm:$0xff] }
 0x285   :  { %v1843_v23 = vld [vmem:[#allocation2 + $0x31] sm:$0xff] }
 0x286   :  { %v1939_v21 = vld [vmem:[#allocation2 + $0x37] sm:$0xff]  ;;  %1973 = vrot.lane.b32.xlu1 %v1651_v16, %s4130_s16  ;;  %2146 = vst.msk [vmem:[#allocation4 + $0x38] sm:$0xff] %vm265_vm2, %v1843_v23 }
 0x287   :  { %1445 = vst.msk [vmem:[#allocation4 + $0x60] sm:$0xff] %vm265_vm2, %v1939_v21  ;;  %1687 = vrot.lane.b32.xlu0 %v1651_v16, %s4128_s27  ;;  %v1301_v2 = vpop.f32.mrf.mxu1  ;;  %v2035_v35 = vld [vmem:[#allocation2 + $0x38] sm:$0xff] }
 0x288   :  { %v1302_v24 = vadd.f32 %v1301_v2, %v4856_v11 }
 0x289   :  { %v1303_v25 = vpop.f32.mrf.mxu1 }
 0x28a   :  { %vm1346_vm14 = vcmp.ge.f32.partialorder %v1302_v24, 0.0  ;;  %v1362_v26 = vmul.f32 0.2, %v1302_v24  ;;  %2069 = vrot.lane.b32.xlu1 %v1747_v4, %s4124_s22 }
 0x28b   :  { %1783 = vrot.lane.b32.xlu0 %v1747_v4, %s4125_s23  ;;  %v1304_v27 = vpop.f32.mrf.mxu1 }
 0x28c   :  { %v1378_v28 = vsel %vm1346_vm14, %v1302_v24, %v1362_v26  ;;  %v1305_v29 = vadd.f32 %v1304_v27, %v4856_v11 }
 0x28d   :  { %1394 = vst.msk [vmem:[#allocation2 + $0x40] sm:$0xff] %vm265_vm2, %v1378_v28  ;;  %v1306_v30 = vpop.f32.mrf.mxu1  ;;  %v2166_v27 = vld [vmem:[#allocation4 + $0x38] sm:$0xff] }
 0x28e   :  { %vm1347_vm15 = vcmp.ge.f32.partialorder %v1305_v29, 0.0  ;;  %v1363_v31 = vmul.f32 0.2, %v1305_v29  ;;  %1497 = vrot.lane.b32.xlu1 %v1747_v4, %s4123_s19 }
 0x28f   :  { %1879 = vrot.lane.b32.xlu0 %v1843_v23, %s4129_s13 }
 0x290   :  { %v1379_v32 = vsel %vm1347_vm15, %v1305_v29, %v1363_v31  ;;  %v2164_v31 = vld [vmem:[#allocation4 + $0x28] sm:$0xff] }
 0x291   :  { %1395 = vst.msk [vmem:[#allocation2 + $0x48] sm:$0xff] %vm265_vm2, %v1379_v32 }
 0x292   :  { %1593 = vrot.lane.b32.xlu1 %v1843_v23, %s4127_s26 }
 0x293   :  { %1975 = vrot.lane.b32.xlu0 %v1939_v21, %s4130_s16 }
 0x294   :  { %v1557_v33 = vld [vmem:[#allocation2 + $0x39] sm:$0xff] }
 0x295   :  { %v1653_v34 = vld [vmem:[#allocation2 + $0x3f] sm:$0xff]  ;;  %2147 = vst.msk [vmem:[#allocation4 + $0x48] sm:$0xff] %vm265_vm2, %v1557_v33 }
 0x296   :  { %1446 = vst.msk [vmem:[#allocation4 + $0x70] sm:$0xff] %vm265_vm2, %v1653_v34  ;;  %1689 = vrot.lane.b32.xlu1 %v1939_v21, %s4128_s27  ;;  %v1749_v38 = vld [vmem:[#allocation2 + $0x40] sm:$0xff] }
 0x297   :  { %2071 = vrot.lane.b32.xlu0 %v2035_v35, %s4124_s22 }
 0x298   :  { %v1845_v36 = vld [vmem:[#allocation2 + $0x41] sm:$0xff] }
 0x299   :  { %v1941_v37 = vld [vmem:[#allocation2 + $0x47] sm:$0xff]  ;;  %2148 = vst.msk [vmem:[#allocation4 + $0x58] sm:$0xff] %vm265_vm2, %v1845_v36 }
 0x29a   :  { %1447 = vst.msk [vmem:[#allocation4 + $0x80] sm:$0xff] %vm265_vm2, %v1941_v37  ;;  %1785 = vrot.lane.b32.xlu1 %v2035_v35, %s4125_s23  ;;  %v2037_v9 = vld [vmem:[#allocation2 + $0x48] sm:$0xff] }
 0x29b   :  { %1499 = vrot.lane.b32.xlu0 %v2035_v35, %s4123_s19 }
 0x29e   :  { %1881 = vrot.lane.b32.xlu1 %v1557_v33, %s4129_s13 }
 0x29f   :  { %1595 = vrot.lane.b32.xlu0 %v1557_v33, %s4127_s26 }
 0x2a2   :  { %1977 = vrot.lane.b32.xlu1 %v1653_v34, %s4130_s16 }
 0x2a3   :  { %1691 = vrot.lane.b32.xlu0 %v1653_v34, %s4128_s27  ;;  %v4085_v34 = vld [vmem:[%s5658_s5 + $0x38] sm:$0xff] }
 0x2a4   :  { %v2198_v35 = vmul.f32 %v4085_v34, %v2166_v27  ;;  %v2170_v34 = vld [vmem:[#allocation4 + $0x58] sm:$0xff] }
 0x2a6   :  { %2073 = vrot.lane.b32.xlu1 %v1749_v38, %s4124_s22 }
 0x2a7   :  { %1787 = vrot.lane.b32.xlu0 %v1749_v38, %s4125_s23 }
 0x2aa   :  { %1501 = vrot.lane.b32.xlu1 %v1749_v38, %s4123_s19  ;;  %v4087_v38 = vld [vmem:[%s5658_s5 + $0x10] sm:$0xff] }
 0x2ab   :  { %1883 = vrot.lane.b32.xlu0 %v1845_v36, %s4129_s13 }
 0x2ac   :  { %v1309_v39 = vpop.f32.mrf.mxu1 }
 0x2ad   :  { %v1310_v40 = vadd.f32 %v1309_v39, %v4856_v11 }
 0x2ae   :  { %v1311_v41 = vpop.f32.mrf.mxu1  ;;  %1597 = vrot.lane.b32.xlu1 %v1845_v36, %s4127_s26  ;;  %v4086_v36 = vld [vmem:[%s5658_s5] sm:$0xff] }
 0x2af   :  { %vm1348_vm4 = vcmp.ge.f32.partialorder %v1310_v40, 0.0  ;;  %v1364_v42 = vmul.f32 0.2, %v1310_v40  ;;  %1979 = vrot.lane.b32.xlu0 %v1941_v37, %s4130_s16  ;;  %v4088_v41 = vld [vmem:[%s5658_s5 + $0x28] sm:$0xff] }
 0x2b0   :  { %v1312_v6 = vpop.f32.mrf.mxu1 }
 0x2b1   :  { %v1380_v43 = vsel %vm1348_vm4, %v1310_v40, %v1364_v42  ;;  %v1313_v44 = vadd.f32 %v1312_v6, %v4856_v11  ;;  %v2196_v42 = vmul.f32 %v4088_v41, %v2164_v31 }
 0x2b2   :  { %1396 = vst.msk [vmem:[#allocation2 + $0x50] sm:$0xff] %vm265_vm2, %v1380_v43  ;;  %v1314_v45 = vpop.f32.mrf.mxu1  ;;  %1693 = vrot.lane.b32.xlu1 %v1941_v37, %s4128_s27 }
 0x2b3   :  { %vm1349_vm5 = vcmp.ge.f32.partialorder %v1313_v44, 0.0  ;;  %v1365_v46 = vmul.f32 0.2, %v1313_v44  ;;  %2075 = vrot.lane.b32.xlu0 %v2037_v9, %s4124_s22 }
 0x2b5   :  { %v1381_v47 = vsel %vm1349_vm5, %v1313_v44, %v1365_v46  ;;  %v2226_v44 = vpack.c.bf16 %v2198_v35, %v2196_v42 }
 0x2b6   :  { %1397 = vst.msk [vmem:[#allocation2 + $0x58] sm:$0xff] %vm265_vm2, %v1381_v47  ;;  %1789 = vrot.lane.b32.xlu1 %v2037_v9, %s4125_s23 }
 0x2b7   :  { %1503 = vrot.lane.b32.xlu0 %v2037_v9, %s4123_s19 }
 0x2b9   :  { %v1559_v14 = vld [vmem:[#allocation2 + $0x49] sm:$0xff] }
 0x2ba   :  { %v1655_v49 = vld [vmem:[#allocation2 + $0x4f] sm:$0xff]  ;;  %1885 = vrot.lane.b32.xlu1 %v1559_v14, %s4129_s13  ;;  %2149 = vst.msk [vmem:[#allocation4 + $0x68] sm:$0xff] %vm265_vm2, %v1559_v14 }
 0x2bb   :  { %1448 = vst.msk [vmem:[#allocation4 + $0x90] sm:$0xff] %vm265_vm2, %v1655_v49  ;;  %1599 = vrot.lane.b32.xlu0 %v1559_v14, %s4127_s26  ;;  %v1751_v19 = vld [vmem:[#allocation2 + $0x50] sm:$0xff] }
 0x2bc   :  { %v4089_v14 = vld [vmem:[%s5657_s1 + $0x30] sm:$0xff]  }
 0x2bd   :  { %v1584_v50 = vpop.permute.xlu0 %1583  ;;  %v1847_v51 = vld [vmem:[#allocation2 + $0x51] sm:$0xff] }
 0x2be   :  { %v1490_v53 = vpop.permute.xlu1 %1489  ;;  %v1943_v12 = vld [vmem:[#allocation2 + $0x57] sm:$0xff]  ;;  %1631 = vst.msk [vmem:[#allocation4] sm:$0xff] %vm546_vm8, %v1584_v50  ;;  %1981 = vrot.lane.b32.xlu1 %v1655_v49, %s4130_s16 }
 0x2bf   :  { %1536 = vst.msk [vmem:[#allocation4 + $0x10] sm:$0xff] %vm449_vm3, %v1490_v53  ;;  %1695 = vrot.lane.b32.xlu0 %v1655_v49, %s4128_s27  ;;  %v1317_v54 = vpop.f32.mrf.mxu1  ;;  %v2039_v60 = vld [vmem:[#allocation2 + $0x58] sm:$0xff] }
 0x2c0   :  { %2150 = vst.msk [vmem:[#allocation4 + $0x78] sm:$0xff] %vm265_vm2, %v1847_v51  ;;  %1449 = vst.msk [vmem:[#allocation4 + $0xa0] sm:$0xff] %vm265_vm2, %v1943_v12  ;;  %v1318_v48 = vadd.f32 %v1317_v54, %v4856_v11 }
 0x2c1   :  { %v1680_v8 = vpop.permute.xlu0 %1679  ;;  %v1319_v57 = vpop.f32.mrf.mxu1 }
 0x2c2   :  { %v1586_v52 = vpop.permute.xlu1 %1585  ;;  %vm1350_vm6 = vcmp.ge.f32.partialorder %v1318_v48, 0.0  ;;  %v1366_v55 = vmul.f32 0.2, %v1318_v48  ;;  %1727 = vst.msk [vmem:[#allocation4] sm:$0xff] %vm643_vm9, %v1680_v8  ;;  %2077 = vrot.lane.b32.xlu1 %v1751_v19, %s4124_s22  ;;  %v4090_v8 = vld [vmem:[%s5657_s1 + $0x28] sm:$0xff]   ;;  %v4091_v57 = vld [vmem:[%s5657_s1 + $0x20] sm:$0xff]  }
 0x2c3   :  { %1632 = vst.msk [vmem:[#allocation4 + $0x10] sm:$0xff] %vm546_vm8, %v1586_v52  ;;  %1791 = vrot.lane.b32.xlu0 %v1751_v19, %s4125_s23  ;;  %v1320_v59 = vpop.f32.mrf.mxu1 }
 0x2c4   :  { %v1382_v58 = vsel %vm1350_vm6, %v1318_v48, %v1366_v55  ;;  %v1321_v61 = vadd.f32 %v1320_v59, %v4856_v11 }
 0x2c5   :  { %1398 = vst.msk [vmem:[#allocation2 + $0x60] sm:$0xff] %vm265_vm2, %v1382_v58  ;;  %v1776_v62 = vpop.permute.xlu0 %1775  ;;  %v1322_v5 = vpop.f32.mrf.mxu1 }
 0x2c6   :  { %v1682_v63 = vpop.permute.xlu1 %1681  ;;  %1823 = vst.msk [vmem:[#allocation4] sm:$0xff] %vm740_vm10, %v1776_v62  ;;  %1505 = vrot.lane.b32.xlu1 %v1751_v19, %s4123_s19  ;;  %vm1351_vm7 = vcmp.ge.f32.partialorder %v1321_v61, 0.0  ;;  %v1367_v22 = vmul.f32 0.2, %v1321_v61 }
 0x2c7   :  { %1728 = vst.msk [vmem:[#allocation4 + $0x10] sm:$0xff] %vm643_vm9, %v1682_v63  ;;  %1887 = vrot.lane.b32.xlu0 %v1847_v51, %s4129_s13 }
 0x2c8   :  { %v1383_v7 = vsel %vm1351_vm7, %v1321_v61, %v1367_v22 }
 0x2c9   :  { %v1872_v17 = vpop.permute.xlu0 %1871  ;;  %1399 = vst.msk [vmem:[#allocation2 + $0x68] sm:$0xff] %vm265_vm2, %v1383_v7  ;;  %v4092_v7 = vld [vmem:[%s5657_s1 + $0x18] sm:$0xff]  }
 0x2ca   :  { %v1778_v18 = vpop.permute.xlu1 %1777  ;;  %1919 = vst.msk [vmem:[#allocation4] sm:$0xff] %vm837_vm11, %v1872_v17  ;;  %1601 = vrot.lane.b32.xlu1 %v1847_v51, %s4127_s26 }
 0x2cb   :  { %1824 = vst.msk [vmem:[#allocation4 + $0x10] sm:$0xff] %vm740_vm10, %v1778_v18  ;;  %1983 = vrot.lane.b32.xlu0 %v1943_v12, %s4130_s16 }
 0x2cc   :  { %v1561_v20 = vld [vmem:[#allocation2 + $0x59] sm:$0xff] }
 0x2cd   :  { %v1657_v56 = vld [vmem:[#allocation2 + $0x5f] sm:$0xff]  ;;  %v1968_v0 = vpop.permute.xlu0 %1967  ;;  %2151 = vst.msk [vmem:[#allocation4 + $0x88] sm:$0xff] %vm265_vm2, %v1561_v20 }
 0x2ce   :  { %1450 = vst.msk [vmem:[#allocation4 + $0xb0] sm:$0xff] %vm265_vm2, %v1657_v56  ;;  %1697 = vrot.lane.b32.xlu1 %v1943_v12, %s4128_s27  ;;  %v1753_v29 = vld [vmem:[#allocation2 + $0x60] sm:$0xff] }
 0x2cf   :  { %2015 = vst.msk [vmem:[#allocation4] sm:$0xff] %vm934_vm12, %v1968_v0  ;;  %2079 = vrot.lane.b32.xlu0 %v2039_v60, %s4124_s22  ;;  %v1874_v3 = vpop.permute.xlu1 %1873 }
 0x2d0   :  { %1920 = vst.msk [vmem:[#allocation4 + $0x10] sm:$0xff] %vm837_vm11, %v1874_v3  ;;  %v1849_v23 = vld [vmem:[#allocation2 + $0x61] sm:$0xff] }
 0x2d1   :  { %v2064_v16 = vpop.permute.xlu0 %2063  ;;  %v5026_v21 = vld [vmem:[#allocation2 + $0x67] sm:$0xff]  ;;  %2152 = vst.msk [vmem:[#allocation4 + $0x98] sm:$0xff] %vm265_vm2, %v1849_v23 }
 0x2d2   :  { %2111 = vst.msk [vmem:[#allocation4] sm:$0xff] %vm1031_vm13, %v2064_v16  ;;  %1793 = vrot.lane.b32.xlu1 %v2039_v60, %s4125_s23  ;;  %v2041_v48 = vld [vmem:[#allocation2 + $0x68] sm:$0xff] }
 0x2d3   :  { %1451 = vst.msk [vmem:[#allocation4 + $0xc0] sm:$0xff] %vm265_vm2, %v5026_v21  ;;  %1507 = vrot.lane.b32.xlu0 %v2039_v60, %s4123_s19  ;;  %v1970_v2 = vpop.permute.xlu1 %1969 }
 0x2d4   :  { %2016 = vst.msk [vmem:[#allocation4 + $0x10] sm:$0xff] %vm934_vm12, %v1970_v2 }
 0x2d5   :  { %v1492_v24 = vpop.permute.xlu0 %1491 }
 0x2d6   :  { %1537 = vst.msk [vmem:[#allocation4 + $0x20] sm:$0xff] %vm449_vm3, %v1492_v24  ;;  %1889 = vrot.lane.b32.xlu1 %v1561_v20, %s4129_s13 }
 0x2d7   :  { %1603 = vrot.lane.b32.xlu0 %v1561_v20, %s4127_s26  ;;  %v2066_v25 = vpop.permute.xlu1 %2065 }
 0x2d8   :  { %2112 = vst.msk [vmem:[#allocation4 + $0x10] sm:$0xff] %vm1031_vm13, %v2066_v25 }
 0x2d9   :  { %v1588_v4 = vpop.permute.xlu0 %1587  ;;  %v2159_v30 = vld [vmem:[#allocation4] sm:$0xff] }
 0x2da   :  { %1633 = vst.msk [vmem:[#allocation4 + $0x20] sm:$0xff] %vm546_vm8, %v1588_v4  ;;  %1985 = vrot.lane.b32.xlu1 %v1657_v56, %s4130_s16  ;;  %v2191_v37 = vmul.f32 %v4086_v36, %v2159_v30  ;;  %v4094_v4 = vld [vmem:[%s5657_s1 + $0x8] sm:$0xff]   ;;  %v4095_v30 = vld [vmem:[%s5657_s1] sm:$0xff]  }
 0x2db   :  { %1699 = vrot.lane.b32.xlu0 %v1657_v56, %s4128_s27  ;;  %v1494_v26 = vpop.permute.xlu1 %1493 }
 0x2dc   :  { %1538 = vst.msk [vmem:[#allocation4 + $0x30] sm:$0xff] %vm449_vm3, %v1494_v26 }
 0x2dd   :  { %v1684_v28 = vpop.permute.xlu0 %1683 }
 0x2de   :  { %1729 = vst.msk [vmem:[#allocation4 + $0x20] sm:$0xff] %vm643_vm9, %v1684_v28  ;;  %2081 = vrot.lane.b32.xlu1 %v1753_v29, %s4124_s22 }
 0x2df   :  { %1795 = vrot.lane.b32.xlu0 %v1753_v29, %s4125_s23  ;;  %v1590_v32 = vpop.permute.xlu1 %1589  ;;  %v2161_v33 = vld [vmem:[#allocation4 + $0x10] sm:$0xff] }
 0x2e0   :  { %1634 = vst.msk [vmem:[#allocation4 + $0x30] sm:$0xff] %vm546_vm8, %v1590_v32  ;;  %v2193_v39 = vmul.f32 %v4087_v38, %v2161_v33 }
 0x2e1   :  { %v1780_v40 = vpop.permute.xlu0 %1779 }
 0x2e2   :  { %1825 = vst.msk [vmem:[#allocation4 + $0x20] sm:$0xff] %vm740_vm10, %v1780_v40  ;;  %1509 = vrot.lane.b32.xlu1 %v1753_v29, %s4123_s19  ;;  %v2223_v6 = vpack.c.bf16 %v2193_v39, %v2191_v37  ;;  %v2168_v37 = vld [vmem:[#allocation4 + $0x48] sm:$0xff]  ;;  %v4096_v40 = vld [vmem:[%s5658_s5 + $0x58] sm:$0xff] }
 0x2e3   :  { %1891 = vrot.lane.b32.xlu0 %v1849_v23, %s4129_s13  ;;  %v1686_v43 = vpop.permute.xlu1 %1685  ;;  %v2202_v41 = vmul.f32 %v4096_v40, %v2170_v34 }
 0x2e4   :  { %1730 = vst.msk [vmem:[#allocation4 + $0x30] sm:$0xff] %vm643_vm9, %v1686_v43  ;;  %2355 = vmatmul.mubr.bf16.vlgmr.msra.gmra.mxu0 %v2223_v6  ;;  %v4097_v6 = vld [vmem:[%s5658_s5 + $0x20] sm:$0xff] }
 0x2e5   :  { %v1325_v45 = vpop.f32.mrf.mxu1  ;;  %v1876_v46 = vpop.permute.xlu0 %1875  ;;  %3784 = vmatprep.mubr.msk.bf16.mxu0 %vm265_vm2, %v2226_v44  ;;  %3949 = vmatpush3.bf16.msra.mxu0 %v4924_v15  ;;  %v4098_v44 = vld [vmem:[%s5658_s5 + $0x30] sm:$0xff] }
 0x2e6   :  { %v1326_v9 = vadd.f32 %v1325_v45, %v4856_v11  ;;  %1921 = vst.msk [vmem:[#allocation4 + $0x20] sm:$0xff] %vm837_vm11, %v1876_v46  ;;  %1605 = vrot.lane.b32.xlu1 %v1849_v23, %s4127_s26  ;;  %3950 = vmatprep.subr.bf16.mxu0 %v4089_v14  ;;  %v4099_v46 = vld [vmem:[%s5658_s5 + $0x48] sm:$0xff] }
 0x2e7   :  { %v1327_v47 = vpop.f32.mrf.mxu1  ;;  %1987 = vrot.lane.b32.xlu0 %v5026_v21, %s4130_s16  ;;  %v1782_v50 = vpop.permute.xlu1 %1781 }
 0x2e8   :  { %vm1352_vm14 = vcmp.ge.f32.partialorder %v1326_v9, 0.0  ;;  %v1368_v49 = vmul.f32 0.2, %v1326_v9  ;;  %1826 = vst.msk [vmem:[#allocation4 + $0x30] sm:$0xff] %vm740_vm10, %v1782_v50  ;;  %v2200_v47 = vmul.f32 %v4099_v46, %v2168_v37  ;;  %v4107_v46 = vld [vmem:[%s5658_s5 + $0x88] sm:$0xff] }
 0x2e9   :  { %v1328_v53 = vpop.f32.mrf.mxu1  ;;  %v1972_v12 = vpop.permute.xlu0 %1971  ;;  %3951 = vmatpush3.bf16.msra.mxu0 %v4089_v14 }
 0x2ea   :  { %v1384_v15 = vsel %vm1352_vm14, %v1326_v9, %v1368_v49  ;;  %v1329_v51 = vadd.f32 %v1328_v53, %v4856_v11  ;;  %2017 = vst.msk [vmem:[#allocation4 + $0x20] sm:$0xff] %vm934_vm12, %v1972_v12  ;;  %1701 = vrot.lane.b32.xlu1 %v5026_v21, %s4128_s27  ;;  %3952 = vmatprep.subr.bf16.mxu0 %v4090_v8 }
 0x2eb   :  { %1400 = vst.msk [vmem:[#allocation2 + $0x70] sm:$0xff] %vm265_vm2, %v1384_v15  ;;  %v1330_v54 = vpop.f32.mrf.mxu1  ;;  %2083 = vrot.lane.b32.xlu0 %v2041_v48, %s4124_s22  ;;  %v2228_v50 = vpack.c.bf16 %v2202_v41, %v2200_v47  ;;  %v4104_v41 = vld [vmem:[%s5658_s5 + $0x98] sm:$0xff] }
 0x2ec   :  { %vm1353_vm15 = vcmp.ge.f32.partialorder %v1329_v51, 0.0  ;;  %v1369_v52 = vmul.f32 0.2, %v1329_v51 }
 0x2ed   :  { %v2068_v55 = vpop.permute.xlu0 %2067  ;;  %3953 = vmatpush3.bf16.msra.mxu0 %v4090_v8 }
 0x2ee   :  { %v1385_v19 = vsel %vm1353_vm15, %v1329_v51, %v1369_v52  ;;  %2113 = vst.msk [vmem:[#allocation4 + $0x20] sm:$0xff] %vm1031_vm13, %v2068_v55  ;;  %1797 = vrot.lane.b32.xlu1 %v2041_v48, %s4125_s23  ;;  %3954 = vmatprep.subr.bf16.mxu0 %v4091_v57 }
 0x2ef   :  { %1401 = vst.msk [vmem:[#allocation2 + $0x78] sm:$0xff] %vm265_vm2, %v1385_v19  ;;  %1511 = vrot.lane.b32.xlu0 %v2041_v48, %s4123_s19  ;;  %v1333_v58 = vpop.f32.mrf.mxu1 }
 0x2f0   :  { %v1334_v59 = vadd.f32 %v1333_v58, %v4856_v11 }
 0x2f1   :  { %v1496_v61 = vpop.permute.xlu0 %1495  ;;  %v1335_v62 = vpop.f32.mrf.mxu1  ;;  %3955 = vmatpush3.bf16.msra.mxu0 %v4091_v57 }
 0x2f2   :  { %v1563_v63 = vld [vmem:[#allocation2 + $0x69] sm:$0xff]  ;;  %vm1354_vm4 = vcmp.ge.f32.partialorder %v1334_v59, 0.0  ;;  %v1370_v22 = vmul.f32 0.2, %v1334_v59  ;;  %1539 = vst.msk [vmem:[#allocation4 + $0x40] sm:$0xff] %vm449_vm3, %v1496_v61  ;;  %3956 = vmatprep.subr.bf16.mxu0 %v4092_v7 }
 0x2f3   :  { %v1659_v5 = vld [vmem:[#allocation2 + $0x6f] sm:$0xff]  ;;  %1893 = vrot.lane.b32.xlu1 %v1563_v63, %s4129_s13  ;;  %2153 = vst.msk [vmem:[#allocation4 + $0xa8] sm:$0xff] %vm265_vm2, %v1563_v63  ;;  %1607 = vrot.lane.b32.xlu0 %v1563_v63, %s4127_s26  ;;  %v1336_v17 = vpop.f32.mrf.mxu1 }
 0x2f4   :  { %1452 = vst.msk [vmem:[#allocation4 + $0xd0] sm:$0xff] %vm265_vm2, %v1659_v5  ;;  %v1386_v18 = vsel %vm1354_vm4, %v1334_v59, %v1370_v22  ;;  %v1337_v20 = vadd.f32 %v1336_v17, %v4856_v11  ;;  %v1878_v56 = vpop.permute.xlu1 %1877  ;;  %v4093_v11 = vld [vmem:[%s5657_s1 + $0x10] sm:$0xff]   ;;  %v2174_v59 = vld [vmem:[#allocation4 + $0x78] sm:$0xff]  ;;  %v2172_v63 = vld [vmem:[#allocation4 + $0x68] sm:$0xff]  ;;  %s4132_s1 = smov 119  }
 0x2f5   :  { %1402 = vst.msk [vmem:[#allocation2 + $0x80] sm:$0xff] %vm265_vm2, %v1386_v18  ;;  %v1592_v0 = vpop.permute.xlu0 %1591  ;;  %v1338_v60 = vpop.f32.mrf.mxu1  ;;  %3957 = vmatpush3.bf16.msra.mxu0 %v4092_v7  ;;  %v1755_v25 = vld [vmem:[#allocation2 + $0x70] sm:$0xff]  ;;  %v2163_v36 = vld [vmem:[#allocation4 + $0x20] sm:$0xff]  ;;  %v4100_v7 = vld [vmem:[%s5658_s5 + $0x78] sm:$0xff] }
 0x2f6   :  { %1922 = vst.msk [vmem:[#allocation4 + $0x30] sm:$0xff] %vm837_vm11, %v1878_v56  ;;  %v1851_v3 = vld [vmem:[#allocation2 + $0x71] sm:$0xff]  ;;  %vm1355_vm5 = vcmp.ge.f32.partialorder %v1337_v20, 0.0  ;;  %v1371_v23 = vmul.f32 0.2, %v1337_v20  ;;  %3958 = vmatprep.subr.bf16.mxu0 %v4093_v11  ;;  %v2195_v43 = vmul.f32 %v4097_v6, %v2163_v36  ;;  %v2206_v17 = vmul.f32 %v4100_v7, %v2174_v59 }
 0x2f7   :  { %v1947_v16 = vld [vmem:[#allocation2 + $0x77] sm:$0xff]  ;;  %1635 = vst.msk [vmem:[#allocation4 + $0x40] sm:$0xff] %vm546_vm8, %v1592_v0  ;;  %1989 = vrot.lane.b32.xlu1 %v1659_v5, %s4130_s16  ;;  %1703 = vrot.lane.b32.xlu0 %v1659_v5, %s4128_s27 }
 0x2f8   :  { %2154 = vst.msk [vmem:[#allocation4 + $0xb8] sm:$0xff] %vm265_vm2, %v1851_v3  ;;  %1453 = vst.msk [vmem:[#allocation4 + $0xe0] sm:$0xff] %vm265_vm2, %v1947_v16  ;;  %v1387_v21 = vsel %vm1355_vm5, %v1337_v20, %v1371_v23  ;;  %v1974_v2 = vpop.permute.xlu1 %1973  ;;  %v2043_v9 = vld [vmem:[#allocation2 + $0x78] sm:$0xff]  ;;  %v4101_v20 = vld [vmem:[%s5658_s5 + $0x40] sm:$0xff] }
 0x2f9   :  { %1403 = vst.msk [vmem:[#allocation2 + $0x88] sm:$0xff] %vm265_vm2, %v1387_v21  ;;  %v1688_v24 = vpop.permute.xlu0 %1687  ;;  %3959 = vmatpush3.bf16.msra.mxu0 %v4093_v11  ;;  %v4102_v0 = vld [vmem:[%s5658_s5 + $0x50] sm:$0xff]  ;;  %v2178_v36 = vld [vmem:[#allocation4 + $0x98] sm:$0xff] }
 0x2fa   :  { %2018 = vst.msk [vmem:[#allocation4 + $0x30] sm:$0xff] %vm934_vm12, %v1974_v2  ;;  %3960 = vmatprep.subr.bf16.mxu0 %v4094_v4 }
 0x2fb   :  { %1731 = vst.msk [vmem:[#allocation4 + $0x40] sm:$0xff] %vm643_vm9, %v1688_v24  ;;  %2085 = vrot.lane.b32.xlu1 %v1755_v25, %s4124_s22  ;;  %1799 = vrot.lane.b32.xlu0 %v1755_v25, %s4125_s23 }
 0x2fc   :  { %v2070_v26 = vpop.permute.xlu1 %2069  ;;  %v1565_v27 = vld [vmem:[#allocation2 + $0x79] sm:$0xff] }
 0x2fd   :  { %v1661_v28 = vld [vmem:[#allocation2 + $0x7f] sm:$0xff]  ;;  %v1784_v29 = vpop.permute.xlu0 %1783  ;;  %2114 = vst.msk [vmem:[#allocation4 + $0x30] sm:$0xff] %vm1031_vm13, %v2070_v26  ;;  %3961 = vmatpush3.bf16.msra.mxu0 %v4094_v4 }
 0x2fe   :  { %2155 = vst.msk [vmem:[#allocation4 + $0xc8] sm:$0xff] %vm265_vm2, %v1565_v27  ;;  %1454 = vst.msk [vmem:[#allocation4 + $0xf0] sm:$0xff] %vm265_vm2, %v1661_v28  ;;  %3962 = vmatprep.subr.bf16.mxu0 %v4095_v30  ;;  %v1757_v52 = vld [vmem:[#allocation2 + $0x80] sm:$0xff] }
 0x2ff   :  { %1827 = vst.msk [vmem:[#allocation4 + $0x40] sm:$0xff] %vm740_vm10, %v1784_v29  ;;  %1513 = vrot.lane.b32.xlu1 %v1755_v25, %s4123_s19  ;;  %1895 = vrot.lane.b32.xlu0 %v1851_v3, %s4129_s13  ;;  %v2046_v29 = vld [vmem:[#allocation2 + $0x90] sm:$0xff]  ;;  %v2182_v59 = vld [vmem:[#allocation4 + $0xb8] sm:$0xff] }
 0x300   :  { %v1498_v31 = vpop.permute.xlu1 %1497  ;;  %v5127_v32 = vld [vmem:[#allocation2 + $0x81] sm:$0xff]  ;;  %v5130_v35 = vld [vmem:[#allocation2 + $0x89] sm:$0xff] }
 0x301   :  { %v1880_v33 = vpop.permute.xlu0 %1879  ;;  %1540 = vst.msk [vmem:[#allocation4 + $0x50] sm:$0xff] %vm449_vm3, %v1498_v31  ;;  %3963 = vmatpush3.bf16.msra.mxu0 %v4095_v30  ;;  %v1949_v61 = vld [vmem:[#allocation2 + $0x87] sm:$0xff] }
 0x302   :  { %2156 = vst.msk [vmem:[#allocation4 + $0xd8] sm:$0xff] %vm265_vm2, %v5127_v32  ;;  %2157 = vst.msk [vmem:[#allocation4 + $0xe8] sm:$0xff] %vm265_vm2, %v5130_v35 }
 0x303   :  { %1923 = vst.msk [vmem:[#allocation4 + $0x40] sm:$0xff] %vm837_vm11, %v1880_v33  ;;  %1609 = vrot.lane.b32.xlu1 %v1851_v3, %s4127_s26  ;;  %1991 = vrot.lane.b32.xlu0 %v1947_v16, %s4130_s16  ;;  %v2045_v3 = vld [vmem:[#allocation2 + $0x88] sm:$0xff] }
 0x304   :  { %v1594_v38 = vpop.permute.xlu1 %1593  ;;  %v2165_v39 = vld [vmem:[#allocation4 + $0x30] sm:$0xff] }
 0x305   :  { %v1976_v42 = vpop.permute.xlu0 %1975  ;;  %1636 = vst.msk [vmem:[#allocation4 + $0x50] sm:$0xff] %vm546_vm8, %v1594_v38  ;;  %v2197_v45 = vmul.f32 %v4098_v44, %v2165_v39  ;;  %v2176_v38 = vld [vmem:[#allocation4 + $0x88] sm:$0xff] }
 0x306   :  { %2019 = vst.msk [vmem:[#allocation4 + $0x40] sm:$0xff] %vm934_vm12, %v1976_v42  ;;  %v2210_v42 = vmul.f32 %v4104_v41, %v2178_v36  ;;  %v2208_v47 = vmul.f32 %v4107_v46, %v2176_v38 }
 0x307   :  { %1705 = vrot.lane.b32.xlu1 %v1947_v16, %s4128_s27  ;;  %2087 = vrot.lane.b32.xlu0 %v2043_v9, %s4124_s22  ;;  %v2225_v14 = vpack.c.bf16 %v2197_v45, %v2195_v43  ;;  %v4103_v16 = vld [vmem:[%s5658_s5 + $0x68] sm:$0xff]  ;;  %v4105_v43 = vld [vmem:[%s5658_s5 + $0x60] sm:$0xff] }
 0x308   :  { %v1690_v49 = vpop.permute.xlu1 %1689  ;;  %v2204_v23 = vmul.f32 %v4103_v16, %v2172_v63  ;;  %v4106_v45 = vld [vmem:[%s5658_s5 + $0x70] sm:$0xff] }
 0x309   :  { %v2072_v53 = vpop.permute.xlu0 %2071  ;;  %1732 = vst.msk [vmem:[#allocation4 + $0x50] sm:$0xff] %vm643_vm9, %v1690_v49  ;;  %2363 = vmatmul.mubr.bf16.gmra.mxu0 %v2225_v14 }
 0x30a   :  { %2115 = vst.msk [vmem:[#allocation4 + $0x40] sm:$0xff] %vm1031_vm13, %v2072_v53  ;;  %3785 = vmatprep.mubr.msk.bf16.mxu0 %vm265_vm2, %v2228_v50  ;;  %v2230_v2 = vpack.c.bf16 %v2206_v17, %v2204_v23  ;;  %v2232_v50 = vpack.c.bf16 %v2210_v42, %v2208_v47  ;;  %v4114_v42 = vld [vmem:[%s5658_s5 + $0xb0] sm:$0xff] }
 0x30b   :  { %1801 = vrot.lane.b32.xlu1 %v2043_v9, %s4125_s23  ;;  %1515 = vrot.lane.b32.xlu0 %v2043_v9, %s4123_s19 }
 0x30c   :  { %v1786_v15 = vpop.permute.xlu1 %1785 }
 0x30d   :  { %v1500_v51 = vpop.permute.xlu0 %1499  ;;  %1828 = vst.msk [vmem:[#allocation4 + $0x50] sm:$0xff] %vm740_vm10, %v1786_v15 }
 0x30e   :  { %1541 = vst.msk [vmem:[#allocation4 + $0x60] sm:$0xff] %vm449_vm3, %v1500_v51 }
 0x30f   :  { %1897 = vrot.lane.b32.xlu1 %v1565_v27, %s4129_s13  ;;  %1611 = vrot.lane.b32.xlu0 %v1565_v27, %s4127_s26 }
 0x310   :  { %v1882_v12 = vpop.permute.xlu1 %1881 }
 0x311   :  { %v1596_v54 = vpop.permute.xlu0 %1595  ;;  %1924 = vst.msk [vmem:[#allocation4 + $0x50] sm:$0xff] %vm837_vm11, %v1882_v12  ;;  %v2167_v62 = vld [vmem:[#allocation4 + $0x40] sm:$0xff] }
 0x312   :  { %1637 = vst.msk [vmem:[#allocation4 + $0x60] sm:$0xff] %vm546_vm8, %v1596_v54  ;;  %v2199_v56 = vmul.f32 %v4101_v20, %v2167_v62  ;;  %v2180_v62 = vld [vmem:[#allocation4 + $0xa8] sm:$0xff] }
 0x313   :  { %1993 = vrot.lane.b32.xlu1 %v1661_v28, %s4130_s16  ;;  %1707 = vrot.lane.b32.xlu0 %v1661_v28, %s4128_s27  ;;  %v1950_v28 = vld [vmem:[#allocation2 + $0x8f] sm:$0xff] }
 0x314   :  { %v1978_v48 = vpop.permute.xlu1 %1977 }
 0x315   :  { %v1692_v8 = vpop.permute.xlu0 %1691  ;;  %2020 = vst.msk [vmem:[#allocation4 + $0x50] sm:$0xff] %vm934_vm12, %v1978_v48 }
 0x316   :  { %1733 = vst.msk [vmem:[#allocation4 + $0x60] sm:$0xff] %vm643_vm9, %v1692_v8 }
 0x317   :  { %2089 = vrot.lane.b32.xlu1 %v1757_v52, %s4124_s22  ;;  %1803 = vrot.lane.b32.xlu0 %v1757_v52, %s4125_s23 }
 0x318   :  { %v2074_v19 = vpop.permute.xlu1 %2073 }
 0x319   :  { %v1788_v55 = vpop.permute.xlu0 %1787  ;;  %2116 = vst.msk [vmem:[#allocation4 + $0x50] sm:$0xff] %vm1031_vm13, %v2074_v19 }
 0x31a   :  { %1829 = vst.msk [vmem:[#allocation4 + $0x60] sm:$0xff] %vm740_vm10, %v1788_v55  ;;  %v5243_v55 = vld [vmem:[%s5659_s3] sm:$0xff]  }
 0x31b   :  { %1517 = vrot.lane.b32.xlu1 %v1757_v52, %s4123_s19  ;;  %1899 = vrot.lane.b32.xlu0 %v5127_v32, %s4129_s13 }
 0x31c   :  { %v1502_v57 = vpop.permute.xlu1 %1501  ;;  %3944 = vmatprep.mubr.bf16.mxu1 %v5243_v55 }
 0x31d   :  { %v1884_v58 = vpop.permute.xlu0 %1883  ;;  %1542 = vst.msk [vmem:[#allocation4 + $0x70] sm:$0xff] %vm449_vm3, %v1502_v57 }
 0x31e   :  { %1925 = vst.msk [vmem:[#allocation4 + $0x60] sm:$0xff] %vm837_vm11, %v1884_v58 }
 0x31f   :  { %1613 = vrot.lane.b32.xlu1 %v5127_v32, %s4127_s26  ;;  %1995 = vrot.lane.b32.xlu0 %v1949_v61, %s4130_s16 }
 0x320   :  { %v1598_v5 = vpop.permute.xlu1 %1597  ;;  %v2169_v22 = vld [vmem:[#allocation4 + $0x50] sm:$0xff] }
 0x321   :  { %v1980_v18 = vpop.permute.xlu0 %1979  ;;  %1638 = vst.msk [vmem:[#allocation4 + $0x70] sm:$0xff] %vm546_vm8, %v1598_v5  ;;  %v2201_v60 = vmul.f32 %v4102_v0, %v2169_v22  ;;  %v4108_v22 = vld [vmem:[%s5658_s5 + $0xb8] sm:$0xff] }
 0x322   :  { %2021 = vst.msk [vmem:[#allocation4 + $0x60] sm:$0xff] %vm934_vm12, %v1980_v18  ;;  %v2214_v7 = vmul.f32 %v4108_v22, %v2182_v59  ;;  %v4109_v18 = vld [vmem:[%s5658_s5 + $0x80] sm:$0xff] }
 0x323   :  { %1709 = vrot.lane.b32.xlu1 %v1949_v61, %s4128_s27  ;;  %2091 = vrot.lane.b32.xlu0 %v2045_v3, %s4124_s22  ;;  %v2227_v11 = vpack.c.bf16 %v2201_v60, %v2199_v56  ;;  %v4110_v56 = vld [vmem:[%s5658_s5 + $0x90] sm:$0xff]  ;;  %v4111_v60 = vld [vmem:[%s5658_s5 + $0xa8] sm:$0xff] }
 0x324   :  { %v1694_v21 = vpop.permute.xlu1 %1693 }
 0x325   :  { %v2076_v24 = vpop.permute.xlu0 %2075  ;;  %1734 = vst.msk [vmem:[#allocation4 + $0x70] sm:$0xff] %vm643_vm9, %v1694_v21  ;;  %2371 = vmatmul.mubr.bf16.gmra.mxu0 %v2227_v11 }
 0x326   :  { %2117 = vst.msk [vmem:[#allocation4 + $0x60] sm:$0xff] %vm1031_vm13, %v2076_v24  ;;  %3786 = vmatprep.mubr.msk.bf16.mxu0 %vm265_vm2, %v2230_v2 }
 0x327   :  { %1805 = vrot.lane.b32.xlu1 %v2045_v3, %s4125_s23  ;;  %v2212_v3 = vmul.f32 %v4111_v60, %v2180_v62 }
 0x328   :  { %v1790_v25 = vpop.permute.xlu1 %1789 }
 0x329   :  { %v1504_v4 = vpop.permute.xlu0 %1503  ;;  %1830 = vst.msk [vmem:[#allocation4 + $0x70] sm:$0xff] %vm740_vm10, %v1790_v25  ;;  %v2234_v11 = vpack.c.bf16 %v2214_v7, %v2212_v3  ;;  %v4118_v7 = vld [vmem:[%s5658_s5 + $0xc0] sm:$0xff] }
 0x32a   :  { %1543 = vst.msk [vmem:[#allocation4 + $0x80] sm:$0xff] %vm449_vm3, %v1504_v4 }
 0x32b   :  { %1901 = vrot.lane.b32.xlu1 %v5130_v35, %s4129_s13 }
 0x32c   :  { %v1886_v26 = vpop.permute.xlu1 %1885 }
 0x32d   :  { %v1600_v27 = vpop.permute.xlu0 %1599  ;;  %1926 = vst.msk [vmem:[#allocation4 + $0x70] sm:$0xff] %vm837_vm11, %v1886_v26  ;;  %v2171_v37 = vld [vmem:[#allocation4 + $0x60] sm:$0xff] }
 0x32e   :  { %1639 = vst.msk [vmem:[#allocation4 + $0x80] sm:$0xff] %vm546_vm8, %v1600_v27  ;;  %v2203_v44 = vmul.f32 %v4105_v43, %v2171_v37  ;;  %v4112_v37 = vld [vmem:[%s5658_s5 + $0xd8] sm:$0xff]  ;;  %v4115_v43 = vld [vmem:[%s5658_s5 + $0xc8] sm:$0xff] }
 0x32f   :  { %1997 = vrot.lane.b32.xlu1 %v1950_v28, %s4130_s16 }
 0x330   :  { %v1982_v30 = vpop.permute.xlu1 %1981 }
 0x331   :  { %v1696_v31 = vpop.permute.xlu0 %1695  ;;  %2022 = vst.msk [vmem:[#allocation4 + $0x70] sm:$0xff] %vm934_vm12, %v1982_v30 }
 0x332   :  { %1735 = vst.msk [vmem:[#allocation4 + $0x80] sm:$0xff] %vm643_vm9, %v1696_v31 }
 0x333   :  { %2093 = vrot.lane.b32.xlu1 %v2046_v29, %s4124_s22 }
 0x334   :  { %v2078_v32 = vpop.permute.xlu1 %2077 }
 0x335   :  { %v1792_v33 = vpop.permute.xlu0 %1791  ;;  %2118 = vst.msk [vmem:[#allocation4 + $0x70] sm:$0xff] %vm1031_vm13, %v2078_v32  ;;  %v2186_v32 = vld [vmem:[#allocation4 + $0xd8] sm:$0xff] }
 0x336   :  { %1831 = vst.msk [vmem:[#allocation4 + $0x80] sm:$0xff] %vm740_vm10, %v1792_v33  ;;  %v2218_v38 = vmul.f32 %v4112_v37, %v2186_v32 }
 0x338   :  { %v1506_v34 = vpop.permute.xlu1 %1505 }
 0x339   :  { %v1888_v35 = vpop.permute.xlu0 %1887  ;;  %1544 = vst.msk [vmem:[#allocation4 + $0x90] sm:$0xff] %vm449_vm3, %v1506_v34  ;;  %v2184_v34 = vld [vmem:[#allocation4 + $0xc8] sm:$0xff] }
 0x33a   :  { %1927 = vst.msk [vmem:[#allocation4 + $0x80] sm:$0xff] %vm837_vm11, %v1888_v35 }
 0x33c   :  { %v1602_v39 = vpop.permute.xlu1 %1601  ;;  %v2173_v40 = vld [vmem:[#allocation4 + $0x70] sm:$0xff] }
 0x33d   :  { %v1984_v6 = vpop.permute.xlu0 %1983  ;;  %1640 = vst.msk [vmem:[#allocation4 + $0x90] sm:$0xff] %vm546_vm8, %v1602_v39  ;;  %v2205_v9 = vmul.f32 %v4106_v45, %v2173_v40  ;;  %v4113_v40 = vld [vmem:[%s5658_s5 + $0xa0] sm:$0xff] }
 0x33e   :  { %2023 = vst.msk [vmem:[#allocation4 + $0x80] sm:$0xff] %vm934_vm12, %v1984_v6 }
 0x33f   :  { %v2229_v14 = vpack.c.bf16 %v2205_v9, %v2203_v44  ;;  %v2216_v44 = vmul.f32 %v4115_v43, %v2184_v34  ;;  %v5344_v43 = vld [vmem:[%s5659_s3 + $0x8] sm:$0xff]   ;;  %s4133_s3 = smov 34  }
 0x340   :  { %v1698_v49 = vpop.permute.xlu1 %1697 }
 0x341   :  { %v2080_v53 = vpop.permute.xlu0 %2079  ;;  %1736 = vst.msk [vmem:[#allocation4 + $0x90] sm:$0xff] %vm643_vm9, %v1698_v49  ;;  %2379 = vmatmul.mubr.bf16.gmra.mxu0 %v2229_v14  ;;  %v2236_v46 = vpack.c.bf16 %v2218_v38, %v2216_v44  ;;  %v4121_v38 = vld [vmem:[%s5658_s5 + $0xf0] sm:$0xff] }
 0x342   :  { %2119 = vst.msk [vmem:[#allocation4 + $0x80] sm:$0xff] %vm1031_vm13, %v2080_v53  ;;  %3787 = vmatprep.mubr.msk.bf16.mxu0 %vm265_vm2, %v2232_v50 }
 0x344   :  { %v1794_v15 = vpop.permute.xlu1 %1793 }
 0x345   :  { %v1508_v51 = vpop.permute.xlu0 %1507  ;;  %1832 = vst.msk [vmem:[#allocation4 + $0x90] sm:$0xff] %vm740_vm10, %v1794_v15 }
 0x346   :  { %1545 = vst.msk [vmem:[#allocation4 + $0xa0] sm:$0xff] %vm449_vm3, %v1508_v51 }
 0x348   :  { %v1890_v12 = vpop.permute.xlu1 %1889 }
 0x349   :  { %v1604_v54 = vpop.permute.xlu0 %1603  ;;  %1928 = vst.msk [vmem:[#allocation4 + $0x90] sm:$0xff] %vm837_vm11, %v1890_v12  ;;  %v2175_v61 = vld [vmem:[#allocation4 + $0x80] sm:$0xff] }
 0x34a   :  { %1641 = vst.msk [vmem:[#allocation4 + $0xa0] sm:$0xff] %vm546_vm8, %v1604_v54  ;;  %v2207_v20 = vmul.f32 %v4109_v18, %v2175_v61  ;;  %v4116_v61 = vld [vmem:[%s5658_s5 + $0xe8] sm:$0xff]  ;;  %v4119_v18 = vld [vmem:[%s5658_s5 + $0xd0] sm:$0xff] }
 0x34c   :  { %v1986_v48 = vpop.permute.xlu1 %1985 }
 0x34d   :  { %v1700_v8 = vpop.permute.xlu0 %1699  ;;  %2024 = vst.msk [vmem:[#allocation4 + $0x90] sm:$0xff] %vm934_vm12, %v1986_v48 }
 0x34e   :  { %1737 = vst.msk [vmem:[#allocation4 + $0xa0] sm:$0xff] %vm643_vm9, %v1700_v8 }
 0x350   :  { %v2082_v52 = vpop.permute.xlu1 %2081 }
 0x351   :  { %v1796_v19 = vpop.permute.xlu0 %1795  ;;  %2120 = vst.msk [vmem:[#allocation4 + $0x90] sm:$0xff] %vm1031_vm13, %v2082_v52  ;;  %v2188_v52 = vld [vmem:[#allocation4 + $0xe8] sm:$0xff] }
 0x352   :  { %1833 = vst.msk [vmem:[#allocation4 + $0xa0] sm:$0xff] %vm740_vm10, %v1796_v19  ;;  %v2190_v19 = vld [vmem:[#allocation4 + $0xf8] sm:$0xff]  ;;  %v2220_v62 = vmul.f32 %v4116_v61, %v2188_v52 }
 0x354   :  { %v1510_v57 = vpop.permute.xlu1 %1509 }
 0x355   :  { %v1892_v58 = vpop.permute.xlu0 %1891  ;;  %1546 = vst.msk [vmem:[#allocation4 + $0xb0] sm:$0xff] %vm449_vm3, %v1510_v57 }
 0x356   :  { %1929 = vst.msk [vmem:[#allocation4 + $0xa0] sm:$0xff] %vm837_vm11, %v1892_v58 }
 0x358   :  { %v1606_v63 = vpop.permute.xlu1 %1605  ;;  %v2177_v5 = vld [vmem:[#allocation4 + $0x90] sm:$0xff] }
 0x359   :  { %v1988_v17 = vpop.permute.xlu0 %1987  ;;  %1642 = vst.msk [vmem:[#allocation4 + $0xb0] sm:$0xff] %vm546_vm8, %v1606_v63  ;;  %v2209_v0 = vmul.f32 %v4110_v56, %v2177_v5  ;;  %v4117_v63 = vld [vmem:[%s5658_s5 + $0xf8] sm:$0xff] }
 0x35a   :  { %2025 = vst.msk [vmem:[#allocation4 + $0xa0] sm:$0xff] %vm934_vm12, %v1988_v17  ;;  %v2222_v5 = vmul.f32 %v4117_v63, %v2190_v19 }
 0x35b   :  { %v2231_v16 = vpack.c.bf16 %v2209_v0, %v2207_v20 }
 0x35c   :  { %v1702_v23 = vpop.permute.xlu1 %1701  ;;  %v2238_v60 = vpack.c.bf16 %v2222_v5, %v2220_v62 }
 0x35d   :  { %v2084_v21 = vpop.permute.xlu0 %2083  ;;  %1738 = vst.msk [vmem:[#allocation4 + $0xb0] sm:$0xff] %vm643_vm9, %v1702_v23  ;;  %2387 = vmatmul.mubr.bf16.gmra.mxu0 %v2231_v16  ;;  %v1422_v23 = vld [vmem:[%s5656_s2 + $0x170] sm:$0x2] }
 0x35e   :  { %2121 = vst.msk [vmem:[#allocation4 + $0xa0] sm:$0xff] %vm1031_vm13, %v2084_v21  ;;  %3788 = vmatprep.mubr.msk.bf16.mxu0 %vm265_vm2, %v2234_v11  ;;  %v2239_v21 = vunpack.c.l.bf16 %v1422_v23 }
 0x360   :  { %v1798_v2 = vpop.permute.xlu1 %1797 }
 0x361   :  { %v1512_v24 = vpop.permute.xlu0 %1511  ;;  %1834 = vst.msk [vmem:[#allocation4 + $0xb0] sm:$0xff] %vm740_vm10, %v1798_v2  ;;  %v2242_v2 = vsub.s32 3, %v4227_v13 }
 0x362   :  { %1547 = vst.msk [vmem:[#allocation4 + $0xc0] sm:$0xff] %vm449_vm3, %v1512_v24 }
 0x365   :  { %v1894_v25 = vpop.permute.xlu1 %1893  ;;  %v1608_v4 = vpop.permute.xlu0 %1607  ;;  %v2179_v33 = vld [vmem:[#allocation4 + $0xa0] sm:$0xff] }
 0x366   :  { %1930 = vst.msk [vmem:[#allocation4 + $0xb0] sm:$0xff] %vm837_vm11, %v1894_v25  ;;  %v2211_v41 = vmul.f32 %v4113_v40, %v2179_v33  ;;  %v5327_v25 = vrot.slane %v2239_v21, %v2242_v2 }
 0x367   :  { %1643 = vst.msk [vmem:[#allocation4 + $0xc0] sm:$0xff] %vm546_vm8, %v1608_v4 }
 0x369   :  { %v1990_v26 = vpop.permute.xlu1 %1989  ;;  %v1704_v27 = vpop.permute.xlu0 %1703 }
 0x36a   :  { %2026 = vst.msk [vmem:[#allocation4 + $0xb0] sm:$0xff] %vm934_vm12, %v1990_v26 }
 0x36b   :  { %1739 = vst.msk [vmem:[#allocation4 + $0xc0] sm:$0xff] %vm643_vm9, %v1704_v27 }
 0x36d   :  { %v2086_v28 = vpop.permute.xlu1 %2085  ;;  %v1800_v29 = vpop.permute.xlu0 %1799 }
 0x36e   :  { %2122 = vst.msk [vmem:[#allocation4 + $0xb0] sm:$0xff] %vm1031_vm13, %v2086_v28 }
 0x36f   :  { %1835 = vst.msk [vmem:[#allocation4 + $0xc0] sm:$0xff] %vm740_vm10, %v1800_v29 }
 0x371   :  { %v1514_v30 = vpop.permute.xlu1 %1513  ;;  %v1896_v31 = vpop.permute.xlu0 %1895 }
 0x372   :  { %1548 = vst.msk [vmem:[#allocation4 + $0xd0] sm:$0xff] %vm449_vm3, %v1514_v30 }
 0x373   :  { %1931 = vst.msk [vmem:[#allocation4 + $0xc0] sm:$0xff] %vm837_vm11, %v1896_v31 }
 0x375   :  { %v1610_v35 = vpop.permute.xlu1 %1609  ;;  %v2181_v36 = vld [vmem:[#allocation4 + $0xb0] sm:$0xff]  ;;  %v1992_v39 = vpop.permute.xlu0 %1991 }
 0x376   :  { %1644 = vst.msk [vmem:[#allocation4 + $0xd0] sm:$0xff] %vm546_vm8, %v1610_v35  ;;  %v2213_v6 = vmul.f32 %v4114_v42, %v2181_v36  ;;  %v4120_v36 = vld [vmem:[%s5658_s5 + $0xe0] sm:$0xff] }
 0x377   :  { %2027 = vst.msk [vmem:[#allocation4 + $0xc0] sm:$0xff] %vm934_vm12, %v1992_v39 }
 0x378   :  { %v2233_v45 = vpack.c.bf16 %v2213_v6, %v2211_v41 }
 0x379   :  { %v1706_v9 = vpop.permute.xlu1 %1705  ;;  %v2088_v47 = vpop.permute.xlu0 %2087 }
 0x37a   :  { %1740 = vst.msk [vmem:[#allocation4 + $0xd0] sm:$0xff] %vm643_vm9, %v1706_v9  ;;  %2395 = vmatmul.mubr.bf16.gmra.mxu0 %v2233_v45 }
 0x37b   :  { %2123 = vst.msk [vmem:[#allocation4 + $0xc0] sm:$0xff] %vm1031_vm13, %v2088_v47  ;;  %3789 = vmatprep.mubr.msk.bf16.mxu0 %vm265_vm2, %v2236_v46 }
 0x37d   :  { %v1802_v14 = vpop.permute.xlu1 %1801  ;;  %v1516_v49 = vpop.permute.xlu0 %1515 }
 0x37e   :  { %1836 = vst.msk [vmem:[#allocation4 + $0xd0] sm:$0xff] %vm740_vm10, %v1802_v14 }
 0x37f   :  { %1549 = vst.msk [vmem:[#allocation4 + $0xe0] sm:$0xff] %vm449_vm3, %v1516_v49 }
 0x381   :  { %v1898_v50 = vpop.permute.xlu1 %1897  ;;  %v1612_v53 = vpop.permute.xlu0 %1611 }
 0x382   :  { %1932 = vst.msk [vmem:[#allocation4 + $0xd0] sm:$0xff] %vm837_vm11, %v1898_v50  ;;  %v2183_v57 = vld [vmem:[#allocation4 + $0xc0] sm:$0xff] }
 0x383   :  { %1645 = vst.msk [vmem:[#allocation4 + $0xe0] sm:$0xff] %vm546_vm8, %v1612_v53  ;;  %v2215_v17 = vmul.f32 %v4118_v7, %v2183_v57 }
 0x385   :  { %v1994_v15 = vpop.permute.xlu1 %1993  ;;  %v1708_v51 = vpop.permute.xlu0 %1707 }
 0x386   :  { %2028 = vst.msk [vmem:[#allocation4 + $0xd0] sm:$0xff] %vm934_vm12, %v1994_v15 }
 0x387   :  { %1741 = vst.msk [vmem:[#allocation4 + $0xe0] sm:$0xff] %vm643_vm9, %v1708_v51 }
 0x389   :  { %v2090_v12 = vpop.permute.xlu1 %2089  ;;  %v1804_v54 = vpop.permute.xlu0 %1803 }
 0x38a   :  { %2124 = vst.msk [vmem:[#allocation4 + $0xd0] sm:$0xff] %vm1031_vm13, %v2090_v12 }
 0x38b   :  { %1837 = vst.msk [vmem:[#allocation4 + $0xe0] sm:$0xff] %vm740_vm10, %v1804_v54 }
 0x38d   :  { %v1518_v48 = vpop.permute.xlu1 %1517  ;;  %v1900_v8 = vpop.permute.xlu0 %1899 }
 0x38e   :  { %1550 = vst.msk [vmem:[#allocation4 + $0xf0] sm:$0xff] %vm449_vm3, %v1518_v48 }
 0x38f   :  { %1933 = vst.msk [vmem:[#allocation4 + $0xe0] sm:$0xff] %vm837_vm11, %v1900_v8 }
 0x391   :  { %v1614_v58 = vpop.permute.xlu1 %1613  ;;  %v2185_v59 = vld [vmem:[#allocation4 + $0xd0] sm:$0xff]  ;;  %v1996_v22 = vpop.permute.xlu0 %1995 }
 0x392   :  { %1646 = vst.msk [vmem:[#allocation4 + $0xf0] sm:$0xff] %vm546_vm8, %v1614_v58  ;;  %v2217_v20 = vmul.f32 %v4119_v18, %v2185_v59 }
 0x393   :  { %2029 = vst.msk [vmem:[#allocation4 + $0xe0] sm:$0xff] %vm934_vm12, %v1996_v22 }
 0x394   :  { %v2235_v56 = vpack.c.bf16 %v2217_v20, %v2215_v17 }
 0x395   :  { %v1710_v0 = vpop.permute.xlu1 %1709  ;;  %v2092_v3 = vpop.permute.xlu0 %2091 }
 0x396   :  { %1742 = vst.msk [vmem:[#allocation4 + $0xf0] sm:$0xff] %vm643_vm9, %v1710_v0  ;;  %2403 = vmatmul.mubr.bf16.gmra.mxu0 %v2235_v56 }
 0x397   :  { %2125 = vst.msk [vmem:[#allocation4 + $0xe0] sm:$0xff] %vm1031_vm13, %v2092_v3  ;;  %3790 = vmatprep.mubr.msk.bf16.mxu0 %vm265_vm2, %v2238_v60 }
 0x399   :  { %v1806_v16 = vpop.permute.xlu1 %1805 }
 0x39a   :  { %1838 = vst.msk [vmem:[#allocation4 + $0xf0] sm:$0xff] %vm740_vm10, %v1806_v16 }
 0x39d   :  { %v1902_v11 = vpop.permute.xlu1 %1901 }
 0x39e   :  { %1934 = vst.msk [vmem:[#allocation4 + $0xf0] sm:$0xff] %vm837_vm11, %v1902_v11  ;;  %v2187_v33 = vld [vmem:[#allocation4 + $0xe0] sm:$0xff] }
 0x39f   :  { %v2219_v37 = vmul.f32 %v4120_v36, %v2187_v33 }
 0x3a1   :  { %v1998_v24 = vpop.permute.xlu1 %1997 }
 0x3a2   :  { %2030 = vst.msk [vmem:[#allocation4 + $0xf0] sm:$0xff] %vm934_vm12, %v1998_v24 }
 0x3a4   :  { %v2356_v26 = vpop.f32.mrf.mxu0 }
 0x3a5   :  { %v2094_v4 = vpop.permute.xlu1 %2093  ;;  %v2357_v27 = vadd.f32 %v2356_v26, %v5327_v25 }
 0x3a6   :  { %2126 = vst.msk [vmem:[#allocation4 + $0xf0] sm:$0xff] %vm1031_vm13, %v2094_v4  ;;  %v2358_v28 = vpop.f32.mrf.mxu0 }
 0x3a7   :  { %v2435_v30 = vmul.f32 0.2, %v2357_v27  ;;  %vm2419_vm3 = vcmp.ge.f32.partialorder %v2357_v27, 0.0 }
 0x3a8   :  { %v2359_v29 = vpop.f32.mrf.mxu0 }
 0x3a9   :  { %v2360_v31 = vadd.f32 %v2359_v29, %v5327_v25  ;;  %v2451_v40 = vsel %vm2419_vm3, %v2357_v27, %v2435_v30 }
 0x3aa   :  { %v2361_v32 = vpop.f32.mrf.mxu0 }
 0x3ab   :  { %vm2420_vm8 = vcmp.ge.f32.partialorder %v2360_v31, 0.0  ;;  %v2436_v34 = vmul.f32 0.2, %v2360_v31 }
 0x3ad   :  { %v2189_v35 = vld [vmem:[#allocation4 + $0xf0] sm:$0xff]  ;;  %v2452_v41 = vsel %vm2420_vm8, %v2360_v31, %v2436_v34 }
 0x3ae   :  { %v2221_v39 = vmul.f32 %v4121_v38, %v2189_v35  ;;  %v5338_v42 = vpack.c.bf16 %v2452_v41, %v2451_v40 }
 0x3b0   :  { %v2237_v6 = vpack.c.bf16 %v2221_v39, %v2219_v37 }
 0x3b2   :  { %2411 = vmatmul.mubr.bf16.gmra.mxu0 %v2237_v6 }
 0x3b3   :  { %3964 = vmatprep.mubr.bf16.mxu0 %v5243_v55 }
 0x3ba   :  { %3965 = vmatmul.mubr.bf16.vlgmr.msra.gmra.mxu0 %v5344_v43 }
 0x3c9   :  { %v2364_v44 = vpop.f32.mrf.mxu0 }
 0x3ca   :  { %v2365_v45 = vadd.f32 %v2364_v44, %v5327_v25 }
 0x3cb   :  { %v2366_v9 = vpop.f32.mrf.mxu0 }
 0x3cc   :  { %v2437_v47 = vmul.f32 0.2, %v2365_v45  ;;  %vm2421_vm9 = vcmp.ge.f32.partialorder %v2365_v45, 0.0 }
 0x3cd   :  { %v2367_v46 = vpop.f32.mrf.mxu0 }
 0x3ce   :  { %v2368_v14 = vadd.f32 %v2367_v46, %v5327_v25  ;;  %v2453_v55 = vsel %vm2421_vm9, %v2365_v45, %v2437_v47 }
 0x3cf   :  { %v2369_v49 = vpop.f32.mrf.mxu0 }
 0x3d0   :  { %vm2422_vm10 = vcmp.ge.f32.partialorder %v2368_v14, 0.0  ;;  %v2438_v50 = vmul.f32 0.2, %v2368_v14 }
 0x3d2   :  { %v2454_v53 = vsel %vm2422_vm10, %v2368_v14, %v2438_v50  ;;  %vm2708_vm10 = vcmask 261120  }
 0x3d3   :  { %v5349_v15 = vpack.c.bf16 %v2454_v53, %v2453_v55 }
 0x3e5   :  { %v2372_v51 = vpop.f32.mrf.mxu0 }
 0x3e6   :  { %v2373_v12 = vadd.f32 %v2372_v51, %v5327_v25 }
 0x3e7   :  { %v2374_v54 = vpop.f32.mrf.mxu0 }
 0x3e8   :  { %v2439_v8 = vmul.f32 0.2, %v2373_v12  ;;  %vm2423_vm11 = vcmp.ge.f32.partialorder %v2373_v12, 0.0 }
 0x3e9   :  { %v2375_v48 = vpop.f32.mrf.mxu0 }
 0x3ea   :  { %v2376_v52 = vadd.f32 %v2375_v48, %v5327_v25  ;;  %v2455_v58 = vsel %vm2423_vm11, %v2373_v12, %v2439_v8 }
 0x3eb   :  { %v2377_v19 = vpop.f32.mrf.mxu0 }
 0x3ec   :  { %vm2424_vm12 = vcmp.ge.f32.partialorder %v2376_v52, 0.0  ;;  %v2440_v57 = vmul.f32 0.2, %v2376_v52 }
 0x3ee   :  { %v2456_v59 = vsel %vm2424_vm12, %v2376_v52, %v2440_v57 }
 0x3ef   :  { %v5353_v61 = vpack.c.bf16 %v2456_v59, %v2455_v58 }
 0x401   :  { %v2380_v62 = vpop.f32.mrf.mxu0 }
 0x402   :  { %v2381_v63 = vadd.f32 %v2380_v62, %v5327_v25 }
 0x403   :  { %v2382_v5 = vpop.f32.mrf.mxu0 }
 0x404   :  { %v2441_v7 = vmul.f32 0.2, %v2381_v63  ;;  %vm2425_vm13 = vcmp.ge.f32.partialorder %v2381_v63, 0.0  ;;  %v2597_v5 = vld [vmem:[%s5656_s2 + $0x4] sm:$0x3] }
 0x405   :  { %v2383_v22 = vpop.f32.mrf.mxu0 }
 0x406   :  { %v2384_v17 = vadd.f32 %v2383_v22, %v5327_v25  ;;  %v2457_v56 = vsel %vm2425_vm13, %v2381_v63, %v2441_v7  ;;  %v2613_v7 = vsel %vm116_vm0, %v2597_v5, 0 }
 0x407   :  { %v2385_v18 = vpop.f32.mrf.mxu0 }
 0x408   :  { %vm2426_vm6 = vcmp.ge.f32.partialorder %v2384_v17, 0.0  ;;  %v2442_v20 = vmul.f32 0.2, %v2384_v17  ;;  %v2604_v18 = vsub.s32 1, %v4227_v13 }
 0x40a   :  { %v2458_v0 = vsel %vm2426_vm6, %v2384_v17, %v2442_v20 }
 0x40b   :  { %v2474_v60 = vpack.c.bf16 %v2458_v0, %v2457_v56 }
 0x41d   :  { %v2388_v3 = vpop.f32.mrf.mxu0 }
 0x41e   :  { %v2389_v16 = vadd.f32 %v2388_v3, %v5327_v25 }
 0x41f   :  { %v2390_v23 = vpop.f32.mrf.mxu0 }
 0x420   :  { %v2443_v21 = vmul.f32 0.2, %v2389_v16  ;;  %vm2427_vm7 = vcmp.ge.f32.partialorder %v2389_v16, 0.0  ;;  %v2677_v23 = vstv %s5661_s0 }
 0x421   :  { %v2391_v11 = vpop.f32.mrf.mxu0 }
 0x422   :  { %v2392_v2 = vadd.f32 %v2391_v11, %v5327_v25  ;;  %v2459_v26 = vsel %vm2427_vm7, %v2389_v16, %v2443_v21  ;;  %v2683_v21 = vstv %s2682_s20 }
 0x423   :  { %v2393_v24 = vpop.f32.mrf.mxu0 }
 0x424   :  { %vm2428_vm14 = vcmp.ge.f32.partialorder %v2392_v2, 0.0  ;;  %v2444_v4 = vmul.f32 0.2, %v2392_v2 }
 0x426   :  { %v2460_v27 = vsel %vm2428_vm14, %v2392_v2, %v2444_v4 }
 0x427   :  { %v2475_v28 = vpack.c.bf16 %v2460_v27, %v2459_v26 }
 0x43a   :  { %v2396_v29 = vpop.f32.mrf.mxu0 }
 0x43b   :  { %v2397_v14 = vadd.f32 %v2396_v29, %v5327_v25 }
 0x43c   :  { %v2398_v30 = vpop.f32.mrf.mxu0 }
 0x43d   :  { %v2445_v48 = vmul.f32 0.2, %v2397_v14  ;;  %vm2429_vm9 = vcmp.ge.f32.partialorder %v2397_v14, 0.0 }
 0x43e   :  { %v2399_v31 = vpop.f32.mrf.mxu0 }
 0x43f   :  { %v2400_v44 = vadd.f32 %v2399_v31, %v5327_v25  ;;  %v2461_v57 = vsel %vm2429_vm9, %v2397_v14, %v2445_v48  ;;  %vm2944_vm9 = vcmask 277640  }
 0x440   :  { %v2401_v32 = vpop.f32.mrf.mxu0 }
 0x441   :  { %v2446_v55 = vmul.f32 0.2, %v2400_v44  ;;  %vm2430_vm8 = vcmp.ge.f32.partialorder %v2400_v44, 0.0 }
 0x443   :  { %v2462_v19 = vsel %vm2430_vm8, %v2400_v44, %v2446_v55  ;;  %vm2873_vm8 = vcmask 138240  }
 0x444   :  { %2875 = vst.msk [vmem:[#allocation3 + $0x8] sm:$0xff] %vm2873_vm8, %v4122_v10  ;;  %2874 = vst.msk [vmem:[#allocation3] sm:$0xff] %vm2873_vm8, %v4122_v10 }
 0x445   :  { %2876 = vst.msk [vmem:[#allocation3 + $0x30] sm:$0xff] %vm2873_vm8, %v4122_v10  ;;  %2877 = vst.msk [vmem:[#allocation3 + $0x38] sm:$0xff] %vm2873_vm8, %v4122_v10 }
 0x456   :  { %v2404_v33 = vpop.f32.mrf.mxu0 }
 0x457   :  { %v2405_v41 = vadd.f32 %v2404_v33, %v5327_v25 }
 0x458   :  { %v2406_v34 = vpop.f32.mrf.mxu0 }
 0x459   :  { %v2447_v49 = vmul.f32 0.2, %v2405_v41  ;;  %vm2431_vm3 = vcmp.ge.f32.partialorder %v2405_v41, 0.0 }
 0x45a   :  { %v2407_v35 = vpop.f32.mrf.mxu0 }
 0x45b   :  { %v2408_v38 = vadd.f32 %v2407_v35, %v5327_v25  ;;  %v2463_v8 = vsel %vm2431_vm3, %v2405_v41, %v2447_v49 }
 0x45c   :  { %v2409_v36 = vpop.f32.mrf.mxu0 }
 0x45d   :  { %v2448_v45 = vmul.f32 0.2, %v2408_v38  ;;  %vm2432_vm15 = vcmp.ge.f32.partialorder %v2408_v38, 0.0 }
 0x45f   :  { %v2464_v12 = vsel %vm2432_vm15, %v2408_v38, %v2448_v45 }
 0x460   :  { %v2477_v52 = vpack.c.bf16 %v2464_v12, %v2463_v8 }
 0x472   :  { %v2412_v37 = vpop.f32.mrf.mxu0 }
 0x473   :  { %v2413_v39 = vadd.f32 %v2412_v37, %v5327_v25 }
 0x474   :  { %v2414_v40 = vpop.f32.mrf.mxu0 }
 0x475   :  { %v2449_v9 = vmul.f32 0.2, %v2413_v39  ;;  %vm2433_vm4 = vcmp.ge.f32.partialorder %v2413_v39, 0.0 }
 0x476   :  { %v2415_v6 = vpop.f32.mrf.mxu0 }
 0x477   :  { %v2416_v46 = vadd.f32 %v2415_v6, %v5327_v25  ;;  %v2465_v53 = vsel %vm2433_vm4, %v2413_v39, %v2449_v9  ;;  %v2476_v25 = vpack.c.bf16 %v2462_v19, %v2461_v57 }
 0x478   :  { %v2417_v47 = vpop.f32.mrf.mxu0 }
 0x479   :  { %vm2434_vm5 = vcmp.ge.f32.partialorder %v2416_v46, 0.0  ;;  %v2450_v50 = vmul.f32 0.2, %v2416_v46 }
 0x47a   :  { %v3966_v58 = vpop.f32.mrf.mxu0 }
 0x47b   :  { %v2466_v51 = vsel %vm2434_vm5, %v2416_v46, %v2450_v50  ;;  %v4046_v50 = vld [vmem:[%s5660_s4 + $0x8] sm:$0xff]  }
 0x47c   :  { %v2478_v54 = vpack.c.bf16 %v2466_v51, %v2465_v53  ;;  %v2582_v59 = vpop.f32.mrf.mxu0 }
 0x47e   :  { %3928 = vmatprep.subr.bf16.mxu1 %v2478_v54  ;;  %v3967_v62 = vpop.f32.mrf.mxu0 }
 0x47f   :  { %3929 = vmatpush3.bf16.msra.mxu1 %v2478_v54 }
 0x480   :  { %3930 = vmatprep.subr.bf16.mxu1 %v2477_v52  ;;  %v2585_v63 = vpop.f32.mrf.mxu0 }
 0x481   :  { %v2598_v22 = vpack.c.bf16 %v2585_v63, %v2582_v59 }
 0x483   :  { %3931 = vmatpush3.bf16.msra.mxu1 %v2477_v52 }
 0x484   :  { %3932 = vmatprep.subr.bf16.mxu1 %v2476_v25 }
 0x487   :  { %3933 = vmatpush3.bf16.msra.mxu1 %v2476_v25 }
 0x488   :  { %3934 = vmatprep.subr.bf16.mxu1 %v2475_v28 }
 0x48b   :  { %3935 = vmatpush3.bf16.msra.mxu1 %v2475_v28 }
 0x48c   :  { %3936 = vmatprep.subr.bf16.mxu1 %v2474_v60 }
 0x48f   :  { %3937 = vmatpush3.bf16.msra.mxu1 %v2474_v60 }
 0x490   :  { %3938 = vmatprep.subr.bf16.mxu1 %v5353_v61 }
 0x493   :  { %3939 = vmatpush3.bf16.msra.mxu1 %v5353_v61  ;;  %v4045_v61 = vld [vmem:[%s5660_s4] sm:$0xff]   ;;  %s4131_s4 = smov 17  }
 0x494   :  { %3940 = vmatprep.subr.bf16.mxu1 %v5349_v15  ;;  %3978 = vmatprep.mubr.msk.bf16.mxu0 %vm2708_vm10, %v4045_v61 }
 0x497   :  { %3941 = vmatpush3.bf16.msra.mxu1 %v5349_v15  ;;  %v2599_v15 = vpack.c.bf16 %v3967_v62, %v3966_v58 }
 0x498   :  { %3942 = vmatprep.subr.bf16.mxu1 %v5338_v42 }
 0x49b   :  { %3943 = vmatpush3.bf16.msra.mxu1 %v5338_v42  ;;  %v2600_v42 = vld [vmem:[%s5656_s2 + $0x170] sm:$0x1] }
 0x49c   :  { %3997 = vmatprep.subr.msk.bf16.mxu1 %vm116_vm0, %v2597_v5  ;;  %v2601_v17 = vunpack.c.l.bf16 %v2600_v42 }
 0x49e   :  { %3945 = vmatmul.mubr.bf16.vlgmr.msra.gmra.mxu1 %v5344_v43  ;;  %v2605_v0 = vrot.slane %v2601_v17, %v2604_v18 }
 0x49f   :  { %3969 = vmatpush3.bf16.msra.mxu1 %v2613_v7  ;;  %3970 = vmatprep.mubr.msk.bf16.mxu1 %vm91_vm1, %v2598_v22 }
 0x4a6   :  { %3971 = vmatmul.mubr.msk.bf16.vlgmr.msra.gmra.mxu1 %vm91_vm1, %v2599_v15 }
 0x4a7   :  { %3986 = vmatprep.mubr.msk.bf16.mxu1 %vm2708_vm10, %v4045_v61 }
 0x55e   :  { %v3946_v43 = vpop.f32.mrf.mxu1 }
 0x55f   :  { %v2680_v29 = vmul.f32 %v3946_v43, %v2677_v23 }
 0x560   :  { %v2525_v20 = vpop.f32.mrf.mxu1 }
 0x561   :  { %v2678_v35 = vmul.f32 %v2677_v23, %v2525_v20 }
 0x562   :  { %v3947_v56 = vpop.f32.mrf.mxu1 }
 0x563   :  { %v2681_v40 = vmul.f32 %v3947_v56, %v2677_v23 }
 0x564   :  { %v2528_v60 = vpop.f32.mrf.mxu1 }
 0x565   :  { %v2679_v45 = vmul.f32 %v2677_v23, %v2528_v60 }
 0x566   :  { %v3972_v3 = vpop.f32.mrf.mxu1 }
 0x567   :  { %v2658_v16 = vadd.f32 %v3972_v3, %v2605_v0 }
 0x568   :  { %v2649_v11 = vpop.f32.mrf.mxu1 }
 0x569   :  { %vm2666_vm0 = vcmp.ge.f32.partialorder %v2658_v16, 0.0  ;;  %v2670_v2 = vmul.f32 0.2, %v2658_v16  ;;  %v2650_v24 = vadd.f32 %v2649_v11, %v2605_v0 }
 0x56a   :  { %v3973_v4 = vpop.f32.mrf.mxu1 }
 0x56b   :  { %v2674_v26 = vsel %vm2666_vm0, %v2658_v16, %v2670_v2  ;;  %vm2664_vm1 = vcmp.ge.f32.partialorder %v2650_v24, 0.0  ;;  %v2668_v27 = vmul.f32 0.2, %v2650_v24  ;;  %v2661_v28 = vadd.f32 %v3973_v4, %v2605_v0 }
 0x56c   :  { %v2686_v30 = vmul.f32 %v2683_v21, %v2674_v26  ;;  %v2652_v31 = vpop.f32.mrf.mxu1  ;;  %vm2882_vm0 = vcmask 138368  }
 0x56d   :  { %v2672_v32 = vsel %vm2664_vm1, %v2650_v24, %v2668_v27  ;;  %vm2667_vm11 = vcmp.ge.f32.partialorder %v2661_v28, 0.0  ;;  %v2671_v33 = vmul.f32 0.2, %v2661_v28  ;;  %v2653_v34 = vadd.f32 %v2652_v31, %v2605_v0 }
 0x56e   :  { %v2690_v36 = vadd.f32 %v2686_v30, %v2680_v29  ;;  %v2684_v37 = vmul.f32 %v2683_v21, %v2672_v32  ;;  %v2924_v32 = vld [vmem:[#allocation3 + $0x8] sm:$0xff]  ;;  %vm3220_vm1 = vcmask 1043456  }
 0x56f   :  { %v2675_v38 = vsel %vm2667_vm11, %v2661_v28, %v2671_v33  ;;  %vm2665_vm12 = vcmp.ge.f32.partialorder %v2653_v34, 0.0  ;;  %v2669_v39 = vmul.f32 0.2, %v2653_v34  ;;  %v3077_v33 = vld [vmem:[#allocation3 + $0x30] sm:$0xff]  ;;  %vm3221_vm11 = vcmask 1044480  }
 0x570   :  { %2880 = vst.msk [vmem:[#allocation3 + $0x20] sm:$0xff] %vm265_vm2, %v2690_v36  ;;  %v2688_v41 = vadd.f32 %v2684_v37, %v2678_v35  ;;  %v2687_v6 = vmul.f32 %v2683_v21, %v2675_v38 }
 0x571   :  { %v2673_v44 = vsel %vm2665_vm12, %v2653_v34, %v2669_v39  ;;  %v2916_v34 = vld [vmem:[#allocation3 + $0x6] sm:$0xff]  ;;  %vm2969_vm12 = vcmask 417040  }
 0x572   :  { %2878 = vst.msk [vmem:[#allocation3 + $0x10] sm:$0xff] %vm265_vm2, %v2688_v41  ;;  %v2691_v9 = vadd.f32 %v2687_v6, %v2681_v40  ;;  %v2685_v46 = vmul.f32 %v2683_v21, %v2673_v44 }
 0x573   :  { %2920 = vst.msk [vmem:[#allocation4] sm:$0xff] %vm2873_vm8, %v2916_v34 }
 0x574   :  { %2881 = vst.msk [vmem:[#allocation3 + $0x28] sm:$0xff] %vm265_vm2, %v2691_v9  ;;  %v2689_v47 = vadd.f32 %v2685_v46, %v2679_v45  ;;  %v2697_v14 = vpack.c.bf16 %v2691_v9, %v2690_v36 }
 0x576   :  { %2879 = vst.msk [vmem:[#allocation3 + $0x18] sm:$0xff] %vm265_vm2, %v2689_v47  ;;  %3974 = vmatprep.subr.bf16.mxu0 %v2697_v14  ;;  %v2696_v49 = vpack.c.bf16 %v2689_v47, %v2688_v41 }
 0x577   :  { %3975 = vmatpush3.bf16.msra.mxu0 %v2697_v14 }
 0x578   :  { %3976 = vmatprep.subr.bf16.mxu0 %v2696_v49 }
 0x57b   :  { %3977 = vmatpush3.bf16.msra.mxu0 %v2696_v49  ;;  %v4047_v49 = vld [vmem:[%s5656_s2 + $0xd0] sm:$0xff]  }
 0x57c   :  { %3227 = vmatprep.subr.bf16.mxu0 %v4126_v1 }
 0x57e   :  { %3979 = vmatmul.mubr.msk.bf16.vlgmr.msra.gmra.mxu0 %vm2708_vm10, %v4046_v50 }
 0x57f   :  { %3228 = vmatpush1.bf16.msra.mxu0 %v4047_v49 }
 0x580   :  { %3229 = vmatprep.subr.bf16.mxu0 %v4126_v1 }
 0x63e   :  { %v3980_v55 = vpop.f32.mrf.mxu0 }
 0x63f   :  { %v2766_v51 = vsub.f32 %v2690_v36, %v3980_v55 }
 0x640   :  { %v2749_v53 = vpop.f32.mrf.mxu0 }
 0x641   :  { %v2764_v54 = vsub.f32 %v2688_v41, %v2749_v53  ;;  %v2770_v52 = vmul.f32 %v2766_v51, %v2766_v51  ;;  %v4048_v53 = vld [vmem:[%s5656_s2 + $0xc8] sm:$0xff]   ;;  %v4049_v51 = vld [vmem:[%s5656_s2 + $0xc0] sm:$0xff]  }
 0x642   :  { %v3981_v12 = vpop.f32.mrf.mxu0  ;;  %3230 = vmatpush1.bf16.msra.mxu0 %v4048_v53 }
 0x643   :  { %v2767_v48 = vsub.f32 %v2691_v9, %v3981_v12  ;;  %v2768_v25 = vmul.f32 %v2764_v54, %v2764_v54  ;;  %3231 = vmatprep.subr.bf16.mxu0 %v4126_v1 }
 0x644   :  { %v2752_v8 = vpop.f32.mrf.mxu0 }
 0x645   :  { %v2771_v19 = vmul.f32 %v2767_v48, %v2767_v48  ;;  %v2765_v57 = vsub.f32 %v2689_v47, %v2752_v8 }
 0x646   :  { %3232 = vmatpush1.bf16.msra.mxu0 %v4049_v51 }
 0x647   :  { %v2773_v58 = vpack.c.bf16 %v2771_v19, %v2770_v52  ;;  %v2769_v59 = vmul.f32 %v2765_v57, %v2765_v57  ;;  %3233 = vmatprep.subr.bf16.mxu0 %v4126_v1  ;;  %v4050_v57 = vld [vmem:[%s5656_s2 + $0xb8] sm:$0xff]  }
 0x649   :  { %v2772_v62 = vpack.c.bf16 %v2769_v59, %v2768_v25  ;;  %3982 = vmatprep.subr.bf16.mxu1 %v2773_v58  ;;  %v4051_v25 = vld [vmem:[%s5656_s2 + $0xb0] sm:$0xff]  }
 0x64a   :  { %3983 = vmatpush3.bf16.msra.mxu1 %v2773_v58  ;;  %3234 = vmatpush1.bf16.msra.mxu0 %v4050_v57  ;;  %v4052_v58 = vld [vmem:[%s5656_s2 + $0xa8] sm:$0xff]  }
 0x64b   :  { %3984 = vmatprep.subr.bf16.mxu1 %v2772_v62  ;;  %3235 = vmatprep.subr.bf16.mxu0 %v4126_v1 }
 0x64e   :  { %3985 = vmatpush3.bf16.msra.mxu1 %v2772_v62  ;;  %3236 = vmatpush1.bf16.msra.mxu0 %v4051_v25  ;;  %v4053_v62 = vld [vmem:[%s5656_s2 + $0xa0] sm:$0xff]  }
 0x64f   :  { %3237 = vmatprep.subr.bf16.mxu0 %v4126_v1 }
 0x651   :  { %3987 = vmatmul.mubr.msk.bf16.vlgmr.msra.gmra.mxu1 %vm2708_vm10, %v4046_v50  ;;  %vm3096_vm10 = vcmask 64512  }
 0x652   :  { %3238 = vmatpush1.bf16.msra.mxu0 %v4052_v58 }
 0x653   :  { %3239 = vmatprep.subr.bf16.mxu0 %v4126_v1 }
 0x656   :  { %3240 = vmatpush1.bf16.msra.mxu0 %v4053_v62  ;;  %v2914_v62 = vld [vmem:[%s5662_s6 + $0x30] sm:$0xff] }
 0x657   :  { %3241 = vmatprep.subr.bf16.mxu0 %v4126_v1 }
 0x711   :  { %v3988_v63 = vpop.f32.mrf.mxu1 }
 0x712   :  { %4074 = vrsqrt.f32 %v3988_v63  ;;  %vm2839_vm6 = vcmp.eq.f32.partialorder %v3988_v63, inf  ;;  %v2842_v16 = vand.u32 2147483648, %v3988_v63  ;;  %vm2841_vm14 = vcmp.eq.f32.partialorder %v3988_v63, 0.0 }
 0x713   :  { %v2808_v5 = vpop.f32.mrf.mxu1 }
 0x714   :  { %4076 = vrsqrt.f32 %v2808_v5  ;;  %vm2825_vm13 = vcmp.eq.f32.partialorder %v2808_v5, inf  ;;  %v2828_v18 = vand.u32 2147483648, %v2808_v5  ;;  %vm2827_vm7 = vcmp.eq.f32.partialorder %v2808_v5, 0.0 }
 0x715   :  { %v3989_v22 = vpop.f32.mrf.mxu1 }
 0x716   :  { %4078 = vrsqrt.f32 %v3989_v22  ;;  %vm2846_vm4 = vcmp.eq.f32.partialorder %v3989_v22, inf  ;;  %v2849_v27 = vand.u32 2147483648, %v3989_v22  ;;  %vm2848_vm3 = vcmp.eq.f32.partialorder %v3989_v22, 0.0 }
 0x717   :  { %v2811_v7 = vpop.f32.mrf.mxu1 }
 0x718   :  { %4080 = vrsqrt.f32 %v2811_v7  ;;  %vm2832_vm15 = vcmp.eq.f32.partialorder %v2811_v7, inf  ;;  %v2835_v2 = vand.u32 2147483648, %v2811_v7  ;;  %vm2834_vm5 = vcmp.eq.f32.partialorder %v2811_v7, 0.0 }
 0x71f   :  { %v4075_v15 = vpop.eup %4074 }
 0x720   :  { %v2838_v61 = vmul.f32 %v4075_v15, %v3988_v63  ;;  %v4138_v15 = vmov 65535  }
 0x721   :  { %v4077_v42 = vpop.eup %4076 }
 0x722   :  { %v2824_v43 = vmul.f32 %v4077_v42, %v2808_v5  ;;  %v2840_v56 = vsel %vm2839_vm6, %v3988_v63, %v2838_v61  ;;  %v3222_v61 = vsel %vm3220_vm1, 4294967295, %v4138_v15  ;;  %vm3019_vm6 = vcmask 695840  }
 0x723   :  { %v4079_v17 = vpop.eup %4078  ;;  %v2843_v21 = vsel %vm2841_vm14, %v2842_v16, %v2840_v56  ;;  %v3223_v42 = vsel %vm3221_vm11, %v3222_v61, 0  ;;  %vm3069_vm14 = vcmask 974640   ;;  %vm3307_vm1 = vcmask 255104  }
 0x724   :  { %v2826_v20 = vsel %vm2825_vm13, %v2808_v5, %v2824_v43  ;;  %v2845_v0 = vmul.f32 %v4079_v17, %v3989_v22  ;;  %v2857_v28 = vsel %vm265_vm2, %v2843_v21, 0.0  ;;  %v4054_v5 = vld [vmem:[%s5656_s2 + $0x98] sm:$0xff]   ;;  %vm2994_vm13 = vcmask 556440  }
 0x725   :  { %v4081_v60 = vpop.eup %4080  ;;  %v2829_v3 = vsel %vm2827_vm7, %v2828_v18, %v2826_v20  ;;  %3242 = vmatpush1.bf16.msra.mxu0 %v4054_v5  ;;  %v4056_v17 = vld [vmem:[%s5656_s2 + $0xd8] sm:$0xff]   ;;  %vm3044_vm7 = vcmask 835240   ;;  %vm3321_vm11 = vcmask 386304  }
 0x726   :  { %v2851_v23 = vsel %vm265_vm2, %v2829_v3, 0.0  ;;  %v2831_v11 = vmul.f32 %v4081_v60, %v2811_v7  ;;  %v2847_v4 = vsel %vm2846_vm4, %v3989_v22, %v2845_v0  ;;  %3255 = vmatprep.subr.bf16.mxu0 %v4126_v1  ;;  %v3107_v60 = vld [vmem:[#allocation3 + $0x32] sm:$0xff]  ;;  %vm3124_vm4 = vcmask 203840  }
 0x727   :  { %2852 = vadd.xlane.f32.xlu0 %v2851_v23  ;;  %v2850_v30 = vsel %vm2848_vm3, %v2849_v27, %v2847_v4 }
 0x728   :  { %v2833_v24 = vsel %vm2832_vm15, %v2811_v7, %v2831_v11  ;;  %v2860_v31 = vsel %vm265_vm2, %v2850_v30, 0.0  ;;  %v4055_v7 = vld [vmem:[%s5656_s2 + $0xe0] sm:$0x1f]   ;;  %vm3094_vm15 = vcmask 1048504  }
 0x729   :  { %v2836_v26 = vsel %vm2834_vm5, %v2835_v2, %v2833_v24  ;;  %v3225_v43 = vand.u32 %v4055_v7, %v3223_v42  ;;  %vm3213_vm5 = vcmask 203776  }
 0x72a   :  { %v2854_v29 = vsel %vm265_vm2, %v2836_v26, 0.0 }
 0x72b   :  { %2858 = vadd.xlane.f32.xlu0 %v2857_v28  ;;  %2855 = vadd.xlane.f32.xlu1 %v2854_v29 }
 0x72c   :  { %3256 = vmatpush2.bf16.msra.mxu0 %v3225_v43 }
 0x72d   :  { %3257 = vmatprep.subr.bf16.mxu0 %v4126_v1 }
 0x72f   :  { %2861 = vadd.xlane.f32.xlu0 %v2860_v31 }
 0x730   :  { %3258 = vmatpush2.bf16.msra.mxu0 %v4056_v17 }
 0x73c   :  { %2932 = vrot.lane.b32.xlu1 %v2924_v32, %s4131_s4 }
 0x740   :  { %3088 = vrot.lane.b32.xlu1 %v3077_v33, %s4132_s1 }
 0x7b0   :  { %v2853_v35 = vpop.xlane.xlu0 %2852 }
 0x7b4   :  { %v2859_v36 = vpop.xlane.xlu0 %2858  ;;  %v2856_v37 = vpop.xlane.xlu1 %2855 }
 0x7b5   :  { %v2863_v38 = vadd.f32 %v2856_v37, %v2853_v35 }
 0x7b7   :  { %v2864_v39 = vadd.f32 %v2863_v38, %v2859_v36  ;;  %v2910_v36 = vld [vmem:[%s5662_s6 + $0x10] sm:$0xff]  ;;  %v2909_v38 = vld [vmem:[%s5662_s6 + $0x8] sm:$0xff] }
 0x7b8   :  { %v2862_v40 = vpop.xlane.xlu0 %2861  ;;  %v2933_v45 = vpop.permute.xlu1 %2932 }
 0x7b9   :  { %v2865_v41 = vadd.f32 %v2864_v39, %v2862_v40  ;;  %2945 = vst.msk [vmem:[#allocation4] sm:$0xff] %vm2944_vm9, %v2933_v45  ;;  %v2911_v39 = vld [vmem:[%s5662_s6 + $0x18] sm:$0xff] }
 0x7bb   :  { %v2866_v6 = vrot.slane %v2865_v41, 4 }
 0x7bc   :  { %v5420_v47 = vpop.permute.xlu1 %3088 }
 0x7bd   :  { %v2867_v44 = vadd.f32 %v2866_v6, %v2865_v41  ;;  %3103 = vst.msk [vmem:[#allocation4 + $0x38] sm:$0xff] %vm3096_vm10, %v5420_v47  ;;  %v2908_v41 = vld [vmem:[%s5662_s6] sm:$0xff] }
 0x7bf   :  { %v2868_v9 = vrot.slane %v2867_v44, 2 }
 0x7c1   :  { %v2869_v46 = vadd.f32 %v2868_v9, %v2867_v44 }
 0x7c3   :  { %v2870_v14 = vrot.slane %v2869_v46, 1 }
 0x7c5   :  { %v2871_v50 = vadd.f32 %v2870_v14, %v2869_v46 }
 0x7c7   :  { %v2872_v55 = vmul.f32 0.001953125, %v2871_v50 }
 0x7c9   :  { %2883 = vst.msk [vmem:[#allocation3 + $0x10] sm:$0xff] %vm2882_vm0, %v2872_v55  ;;  %2884 = vst.msk [vmem:[#allocation3 + $0x18] sm:$0xff] %vm2882_vm0, %v2872_v55 }
 0x7ca   :  { %2885 = vst.msk [vmem:[#allocation3 + $0x20] sm:$0xff] %vm2882_vm0, %v2872_v55  ;;  %2886 = vst.msk [vmem:[#allocation3 + $0x28] sm:$0xff] %vm2882_vm0, %v2872_v55 }
 0x7d0   :  { %v2949_v12 = vld [vmem:[#allocation3 + $0xa] sm:$0xff]  ;;  %v2975_v8 = vld [vmem:[#allocation3 + $0x16] sm:$0xff] }
 0x7d1   :  { %v2925_v54 = vld [vmem:[#allocation3 + $0x10] sm:$0xff]  ;;  %2957 = vrot.lane.b32.xlu1 %v2949_v12, %s4133_s3  ;;  %v3050_v52 = vld [vmem:[#allocation3 + $0x1e] sm:$0xff]  ;;  %2922 = vst.msk [vmem:[#allocation4 + $0x20] sm:$0xff] %vm2873_vm8, %v2975_v8  ;;  %v2977_v20 = vld [vmem:[#allocation3 + $0x26] sm:$0xff] }
 0x7d2   :  { %2934 = vrot.lane.b32.xlu0 %v2925_v54, %s4131_s4  ;;  %v2974_v48 = vld [vmem:[#allocation3 + $0xe] sm:$0xff]  ;;  %2923 = vst.msk [vmem:[#allocation4 + $0x30] sm:$0xff] %vm2873_vm8, %v3050_v52  ;;  %v3000_v59 = vld [vmem:[#allocation3 + $0x18] sm:$0xff]  ;;  %v3075_v22 = vld [vmem:[#allocation3 + $0x20] sm:$0xff] }
 0x7d3   :  { %2921 = vst.msk [vmem:[#allocation4 + $0x10] sm:$0xff] %vm2873_vm8, %v2974_v48  ;;  %v2950_v19 = vld [vmem:[#allocation3 + $0x12] sm:$0xff]  ;;  %v3025_v63 = vld [vmem:[#allocation3 + $0x1a] sm:$0xff]  ;;  %v3105_v18 = vld [vmem:[#allocation3 + $0x22] sm:$0xff] }
 0x7d4   :  { %v3002_v56 = vld [vmem:[#allocation3 + $0x28] sm:$0xff] }
 0x7d5   :  { %2959 = vrot.lane.b32.xlu1 %v2950_v19, %s4133_s3  ;;  %v3027_v1 = vld [vmem:[#allocation3 + $0x2a] sm:$0xff] }
 0x7d6   :  { %2982 = vrot.lane.b32.xlu0 %v2974_v48, %s4134_s12  ;;  %v3052_v0 = vld [vmem:[#allocation3 + $0x2e] sm:$0xff] }
 0x7d9   :  { %2984 = vrot.lane.b32.xlu1 %v2975_v8, %s4134_s12 }
 0x7da   :  { %3007 = vrot.lane.b32.xlu0 %v2925_v54, %s4135_s17 }
 0x7dd   :  { %3009 = vrot.lane.b32.xlu1 %v3000_v59, %s4135_s17 }
 0x7de   :  { %3032 = vrot.lane.b32.xlu0 %v2950_v19, %s4136_s21 }
 0x7e1   :  { %3034 = vrot.lane.b32.xlu1 %v3025_v63, %s4136_s21 }
 0x7e2   :  { %3082 = vrot.lane.b32.xlu0 %v3000_v59, %s4132_s1 }
 0x7e5   :  { %3084 = vrot.lane.b32.xlu1 %v3075_v22, %s4132_s1 }
 0x7e6   :  { %3057 = vrot.lane.b32.xlu0 %v2975_v8, %s4137_s8 }
 0x7e9   :  { %3059 = vrot.lane.b32.xlu1 %v3050_v52, %s4137_s8 }
 0x7ea   :  { %3112 = vrot.lane.b32.xlu0 %v3025_v63, %s4139_s9 }
 0x7ed   :  { %3114 = vrot.lane.b32.xlu1 %v3105_v18, %s4139_s9 }
 0x7ee   :  { %2936 = vrot.lane.b32.xlu0 %v3000_v59, %s4131_s4  ;;  %v2912_v59 = vld [vmem:[%s5662_s6 + $0x20] sm:$0xff] }
 0x7f1   :  { %2938 = vrot.lane.b32.xlu1 %v3075_v22, %s4131_s4 }
 0x7f2   :  { %2961 = vrot.lane.b32.xlu0 %v3025_v63, %s4133_s3 }
 0x7f5   :  { %2963 = vrot.lane.b32.xlu1 %v3105_v18, %s4133_s3 }
 0x7f6   :  { %2986 = vrot.lane.b32.xlu0 %v3050_v52, %s4134_s12 }
 0x7f9   :  { %2988 = vrot.lane.b32.xlu1 %v2977_v20, %s4134_s12 }
 0x7fa   :  { %3011 = vrot.lane.b32.xlu0 %v3075_v22, %s4135_s17  ;;  %v2915_v22 = vld [vmem:[%s5662_s6 + $0x38] sm:$0xff] }
 0x7fd   :  { %3013 = vrot.lane.b32.xlu1 %v3002_v56, %s4135_s17 }
 0x7fe   :  { %3036 = vrot.lane.b32.xlu0 %v3105_v18, %s4136_s21 }
 0x801   :  { %3038 = vrot.lane.b32.xlu1 %v3027_v1, %s4136_s21 }
 0x802   :  { %3086 = vrot.lane.b32.xlu0 %v3002_v56, %s4132_s1  ;;  %v2907_v56 = vld [vmem:[%s5656_s2 + $0x170] sm:$0x4] }
 0x805   :  { %3063 = vrot.lane.b32.xlu1 %v3052_v0, %s4137_s8  ;;  %v3152_v0 = vsub.s32 4, %v4227_v13 }
 0x806   :  { %3061 = vrot.lane.b32.xlu0 %v2977_v20, %s4137_s8 }
 0x809   :  { %3118 = vrot.lane.b32.xlu1 %v3107_v60, %s4139_s9 }
 0x80a   :  { %3116 = vrot.lane.b32.xlu0 %v3027_v1, %s4139_s9  ;;  %v3149_v1 = vunpack.c.l.bf16 %v2907_v56 }
 0x80c   :  { %v3153_v60 = vrot.slane %v3149_v1, %v3152_v0 }
 0x843   :  { %v2958_v16 = vpop.permute.xlu1 %2957 }
 0x844   :  { %v2935_v3 = vpop.permute.xlu0 %2934  ;;  %2970 = vst.msk [vmem:[#allocation4] sm:$0xff] %vm2969_vm12, %v2958_v16 }
 0x845   :  { %2946 = vst.msk [vmem:[#allocation4 + $0x10] sm:$0xff] %vm2944_vm9, %v2935_v3 }
 0x847   :  { %v2960_v11 = vpop.permute.xlu1 %2959 }
 0x848   :  { %v2983_v23 = vpop.permute.xlu0 %2982  ;;  %2971 = vst.msk [vmem:[#allocation4 + $0x10] sm:$0xff] %vm2969_vm12, %v2960_v11 }
 0x849   :  { %2995 = vst.msk [vmem:[#allocation4] sm:$0xff] %vm2994_vm13, %v2983_v23 }
 0x84b   :  { %v2985_v2 = vpop.permute.xlu1 %2984 }
 0x84c   :  { %v3008_v21 = vpop.permute.xlu0 %3007  ;;  %2996 = vst.msk [vmem:[#allocation4 + $0x10] sm:$0xff] %vm2994_vm13, %v2985_v2 }
 0x84d   :  { %3020 = vst.msk [vmem:[#allocation4] sm:$0xff] %vm3019_vm6, %v3008_v21 }
 0x84f   :  { %v3010_v4 = vpop.permute.xlu1 %3009 }
 0x850   :  { %v3033_v24 = vpop.permute.xlu0 %3032  ;;  %3021 = vst.msk [vmem:[#allocation4 + $0x10] sm:$0xff] %vm3019_vm6, %v3010_v4 }
 0x851   :  { %3045 = vst.msk [vmem:[#allocation4] sm:$0xff] %vm3044_vm7, %v3033_v24 }
 0x853   :  { %v3035_v27 = vpop.permute.xlu1 %3034 }
 0x854   :  { %v3083_v26 = vpop.permute.xlu0 %3082  ;;  %3046 = vst.msk [vmem:[#allocation4 + $0x10] sm:$0xff] %vm3044_vm7, %v3035_v27 }
 0x855   :  { %3097 = vst.msk [vmem:[#allocation4 + $0x8] sm:$0xff] %vm3096_vm10, %v3083_v26 }
 0x857   :  { %v3085_v29 = vpop.permute.xlu1 %3084 }
 0x858   :  { %v3058_v28 = vpop.permute.xlu0 %3057  ;;  %3099 = vst.msk [vmem:[#allocation4 + $0x18] sm:$0xff] %vm3096_vm10, %v3085_v29 }
 0x859   :  { %3070 = vst.msk [vmem:[#allocation4] sm:$0xff] %vm3069_vm14, %v3058_v28 }
 0x85a   :  { %3095 = vst.msk [vmem:[#allocation4] sm:$0xff] %vm3094_vm15, %v3083_v26 }
 0x85b   :  { %v3060_v31 = vpop.permute.xlu1 %3059 }
 0x85c   :  { %v3113_v30 = vpop.permute.xlu0 %3112  ;;  %3071 = vst.msk [vmem:[#allocation4 + $0x10] sm:$0xff] %vm3069_vm14, %v3060_v31 }
 0x85d   :  { %3125 = vst.msk [vmem:[#allocation4 + $0x8] sm:$0xff] %vm3124_vm4, %v3113_v30 }
 0x85e   :  { %3098 = vst.msk [vmem:[#allocation4 + $0x10] sm:$0xff] %vm3094_vm15, %v3085_v29 }
 0x85f   :  { %v3115_v33 = vpop.permute.xlu1 %3114 }
 0x860   :  { %v2937_v32 = vpop.permute.xlu0 %2936  ;;  %3126 = vst.msk [vmem:[#allocation4 + $0x18] sm:$0xff] %vm3124_vm4, %v3115_v33 }
 0x861   :  { %2947 = vst.msk [vmem:[#allocation4 + $0x20] sm:$0xff] %vm2944_vm9, %v2937_v32  ;;  %v3129_v6 = vld [vmem:[#allocation4] sm:$0xff] }
 0x862   :  { %v3137_v50 = vmul.f32 %v3129_v6, %v2908_v41  ;;  %v4057_v6 = vld [vmem:[%s5656_s2 + $0x160] sm:$0xff]  }
 0x863   :  { %v2939_v35 = vpop.permute.xlu1 %2938  ;;  %3886 = vmatprep.subr.bf16.mxu1 %v4057_v6 }
 0x864   :  { %v2962_v34 = vpop.permute.xlu0 %2961  ;;  %2948 = vst.msk [vmem:[#allocation4 + $0x30] sm:$0xff] %vm2944_vm9, %v2939_v35  ;;  %v3130_v40 = vld [vmem:[#allocation4 + $0x8] sm:$0xff]  ;;  %vm3293_vm9 = vcmask 123904  }
 0x865   :  { %2972 = vst.msk [vmem:[#allocation4 + $0x20] sm:$0xff] %vm2969_vm12, %v2962_v34  ;;  %v3131_v37 = vld [vmem:[#allocation4 + $0x10] sm:$0xff]  ;;  %v3138_v14 = vmul.f32 %v3130_v40, %v2909_v38 }
 0x866   :  { %v3139_v46 = vmul.f32 %v3131_v37, %v2910_v36 }
 0x867   :  { %v2964_v45 = vpop.permute.xlu1 %2963  ;;  %v3132_v9 = vld [vmem:[#allocation4 + $0x18] sm:$0xff] }
 0x868   :  { %v2987_v44 = vpop.permute.xlu0 %2986  ;;  %2973 = vst.msk [vmem:[#allocation4 + $0x30] sm:$0xff] %vm2969_vm12, %v2964_v45  ;;  %v3140_v49 = vmul.f32 %v3132_v9, %v2911_v39  ;;  %v3145_v12 = vpack.c.bf16 %v3139_v46, %v3137_v50  ;;  %v4060_v50 = vld [vmem:[%s5656_s2 + $0x118] sm:$0xff]   ;;  %vm3335_vm12 = vcmask 517504  }
 0x869   :  { %2997 = vst.msk [vmem:[#allocation4 + $0x20] sm:$0xff] %vm2994_vm13, %v2987_v44  ;;  %v4058_v44 = vld [vmem:[%s5656_s2 + $0x120] sm:$0xff]  }
 0x86a   :  { %v3146_v55 = vpack.c.bf16 %v3140_v49, %v3138_v14  ;;  %3887 = vmatpush3.bf16.msra.mxu1 %v4058_v44  ;;  %v4059_v49 = vld [vmem:[%s5656_s2 + $0x158] sm:$0xff]  }
 0x86b   :  { %v2989_v51 = vpop.permute.xlu1 %2988  ;;  %3888 = vmatprep.subr.bf16.mxu1 %v4059_v49 }
 0x86c   :  { %v3012_v53 = vpop.permute.xlu0 %3011  ;;  %2998 = vst.msk [vmem:[#allocation4 + $0x30] sm:$0xff] %vm2994_vm13, %v2989_v51  ;;  %3811 = vmatprep.mubr.msk.bf16.mxu0 %vm3213_vm5, %v3146_v55  ;;  %v4061_v51 = vld [vmem:[%s5656_s2 + $0x150] sm:$0xff]   ;;  %vm3349_vm13 = vcmask 648704  }
 0x86d   :  { %3022 = vst.msk [vmem:[#allocation4 + $0x20] sm:$0xff] %vm3019_vm6, %v3012_v53  ;;  %3260 = vmatmul.mubr.bf16.vlgmr.msra.gmra.mxu0 %v3145_v12  ;;  %v4062_v12 = vld [vmem:[%s5656_s2 + $0x110] sm:$0xff]  }
 0x86e   :  { %3889 = vmatpush3.bf16.msra.mxu1 %v4060_v50 }
 0x86f   :  { %v3014_v48 = vpop.permute.xlu1 %3013  ;;  %3890 = vmatprep.subr.bf16.mxu1 %v4061_v51 }
 0x870   :  { %v3037_v54 = vpop.permute.xlu0 %3036  ;;  %3023 = vst.msk [vmem:[#allocation4 + $0x30] sm:$0xff] %vm3019_vm6, %v3014_v48  ;;  %v4063_v48 = vld [vmem:[%s5656_s2 + $0x148] sm:$0xff]   ;;  %vm3363_vm6 = vcmask 779904  }
 0x871   :  { %3047 = vst.msk [vmem:[#allocation4 + $0x20] sm:$0xff] %vm3044_vm7, %v3037_v54 }
 0x872   :  { %3891 = vmatpush3.bf16.msra.mxu1 %v4062_v12 }
 0x873   :  { %v3039_v52 = vpop.permute.xlu1 %3038  ;;  %3892 = vmatprep.subr.bf16.mxu1 %v4063_v48 }
 0x874   :  { %v3087_v8 = vpop.permute.xlu0 %3086  ;;  %3048 = vst.msk [vmem:[#allocation4 + $0x30] sm:$0xff] %vm3044_vm7, %v3039_v52  ;;  %vm3377_vm7 = vcmask 911104  }
 0x875   :  { %3101 = vst.msk [vmem:[#allocation4 + $0x28] sm:$0xff] %vm3096_vm10, %v3087_v8 }
 0x877   :  { %v3064_v57 = vpop.permute.xlu1 %3063 }
 0x878   :  { %v3062_v19 = vpop.permute.xlu0 %3061  ;;  %3073 = vst.msk [vmem:[#allocation4 + $0x30] sm:$0xff] %vm3069_vm14, %v3064_v57  ;;  %v4066_v57 = vld [vmem:[%s5656_s2 + $0x100] sm:$0xff]  }
 0x879   :  { %3072 = vst.msk [vmem:[#allocation4 + $0x20] sm:$0xff] %vm3069_vm14, %v3062_v19  ;;  %v4065_v19 = vld [vmem:[%s5656_s2 + $0x140] sm:$0xff]   ;;  %vm3391_vm14 = vcmask 1042304  }
 0x87a   :  { %3100 = vst.msk [vmem:[#allocation4 + $0x20] sm:$0xff] %vm3094_vm15, %v3087_v8  ;;  %3102 = vst.msk [vmem:[#allocation4 + $0x30] sm:$0xff] %vm3094_vm15, %v5420_v47  ;;  %v2913_v47 = vld [vmem:[%s5662_s6 + $0x28] sm:$0xff]  ;;  %vm4140_vm15 = vmmov 0  }
 0x87b   :  { %v3119_v58 = vpop.permute.xlu1 %3118  ;;  %v4064_v8 = vld [vmem:[%s5656_s2 + $0x108] sm:$0xff]  }
 0x87c   :  { %v3117_v25 = vpop.permute.xlu0 %3116  ;;  %3128 = vst.msk [vmem:[#allocation4 + $0x38] sm:$0xff] %vm3124_vm4, %v3119_v58  ;;  %3893 = vmatpush3.bf16.msra.mxu1 %v4064_v8  ;;  %v4067_v58 = vld [vmem:[%s5656_s2 + $0x138] sm:$0xff]  }
 0x87d   :  { %3127 = vst.msk [vmem:[#allocation4 + $0x28] sm:$0xff] %vm3124_vm4, %v3117_v25  ;;  %3894 = vmatprep.subr.bf16.mxu1 %v4065_v19 }
 0x880   :  { %3895 = vmatpush3.bf16.msra.mxu1 %v4066_v57 }
 0x881   :  { %v3133_v63 = vld [vmem:[#allocation4 + $0x20] sm:$0xff]  ;;  %v3135_v5 = vld [vmem:[#allocation4 + $0x30] sm:$0xff]  ;;  %3896 = vmatprep.subr.bf16.mxu1 %v4067_v58 }
 0x882   :  { %v3141_v61 = vmul.f32 %v3133_v63, %v2912_v59  ;;  %v3143_v42 = vmul.f32 %v3135_v5, %v2914_v62  ;;  %v4068_v59 = vld [vmem:[%s5656_s2 + $0xf8] sm:$0xff]   ;;  %v4069_v62 = vld [vmem:[%s5656_s2 + $0x130] sm:$0xff]  }
 0x883   :  { %v3136_v15 = vld [vmem:[#allocation4 + $0x38] sm:$0xff]  ;;  %v4070_v5 = vld [vmem:[%s5656_s2 + $0xf0] sm:$0xff]  }
 0x884   :  { %v3134_v7 = vld [vmem:[#allocation4 + $0x28] sm:$0xff]  ;;  %v3144_v17 = vmul.f32 %v3136_v15, %v2915_v22  ;;  %v3147_v20 = vpack.c.bf16 %v3143_v42, %v3141_v61  ;;  %3897 = vmatpush3.bf16.msra.mxu1 %v4068_v59 }
 0x885   :  { %v3142_v43 = vmul.f32 %v3134_v7, %v2913_v47  ;;  %3898 = vmatprep.subr.bf16.mxu1 %v4069_v62  ;;  %v4071_v47 = vld [vmem:[%s5656_s2 + $0x128] sm:$0xff]  }
 0x886   :  { %v4072_v7 = vld [vmem:[%s5656_s2 + $0xe8] sm:$0xff]  }
 0x887   :  { %v3148_v18 = vpack.c.bf16 %v3144_v17, %v3142_v43 }
 0x888   :  { %3899 = vmatpush3.bf16.msra.mxu1 %v4070_v5 }
 0x889   :  { %3812 = vmatprep.mubr.msk.bf16.mxu0 %vm3213_vm5, %v3148_v18  ;;  %3900 = vmatprep.subr.bf16.mxu1 %v4071_v47  ;;  %vm3735_vm5 = vcmask 1024  }
 0x88a   :  { %3268 = vmatmul.mubr.bf16.gmra.mxu0 %v3147_v20 }
 0x88c   :  { %3901 = vmatpush3.bf16.msra.mxu1 %v4072_v7 }
 0x88d   :  { %3990 = vmatprep.subr.bf16.mxu1 %v4122_v10 }
 0x92d   :  { %v3261_v3 = vpop.f32.mrf.mxu0 }
 0x92e   :  { %v3262_v16 = vadd.f32 %v3261_v3, %v3153_v60 }
 0x92f   :  { %v3263_v23 = vpop.f32.mrf.mxu0 }
 0x930   :  { %vm3276_vm3 = vcmp.ge.f32.partialorder %v3262_v16, 0.0  ;;  %v3280_v11 = vmul.f32 0.2, %v3262_v16 }
 0x931   :  { %v3264_v21 = vpop.f32.mrf.mxu0 }
 0x932   :  { %v3284_v2 = vsel %vm3276_vm3, %v3262_v16, %v3280_v11  ;;  %v3265_v24 = vadd.f32 %v3264_v21, %v3153_v60 }
 0x933   :  { %3288 = vst.msk [vmem:[#allocation3 + $0x10] sm:$0xff] %vm265_vm2, %v3284_v2  ;;  %v3266_v4 = vpop.f32.mrf.mxu0 }
 0x934   :  { %vm3277_vm8 = vcmp.ge.f32.partialorder %v3265_v24, 0.0  ;;  %v3281_v26 = vmul.f32 0.2, %v3265_v24 }
 0x936   :  { %v3285_v27 = vsel %vm3277_vm8, %v3265_v24, %v3281_v26  ;;  %v4073_v26 = vld [vmem:[%s5656_s2 + $0x168] sm:$0xff]  }
 0x937   :  { %3289 = vst.msk [vmem:[#allocation3 + $0x18] sm:$0xff] %vm265_vm2, %v3285_v27  ;;  %v3532_v27 = vld [vmem:[%s5656_s2 + $0x170] sm:$0x4] }
 0x93a   :  { %v3813_v28 = vld.sshfl [vmem:[#allocation3 + $0x12] sm:$0x3 pattern:$0x76325410]  ;;  %v3292_v29 = vld [vmem:[#allocation3 + $0x10] sm:$0x3] }
 0x93b   :  { %3304 = vrot.lane.b32.xlu0 %v3813_v28, %s4123_s19  ;;  %3294 = vst.msk [vmem:[#allocation5] sm:$0x3] %vm3293_vm9, %v3292_v29  ;;  %v3814_v30 = vld.sshfl [vmem:[#allocation3 + $0x14] sm:$0x3 pattern:$0x76325410]  ;;  %v3533_v28 = vunpack.c.l.bf16 %v3532_v27 }
 0x93c   :  { %v3815_v31 = vld.sshfl [vmem:[#allocation3 + $0x16] sm:$0x3 pattern:$0x76325410]  ;;  %v3536_v29 = vsub.s32 5, %v4227_v13 }
 0x93e   :  { %v3816_v32 = vld.sshfl [vmem:[#allocation3 + $0x18] sm:$0x3 pattern:$0x76325410] }
 0x93f   :  { %3318 = vrot.lane.b32.xlu0 %v3814_v30, %s4127_s26  ;;  %v3817_v35 = vld.sshfl [vmem:[#allocation3 + $0x1a] sm:$0x3 pattern:$0x76325410] }
 0x940   :  { %v3818_v41 = vld.sshfl [vmem:[#allocation3 + $0x1c] sm:$0x3 pattern:$0x76325410] }
 0x941   :  { %v3819_v14 = vld.sshfl [vmem:[#allocation3 + $0x1e] sm:$0x3 pattern:$0x76325410] }
 0x943   :  { %3332 = vrot.lane.b32.xlu0 %v3815_v31, %s4128_s27  ;;  %v3537_v31 = vrot.slane %v3533_v28, %v3536_v29 }
 0x947   :  { %3346 = vrot.lane.b32.xlu0 %v3816_v32, %s4125_s23 }
 0x94a   :  { %v3269_v33 = vpop.f32.mrf.mxu0 }
 0x94b   :  { %v3270_v34 = vadd.f32 %v3269_v33, %v3153_v60  ;;  %3360 = vrot.lane.b32.xlu0 %v3817_v35, %s4129_s13 }
 0x94c   :  { %v3271_v36 = vpop.f32.mrf.mxu0 }
 0x94d   :  { %vm3278_vm10 = vcmp.ge.f32.partialorder %v3270_v34, 0.0  ;;  %v3282_v37 = vmul.f32 0.2, %v3270_v34 }
 0x94e   :  { %v3272_v38 = vpop.f32.mrf.mxu0 }
 0x94f   :  { %v3286_v39 = vsel %vm3278_vm10, %v3270_v34, %v3282_v37  ;;  %v3273_v40 = vadd.f32 %v3272_v38, %v3153_v60  ;;  %3374 = vrot.lane.b32.xlu0 %v3818_v41, %s4130_s16  ;;  %v3684_v41 = vsub.s32 6, %v4227_v13 }
 0x950   :  { %3290 = vst.msk [vmem:[#allocation3 + $0x20] sm:$0xff] %vm265_vm2, %v3286_v39  ;;  %v3274_v45 = vpop.f32.mrf.mxu0 }
 0x951   :  { %vm3279_vm0 = vcmp.ge.f32.partialorder %v3273_v40, 0.0  ;;  %v3283_v9 = vmul.f32 0.2, %v3273_v40 }
 0x953   :  { %v3287_v46 = vsel %vm3279_vm0, %v3273_v40, %v3283_v9  ;;  %3388 = vrot.lane.b32.xlu0 %v3819_v14, %s4124_s22 }
 0x954   :  { %3291 = vst.msk [vmem:[#allocation3 + $0x28] sm:$0xff] %vm265_vm2, %v3287_v46 }
 0x957   :  { %v3820_v55 = vld.sshfl [vmem:[#allocation3 + $0x22] sm:$0x3 pattern:$0x76325410]  ;;  %v3393_v53 = vld [vmem:[#allocation3 + $0x20] sm:$0x3] }
 0x958   :  { %3404 = vrot.lane.b32.xlu1 %v3820_v55, %s4123_s19  ;;  %3394 = vst.msk [vmem:[#allocation5 + $0x2] sm:$0x3] %vm3293_vm9, %v3393_v53  ;;  %v3821_v54 = vld.sshfl [vmem:[#allocation3 + $0x24] sm:$0x3 pattern:$0x76325410] }
 0x959   :  { %v3822_v52 = vld.sshfl [vmem:[#allocation3 + $0x26] sm:$0x3 pattern:$0x76325410] }
 0x95b   :  { %v3823_v25 = vld.sshfl [vmem:[#allocation3 + $0x28] sm:$0x3 pattern:$0x76325410] }
 0x95c   :  { %3417 = vrot.lane.b32.xlu1 %v3821_v54, %s4127_s26  ;;  %v3824_v63 = vld.sshfl [vmem:[#allocation3 + $0x2a] sm:$0x3 pattern:$0x76325410] }
 0x95d   :  { %v3825_v22 = vld.sshfl [vmem:[#allocation3 + $0x2c] sm:$0x3 pattern:$0x76325410] }
 0x95e   :  { %v3826_v15 = vld.sshfl [vmem:[#allocation3 + $0x2e] sm:$0x3 pattern:$0x76325410] }
 0x960   :  { %3430 = vrot.lane.b32.xlu1 %v3822_v52, %s4128_s27 }
 0x964   :  { %3443 = vrot.lane.b32.xlu1 %v3823_v25, %s4125_s23 }
 0x968   :  { %3456 = vrot.lane.b32.xlu1 %v3824_v63, %s4129_s13 }
 0x96c   :  { %3469 = vrot.lane.b32.xlu1 %v3825_v22, %s4130_s16 }
 0x970   :  { %3482 = vrot.lane.b32.xlu1 %v3826_v15, %s4124_s22 }
 0x9ad   :  { %v3305_v61 = vpop.permute.xlu0 %3304 }
 0x9ae   :  { %3308 = vst.msk [vmem:[#allocation5] sm:$0x3] %vm3307_vm1, %v3305_v61 }
 0x9b1   :  { %v3319_v42 = vpop.permute.xlu0 %3318 }
 0x9b2   :  { %3322 = vst.msk [vmem:[#allocation5] sm:$0x3] %vm3321_vm11, %v3319_v42 }
 0x9b5   :  { %v3333_v43 = vpop.permute.xlu0 %3332 }
 0x9b6   :  { %3336 = vst.msk [vmem:[#allocation5] sm:$0x3] %vm3335_vm12, %v3333_v43 }
 0x9b9   :  { %v3347_v17 = vpop.permute.xlu0 %3346 }
 0x9ba   :  { %3350 = vst.msk [vmem:[#allocation5] sm:$0x3] %vm3349_vm13, %v3347_v17 }
 0x9bd   :  { %v3361_v18 = vpop.permute.xlu0 %3360 }
 0x9be   :  { %3364 = vst.msk [vmem:[#allocation5] sm:$0x3] %vm3363_vm6, %v3361_v18 }
 0x9c1   :  { %v3375_v20 = vpop.permute.xlu0 %3374 }
 0x9c2   :  { %3378 = vst.msk [vmem:[#allocation5] sm:$0x3] %vm3377_vm7, %v3375_v20 }
 0x9c5   :  { %v3389_v56 = vpop.permute.xlu0 %3388 }
 0x9c6   :  { %3392 = vst.msk [vmem:[#allocation5] sm:$0x3] %vm3391_vm14, %v3389_v56 }
 0x9ca   :  { %v3405_v1 = vpop.permute.xlu1 %3404 }
 0x9cb   :  { %3407 = vst.msk [vmem:[#allocation5 + $0x2] sm:$0x3] %vm3307_vm1, %v3405_v1 }
 0x9ce   :  { %v3418_v0 = vpop.permute.xlu1 %3417 }
 0x9cf   :  { %3420 = vst.msk [vmem:[#allocation5 + $0x2] sm:$0x3] %vm3321_vm11, %v3418_v0 }
 0x9d2   :  { %v3431_v60 = vpop.permute.xlu1 %3430 }
 0x9d3   :  { %3433 = vst.msk [vmem:[#allocation5 + $0x2] sm:$0x3] %vm3335_vm12, %v3431_v60 }
 0x9d6   :  { %v3444_v3 = vpop.permute.xlu1 %3443 }
 0x9d7   :  { %3446 = vst.msk [vmem:[#allocation5 + $0x2] sm:$0x3] %vm3349_vm13, %v3444_v3 }
 0x9da   :  { %v3457_v16 = vpop.permute.xlu1 %3456 }
 0x9db   :  { %3459 = vst.msk [vmem:[#allocation5 + $0x2] sm:$0x3] %vm3363_vm6, %v3457_v16 }
 0x9de   :  { %v3470_v23 = vpop.permute.xlu1 %3469 }
 0x9df   :  { %3472 = vst.msk [vmem:[#allocation5 + $0x2] sm:$0x3] %vm3377_vm7, %v3470_v23 }
 0x9e2   :  { %v3483_v11 = vpop.permute.xlu1 %3482 }
 0x9e3   :  { %3485 = vst.msk [vmem:[#allocation5 + $0x2] sm:$0x3] %vm3391_vm14, %v3483_v11 }
 0x9ea   :  { %v3827_v21 = vld.sshfl [vmem:[#allocation5] sm:$0x33 pattern:$0x76325410] }
 0x9eb   :  { %v3527_v2 = vcombine.high %v3827_v21, %v3827_v21  ;;  %v3530_v4 = vpack.c.bf16 %v3827_v21, %v3827_v21 }
 0x9ed   :  { %v3531_v24 = vpack.c.bf16 %v3527_v2, %v3527_v2 }
 0x9ef   :  { %3666 = vmatprep.mubr.bf16.mxu1 %v3531_v24 }
 0x9f0   :  { %3667 = vmatmul.mubr.bf16.vlgmr.msra.gmra.mxu1 %v3530_v4 }
 0x9f1   :  { %3992 = vmatprep.mubr.msk.bf16.mxu1 %vm4140_vm15, %v4122_v10  ;;  %3991 = vmatpush3.bf16.msra.mxu1 %v4073_v26  ;;  %v3680_v10 = vld [vmem:[%s5656_s2 + $0x170] sm:$0x8] }
 0x9f2   :  { %v3681_v40 = vunpack.c.l.bf16 %v3680_v10 }
 0x9f4   :  { %v3685_v6 = vrot.slane %v3681_v40, %v3684_v41 }
 0xab0   :  { %v3902_v30 = vpop.f32.mrf.mxu1 }
 0xab2   :  { %v3903_v32 = vpop.f32.mrf.mxu1 }
 0xab3   :  { %v3904_v33 = vadd.f32 %v3903_v32, %v3902_v30 }
 0xab4   :  { %v3905_v34 = vpop.f32.mrf.mxu1 }
 0xab5   :  { %v3669_v35 = vadd.f32 %v3904_v33, %v3537_v31 }
 0xab6   :  { %v3906_v36 = vpop.f32.mrf.mxu1 }
 0xab7   :  { %vm3674_vm4 = vcmp.ge.f32.partialorder %v3669_v35, 0.0  ;;  %v3675_v37 = vmul.f32 0.2, %v3669_v35 }
 0xab9   :  { %v3676_v38 = vsel %vm3674_vm4, %v3669_v35, %v3675_v37 }
 0xaba   :  { %v3679_v39 = vpack.c.bf16 %v3676_v38, %v3676_v38 }
 0xabc   :  { %3993 = vmatmul.mubr.msk.bf16.vlgmr.msra.gmra.mxu1 %vm265_vm2, %v3679_v39 }
 0xb7c   :  { %v3729_v44 = vpop.f32.mrf.mxu1 }
 0xb7d   :  { %v3730_v45 = vadd.f32 %v3729_v44, %v3685_v6 }
 0xb7e   :  { %v3994_v9 = vpop.f32.mrf.mxu1 }
 0xb7f   :  { %3736 = vst.msk [vmem:[%s5663_s7] sm:$0x3] %vm3735_vm5, %v3730_v45 }
 0xb80   :  { %v3732_v46 = vpop.f32.mrf.mxu1 }
 0xb82   :  { %v3995_v14 = vpop.f32.mrf.mxu1 }

</bundles_post_ra>
